<compile_context>
chip_gen: v7x
topology: tpu7x:2x2x1
jax: 0.10.0
libtpu: 0.0.40
codegen_flags: <defaults>
</compile_context>

<pallas_src>
from collections import namedtuple
import math

import numpy as np
import jax
import jax.numpy as jnp
from jax.experimental import pallas as pl
from jax.experimental.pallas import tpu as pltpu

# ---------------- problem sizes ----------------
B, N, K = 2, 8, 4            # batch, nodes, neighbours per node
D0 = 4                       # channels per degree (fiber_in == fiber_out == (4, 4))
H = 16                       # radial_hidden_dim
LI = D0                      # nc_in of every Radial
LO = 2                       # nc_out of every Radial (split_num_into_groups(4, 2))
NE = B * N                   # node slots
E = B * N * K                # edges
EPS = 1e-5                   # F.layer_norm default eps
PREC = jax.lax.Precision.HIGHEST

FEAT = 1 + D0 + 3 * D0 + 9   # per-edge input row:  [rel | x0 | x1 | D]  = 26
OUTW = D0 + 3 * D0           # per-edge output row: [out0 | out1]        = 16
NROT = 9 * D0                # D-rotation product columns (g, m2, m1)    = 36
NQ = 6 * LO                  # li-contraction output slots               = 12
NPROD = NQ * LI              # li-contraction product columns            = 48

EdgeInfo = namedtuple('EdgeInfo', ['neighbor_indices', 'neighbor_mask', 'edges'])


def _detect_grid_steps():
    """1 grid step on single-TensorCore v5e/v6e; 2 'parallel' steps on 2-TC v7x."""
    try:
        kind = jax.devices()[0].device_kind.lower()
    except Exception:
        return 1
    return 2 if ('v7' in kind or '7x' in kind) else 1


GRID_STEPS = _detect_grid_steps()


# ===================== Pallas kernels =====================

def _dtp_edge_kernel(ef_ref,
                     w1e_ref, b1_ref, g1_ref, w2_ref, b2_ref, g2_ref,
                     w3e_ref, b3e_ref, avg_ref,
                     exx1_ref, ed1_ref, ed2_ref, ex0_ref, exr_ref, expre_ref,
                     es1_ref, es0w_ref, es2b_ref, es3w_ref,
                     out_ref):
    """Per-edge DTP hot path for fiber (4,4)->(4,4).  One (TE,16) store per tile."""
    ef = ef_ref[...]                                   # (TE, 26) = [rel | x0 | x1 | D]

    def mm(a, b):
        return jnp.dot(a, b, precision=PREC, preferred_element_type=jnp.float32)

    def silu(h):
        return h * jax.nn.sigmoid(h)

    avg = avg_ref[...]                                 # (64,64) per-Radial block averaging

    def group_ln(h, g):                                # F.layer_norm per 16-wide Radial group
        mu = mm(h, avg)
        d = h - mu
        var = mm(d * d, avg)
        return d * jax.lax.rsqrt(var + EPS) * g

    # ---- all 4 Radial MLPs fused into one 64-wide stack ----
    h = mm(ef, w1e_ref[...]) + b1_ref[...]             # Linear(1,H) x4        -> (TE, 64)
    h = group_ln(silu(h), g1_ref[...])
    h = mm(h, w2_ref[...]) + b2_ref[...]               # block-diag Linear(H,H) x4
    h = group_ln(silu(h), g2_ref[...])
    r = mm(h, w3e_ref[...]) + b3e_ref[...]             # (TE, 48): R duplicated per (slot, li)

    # ---- rotate degree-1 inputs:  xr[li,m2] = sum_m1 x1[li,m1] * D[m1,m2] ----
    xr = mm(mm(ef, exx1_ref[...]) * mm(ef, ed1_ref[...]), es1_ref[...])        # (TE, 12)

    # ---- contract R against inputs over li (m centering slice/pad baked into consts) ----
    prod = r * (mm(ef, ex0_ref[...]) + mm(xr, exr_ref[...]))                   # (TE, 48)
    pre1 = mm(prod, es2b_ref[...])                                             # (TE, 12)

    # ---- apply output Wigner-D: out1[lo,m2] = sum_m1 pre1[lo,m1] * D[m2,m1] ----
    out1 = mm(mm(pre1, expre_ref[...]) * mm(ef, ed2_ref[...]), es3w_ref[...])  # cols 4..15
    out_ref[...] = mm(prod, es0w_ref[...]) + out1      # single lane-merged store [out0|out1]


def _pool_out_kernel(v_ref, mask_ref, inp_ref, mexp_ref, msum_ref, wout_ref, wsi_ref,
                     out_ref):
    """masked_mean over neighbours + project_out + self-interaction, single store."""
    def mm(a, b):
        return jnp.dot(a, b, precision=PREC, preferred_element_type=jnp.float32)

    m = mask_ref[...]                                  # (TN, K) in {0., 1.}
    masked = v_ref[...] * mm(m, mexp_ref[...])         # (TN, K*16) mask broadcast per column
    summed = mm(masked, msum_ref[...])                 # (TN, 16) sum over neighbours
    cnt = jnp.sum(m, axis=-1, keepdims=True)           # (TN, 1)
    pooled = summed * pl.reciprocal(jnp.maximum(cnt, 1.0), approx=True)
    out_ref[...] = mm(pooled, wout_ref[...]) + mm(inp_ref[...], wsi_ref[...])


# ===================== constant selection matrices =====================

def _edge_constants():
    """0/1 matrices that turn the per-edge tensor product into lane-dense elementwise
    products + tiny constant matmuls.

    Column conventions:
      * D-rotation products:     c = g*9 + m2*3 + m1      (g: channel 0..3)
      * li-contraction products: c = q*LI + li            (q: output slot 0..11)
    """
    OX1 = 1 + D0              # x1 offset inside ef
    OD = 1 + D0 + 3 * D0      # Wigner-D offset inside ef

    EXg = np.zeros((3 * D0, NROT), np.float32)    # picks v[g*3+m1]  (v = x1 or pre1)
    ED1 = np.zeros((FEAT, NROT), np.float32)      # picks D[m1,m2]   (input rotation)
    ED2 = np.zeros((FEAT, NROT), np.float32)      # picks D[m2,m1]   (output rotation)
    ES1 = np.zeros((NROT, 3 * D0), np.float32)    # sum over m1 -> col g*3+m2
    ES3w = np.zeros((NROT, OUTW), np.float32)     # same sum, placed at out cols 4+g*3+m2
    for g in range(D0):
        for m2 in range(3):
            for m1 in range(3):
                c = g * 9 + m2 * 3 + m1
                EXg[g * 3 + m1, c] = 1.0
                ED1[OD + m1 * 3 + m2, c] = 1.0
                ED2[OD + m2 * 3 + m1, c] = 1.0
                ES1[c, g * 3 + m2] = 1.0
                ES3w[c, D0 + g * 3 + m2] = 1.0
    EXx1 = np.zeros((FEAT, NROT), np.float32)     # EXg, but reading x1 out of ef
    EXx1[OX1:OX1 + 3 * D0, :] = EXg

    # 12 li-contraction output slots q (ordering matches the torch chunk concat):
    #   q = 0..1   pair (0,0): out0[lo]        = sum_li R00[lo,li] * x0[li]
    #   q = 2..3   pair (1,0): out0[2+lo]      = sum_li R10[lo,li] * xr[li, m=1]  (slice to centre)
    #   q = 4..5   pair (0,1): pre1[lo,  m=1]  = sum_li R01[lo,li] * x0[li]       (pad to centre)
    #   q = 6..11  pair (1,1): pre1[2+lo, m]   = sum_li R11[lo,li] * xr[li, m]
    ER = np.zeros((4 * LO * LI, NPROD), np.float32)
    EX0 = np.zeros((FEAT, NPROD), np.float32)
    EXr = np.zeros((3 * D0, NPROD), np.float32)
    ES0w = np.zeros((NPROD, OUTW), np.float32)    # out0 -> out cols 0..3
    ES2b = np.zeros((NPROD, 3 * D0), np.float32)  # pre1 (m-centering zeros built in)
    for lo in range(LO):
        for li in range(LI):
            c = lo * LI + li                                    # pair (0,0)
            ER[0 * LO * LI + lo * LI + li, c] = 1.0
            EX0[1 + li, c] = 1.0
            ES0w[c, lo] = 1.0
            c = (2 + lo) * LI + li                              # pair (1,0)
            ER[1 * LO * LI + lo * LI + li, c] = 1.0
            EXr[li * 3 + 1, c] = 1.0
            ES0w[c, LO + lo] = 1.0
            c = (4 + lo) * LI + li                              # pair (0,1)
            ER[2 * LO * LI + lo * LI + li, c] = 1.0
            EX0[1 + li, c] = 1.0
            ES2b[c, lo * 3 + 1] = 1.0
            for m in range(3):                                  # pair (1,1)
                c = (6 + lo * 3 + m) * LI + li
                ER[3 * LO * LI + lo * LI + li, c] = 1.0
                EXr[li * 3 + m, c] = 1.0
                ES2b[c, (LO + lo) * 3 + m] = 1.0
    return dict(EXx1=EXx1, ED1=ED1, ED2=ED2, ES1=ES1, ES3w=ES3w, EXg=EXg,
                ER=ER, EX0=EX0, EXr=EXr, ES0w=ES0w, ES2b=ES2b)


def _block_diag(blocks):
    rows = sum(b.shape[0] for b in blocks)
    cols = sum(b.shape[1] for b in blocks)
    out = jnp.zeros((rows, cols), jnp.float32)
    r = c = 0
    for b in blocks:
        out = out.at[r:r + b.shape[0], c:c + b.shape[1]].set(b)
        r += b.shape[0]
        c += b.shape[1]
    return out


def fold_params(params):
    """Fold raw module parameters into the lane-dense layouts the two kernels expect."""
    C = _edge_constants()
    w1s, b1s, g1s, w2s, b2s, g2s, w3s, b3s = params['radial']
    P = w1s.shape[0]
    flat = lambda a: a.reshape(1, -1)                       # (P,1,H) -> (1, P*H), p-major

    W1e = jnp.zeros((FEAT, P * H), jnp.float32).at[0].set(w1s.reshape(-1))
    W2blk = _block_diag([w2s[p] for p in range(P)])          # (64, 64)
    W3stk = _block_diag([w3s[p] for p in range(P)])          # (64, 32)
    ERj = jnp.asarray(C['ER'])
    W3e = W3stk @ ERj                                        # (64, 48) duplication folded in
    b3e = flat(b3s) @ ERj                                    # (1, 48)
    AVG = jnp.asarray(np.kron(np.eye(P, dtype=np.float32),
                              np.full((H, H), 1.0 / H, np.float32)))

    edge_ops = (W1e, flat(b1s), flat(g1s), W2blk, flat(b2s), flat(g2s), W3e, b3e, AVG,
                jnp.asarray(C['EXx1']), jnp.asarray(C['ED1']), jnp.asarray(C['ED2']),
                jnp.asarray(C['EX0']), jnp.asarray(C['EXr']), jnp.asarray(C['EXg']),
                jnp.asarray(C['ES1']), jnp.asarray(C['ES0w']), jnp.asarray(C['ES2b']),
                jnp.asarray(C['ES3w']))

    # pooling: neighbour-mask broadcast / sum matrices + fused project_out / self-interact
    ME = np.zeros((K, K * OUTW), np.float32)
    MS = np.zeros((K * OUTW, OUTW), np.float32)
    for k in range(K):
        ME[k, k * OUTW:(k + 1) * OUTW] = 1.0
        MS[k * OUTW:(k + 1) * OUTW, :] = np.eye(OUTW, dtype=np.float32)
    I3 = jnp.eye(3, dtype=jnp.float32)
    blk = lambda w: _block_diag([w[0], jnp.kron(w[1], I3)])  # deg-0 block | deg-1 kron block
    pool_ops = (jnp.asarray(ME), jnp.asarray(MS), blk(params['w_out']), blk(params['w_si']))

    return {'w_xi': params['w_xi'], 'w_xj': params['w_xj'],
            'edge': edge_ops, 'pool': pool_ops}


# ===================== pallas_call wrappers =====================

def _edge_call(ef, edge_ops):
    te = E // GRID_STEPS
    full = lambda a: pl.BlockSpec(a.shape, lambda i: (0, 0))
    return pl.pallas_call(
        _dtp_edge_kernel,
        grid=(GRID_STEPS,),
        in_specs=[pl.BlockSpec((te, FEAT), lambda i: (i, 0))] + [full(a) for a in edge_ops],
        out_specs=pl.BlockSpec((te, OUTW), lambda i: (i, 0)),
        out_shape=jax.ShapeDtypeStruct((E, OUTW), jnp.float32),
        compiler_params=pltpu.CompilerParams(dimension_semantics=("parallel",)),
    )(ef, *edge_ops)


def _pool_call(v, maskf, inp_flat, pool_ops):
    tn = NE // GRID_STEPS
    full = lambda a: pl.BlockSpec(a.shape, lambda i: (0, 0))
    return pl.pallas_call(
        _pool_out_kernel,
        grid=(GRID_STEPS,),
        in_specs=[pl.BlockSpec((tn, K * OUTW), lambda i: (i, 0)),
                  pl.BlockSpec((tn, K), lambda i: (i, 0)),
                  pl.BlockSpec((tn, OUTW), lambda i: (i, 0))] + [full(a) for a in pool_ops],
        out_specs=pl.BlockSpec((tn, OUTW), lambda i: (i, 0)),
        out_shape=jax.ShapeDtypeStruct((NE, OUTW), jnp.float32),
        compiler_params=pltpu.CompilerParams(dimension_semantics=("parallel",)),
    )(v, maskf, inp_flat, *pool_ops)


def dtp_forward(fparams, inp, basis, Dmats, edge_info, rel_dist):
    """Pallas implementation of DTP.forward (pool=True path), folded params."""
    nbr_idx, nbr_mask, edges = edge_info
    assert edges is None                 # edge_dim == 0 in this config
    # TODO(synk): the Clebsch-Gordan `basis` contraction branch (B is not None) is not
    # implemented; this config calls DTP with an empty basis dict, so the reference
    # module takes the plain `R @ x` branch for every (degree_in, degree_out) pair.
    assert len(basis) == 0

    inp0, inp1 = inp[0], inp[1]
    D1 = Dmats[1]

    # project_xi_xj + gather stay in XLA (tiny 4x4 matmuls fuse with the index_select)
    flin = lambda x, w: jnp.einsum('bndm,de->bnem', x, w, precision=PREC)
    src0, src1 = flin(inp0, fparams['w_xi'][0]), flin(inp1, fparams['w_xi'][1])
    tgt0, tgt1 = flin(inp0, fparams['w_xj'][0]), flin(inp1, fparams['w_xj'][1])
    gather = lambda v: jax.vmap(lambda vb, ib: vb[ib])(v, nbr_idx)
    x0e = gather(tgt0) + src0[:, :, None]          # (B, N, K, 4, 1)
    x1e = gather(tgt1) + src1[:, :, None]          # (B, N, K, 4, 3)

    # edge-major lane-concatenated layout for the hot-path kernel
    ef = jnp.concatenate([rel_dist.reshape(E, 1), x0e.reshape(E, D0),
                          x1e.reshape(E, 3 * D0), D1.reshape(E, 9)], axis=-1)   # (E, 26)
    edge_out = _edge_call(ef, fparams['edge'])                                   # (E, 16)

    # fused masked-mean + project_out + self-interaction
    inp_flat = jnp.concatenate([inp0.reshape(NE, D0), inp1.reshape(NE, 3 * D0)], axis=-1)
    final = _pool_call(edge_out.reshape(NE, K * OUTW),
                       nbr_mask.reshape(NE, K).astype(jnp.float32),
                       inp_flat, fparams['pool'])                                # (NE, 16)

    return {0: final[:, :D0].reshape(B, N, D0, 1),
            1: final[:, D0:].reshape(B, N, D0, 3)}


# ===================== pure-JAX reference (mirrors the torch code) =====================

def dtp_reference(params, inp, Dmats, edge_info, rel_dist):
    nbr_idx, nbr_mask, _ = edge_info
    inp0, inp1 = inp[0], inp[1]
    D1 = Dmats[1]

    flin = lambda x, w: jnp.einsum('bndm,de->bnem', x, w, precision=PREC)
    src = [flin(inp0, params['w_xi'][0]), flin(inp1, params['w_xi'][1])]
    tgt = [flin(inp0, params['w_xj'][0]), flin(inp1, params['w_xj'][1])]
    gather = lambda v: jax.vmap(lambda vb, ib: vb[ib])(v, nbr_idx)
    x0 = gather(tgt[0]) + src[0][:, :, None]
    x1 = gather(tgt[1]) + src[1][:, :, None]
    x1r = jnp.einsum('bnkij,bnkli->bnklj', D1, x1, precision=PREC)

    w1s, b1s, g1s, w2s, b2s, g2s, w3s, b3s = params['radial']
    silu = lambda h: h * jax.nn.sigmoid(h)

    def ln(h, g):
        mu = jnp.mean(h, axis=-1, keepdims=True)
        var = jnp.mean(jnp.square(h - mu), axis=-1, keepdims=True)
        return (h - mu) * jax.lax.rsqrt(var + EPS) * g

    def radial(p):
        h = jnp.einsum('bnkc,ch->bnkh', rel_dist, w1s[p], precision=PREC) + b1s[p, 0]
        h = ln(silu(h), g1s[p, 0])
        h = jnp.einsum('bnkh,hg->bnkg', h, w2s[p], precision=PREC) + b2s[p, 0]
        h = ln(silu(h), g2s[p, 0])
        h = jnp.einsum('bnkh,ho->bnko', h, w3s[p], precision=PREC) + b3s[p, 0]
        return h.reshape(B, N, K, LO, LI)

    R00, R10, R01, R11 = radial(0), radial(1), radial(2), radial(3)
    ein = lambda R, x: jnp.einsum('bnkoi,bnkim->bnkom', R, x, precision=PREC)

    out0 = jnp.concatenate([ein(R00, x0), ein(R10, x1r[..., 1:2])], axis=-2)
    c01 = jnp.pad(ein(R01, x0), [(0, 0)] * 4 + [(1, 1)])
    out1 = jnp.concatenate([c01, ein(R11, x1r)], axis=-2)
    out1 = jnp.einsum('bnkom,bnkpm->bnkop', out1, D1, precision=PREC)

    maskf = nbr_mask.astype(jnp.float32)
    cnt = jnp.sum(maskf, axis=2)

    def pool(v):
        s = jnp.sum(v * maskf[..., None, None], axis=2)
        return jnp.where(cnt[..., None, None] > 0,
                         s / jnp.maximum(cnt, 1.0)[..., None, None], 0.0)

    o0 = flin(pool(out0), params['w_out'][0]) + flin(inp0, params['w_si'][0])
    o1 = flin(pool(out1), params['w_out'][1]) + flin(inp1, params['w_si'][1])
    return {0: o0, 1: o1}


# ===================== deterministic parameter init =====================

def init_params(key):
    ks = jax.random.split(key, 14)
    fw = lambda k: jax.random.normal(k, (D0, D0), jnp.float32) / math.sqrt(D0)
    unif = lambda k, shape, fan_in: jax.random.uniform(
        k, shape, jnp.float32, -1.0 / math.sqrt(fan_in), 1.0 / math.sqrt(fan_in))
    P = 4  # (d_in, d_out) pairs: (0,0), (1,0), (0,1), (1,1)
    return {
        'w_xi': (fw(ks[0]), fw(ks[1])),
        'w_xj': (fw(ks[2]), fw(ks[3])),
        'w_out': (fw(ks[4]), fw(ks[5])),
        'w_si': (fw(ks[6]), fw(ks[7])),
        'radial': (
            unif(ks[8], (P, 1, H), 1),            # Linear(edge_dim+1, H) weight (x @ W)
            unif(ks[9], (P, 1, H), 1),            # ... bias
            jnp.ones((P, 1, H), jnp.float32),     # LayerNorm gamma (beta buffer is 0)
            unif(ks[10], (P, H, H), H),           # Linear(H, H) weight
            unif(ks[11], (P, 1, H), H),           # ... bias
            jnp.ones((P, 1, H), jnp.float32),     # LayerNorm gamma
            unif(ks[12], (P, H, LO * LI), H),     # Linear(H, nc_out*nc_in) weight
            unif(ks[13], (P, 1, LO * LI), H),     # ... bias
        ),
    }


if __name__ == "__main__":
    key = jax.random.PRNGKey(0)
    kp, kd = jax.random.split(key)
    params = init_params(kp)
    kparams = fold_params(params)

    kis = jax.random.split(kd, 6)
    inp = {0: jax.random.normal(kis[0], (B, N, D0, 1), jnp.float32),
           1: jax.random.normal(kis[1], (B, N, D0, 3), jnp.float32)}
    nbr_idx = jax.random.randint(kis[2], (B, N, K), 0, N)
    nbr_mask = jax.random.uniform(kis[3], (B, N, K)) > 0.25
    Dmats = {1: jax.random.normal(kis[4], (B, N, K, 3, 3), jnp.float32)}
    rel_dist = jnp.abs(jax.random.normal(kis[5], (B, N, K, 1), jnp.float32))
    edge_info = EdgeInfo(nbr_idx, nbr_mask, None)
    basis = {}  # no Clebsch-Gordan basis -> exercises the `R @ x` branch

    out = jax.jit(dtp_forward)(kparams, inp, basis, Dmats, edge_info, rel_dist)
    out = jax.block_until_ready(out)

    ref = dtp_reference(params, inp, Dmats, edge_info, rel_dist)
    for deg in (0, 1):
        assert out[deg].shape == ref[deg].shape, (deg, out[deg].shape, ref[deg].shape)
        assert jnp.allclose(out[deg], ref[deg], atol=1e-2, rtol=1e-2), (
            "degree", deg, "max abs diff",
            float(jnp.max(jnp.abs(out[deg] - ref[deg]))))
    print("KERNEL_OK")
</pallas_src>

<mosaic_0001>
module attributes {stable_mosaic.version = 11 : i64} {
  func.func @_pool_out_kernel(%arg0: i32, %arg1: memref<16x64xf32, #tpu.memory_space<vmem>>, %arg2: memref<16x4xf32, #tpu.memory_space<vmem>>, %arg3: memref<16x16xf32, #tpu.memory_space<vmem>>, %arg4: memref<4x64xf32, #tpu.memory_space<vmem>>, %arg5: memref<64x16xf32, #tpu.memory_space<vmem>>, %arg6: memref<16x16xf32, #tpu.memory_space<vmem>>, %arg7: memref<16x16xf32, #tpu.memory_space<vmem>>, %arg8: memref<16x16xf32, #tpu.memory_space<vmem>>) attributes {dimension_semantics = [#tpu.dimension_semantics<parallel>], iteration_bounds = array<i64: 1>, scalar_prefetch = 0 : i64, scratch_operands = 0 : i64, tpu.core_type = #tpu.core_type<tc>, window_params = [{transform_indices = @transform_0, window_bounds = array<i64: 16, 64>}, {transform_indices = @transform_1, window_bounds = array<i64: 16, 4>}, {transform_indices = @transform_2, window_bounds = array<i64: 16, 16>}, {pipeline_mode = #tpu.pipeline_mode<synchronous>, transform_indices = @transform_3, window_bounds = array<i64: 4, 64>}, {pipeline_mode = #tpu.pipeline_mode<synchronous>, transform_indices = @transform_4, window_bounds = array<i64: 64, 16>}, {pipeline_mode = #tpu.pipeline_mode<synchronous>, transform_indices = @transform_5, window_bounds = array<i64: 16, 16>}, {pipeline_mode = #tpu.pipeline_mode<synchronous>, transform_indices = @transform_6, window_bounds = array<i64: 16, 16>}, {transform_indices = @transform_7, window_bounds = array<i64: 16, 16>}]} {
    %c0 = arith.constant 0 : index
    %c0_0 = arith.constant 0 : index
    %0 = vector.load %arg2[%c0, %c0_0] : memref<16x4xf32, #tpu.memory_space<vmem>>, vector<16x4xf32>
    %c0_1 = arith.constant 0 : index
    %c0_2 = arith.constant 0 : index
    %1 = vector.load %arg1[%c0_1, %c0_2] : memref<16x64xf32, #tpu.memory_space<vmem>>, vector<16x64xf32>
    %c0_3 = arith.constant 0 : index
    %c0_4 = arith.constant 0 : index
    %2 = vector.load %arg4[%c0_3, %c0_4] : memref<4x64xf32, #tpu.memory_space<vmem>>, vector<4x64xf32>
    %cst = arith.constant dense<0.000000e+00> : vector<16x64xf32>
    %3 = tpu.matmul %0, %2, %cst {dimension_numbers = #tpu.dot_dimension_numbers<[1], [0], [0], [1], [0, 0, 1, 1], [], []>, precision = #tpu.contract_precision<fp32>} : vector<16x4xf32>, vector<4x64xf32>, vector<16x64xf32> -> vector<16x64xf32>
    %4 = arith.mulf %1, %3 : vector<16x64xf32>
    %c0_5 = arith.constant 0 : index
    %c0_6 = arith.constant 0 : index
    %5 = vector.load %arg5[%c0_5, %c0_6] : memref<64x16xf32, #tpu.memory_space<vmem>>, vector<64x16xf32>
    %cst_7 = arith.constant dense<0.000000e+00> : vector<16x16xf32>
    %6 = tpu.matmul %4, %5, %cst_7 {dimension_numbers = #tpu.dot_dimension_numbers<[1], [0], [0], [1], [0, 0, 1, 1], [], []>, precision = #tpu.contract_precision<fp32>} : vector<16x64xf32>, vector<64x16xf32>, vector<16x16xf32> -> vector<16x16xf32>
    %cst_8 = arith.constant dense<0.000000e+00> : vector<16xf32>
    %7 = vector.multi_reduction <add>, %0, %cst_8 [1] : vector<16x4xf32> to vector<16xf32>
    %8 = vector.shape_cast %7 : vector<16xf32> to vector<16x1xf32>
    %cst_9 = arith.constant 1.000000e+00 : f32
    %9 = vector.broadcast %cst_9 : f32 to vector<16x1xf32>
    %10 = arith.maximumf %8, %9 : vector<16x1xf32>
    %11 = tpu.reciprocal %10 {approx = true} : vector<16x1xf32> -> vector<16x1xf32>
    %12 = vector.broadcast %11 : vector<16x1xf32> to vector<16x16xf32>
    %13 = arith.mulf %6, %12 : vector<16x16xf32>
    %c0_10 = arith.constant 0 : index
    %c0_11 = arith.constant 0 : index
    %14 = vector.load %arg6[%c0_10, %c0_11] : memref<16x16xf32, #tpu.memory_space<vmem>>, vector<16x16xf32>
    %cst_12 = arith.constant dense<0.000000e+00> : vector<16x16xf32>
    %15 = tpu.matmul %13, %14, %cst_12 {dimension_numbers = #tpu.dot_dimension_numbers<[1], [0], [0], [1], [0, 0, 1, 1], [], []>, precision = #tpu.contract_precision<fp32>} : vector<16x16xf32>, vector<16x16xf32>, vector<16x16xf32> -> vector<16x16xf32>
    %c0_13 = arith.constant 0 : index
    %c0_14 = arith.constant 0 : index
    %16 = vector.load %arg3[%c0_13, %c0_14] : memref<16x16xf32, #tpu.memory_space<vmem>>, vector<16x16xf32>
    %c0_15 = arith.constant 0 : index
    %c0_16 = arith.constant 0 : index
    %17 = vector.load %arg7[%c0_15, %c0_16] : memref<16x16xf32, #tpu.memory_space<vmem>>, vector<16x16xf32>
    %cst_17 = arith.constant dense<0.000000e+00> : vector<16x16xf32>
    %18 = tpu.matmul %16, %17, %cst_17 {dimension_numbers = #tpu.dot_dimension_numbers<[1], [0], [0], [1], [0, 0, 1, 1], [], []>, precision = #tpu.contract_precision<fp32>} : vector<16x16xf32>, vector<16x16xf32>, vector<16x16xf32> -> vector<16x16xf32>
    %19 = arith.addf %15, %18 : vector<16x16xf32>
    %c0_18 = arith.constant 0 : index
    %c0_19 = arith.constant 0 : index
    %20 = vector.load %arg8[%c0_18, %c0_19] : memref<16x16xf32, #tpu.memory_space<vmem>>, vector<16x16xf32>
    tpu.vector_store %arg8[%c0_18, %c0_19], %19 {strides = array<i32>} : memref<16x16xf32, #tpu.memory_space<vmem>>, vector<16x16xf32>,
    return
  }
  func.func @transform_0(%arg0: i32) -> (i32, i32) {
    %c0_i32 = arith.constant 0 : i32
    %c0_i32_0 = arith.constant 0 : i32
    return %arg0, %c0_i32 : i32, i32
  }
  func.func @transform_1(%arg0: i32) -> (i32, i32) {
    %c0_i32 = arith.constant 0 : i32
    %c0_i32_0 = arith.constant 0 : i32
    return %arg0, %c0_i32 : i32, i32
  }
  func.func @transform_2(%arg0: i32) -> (i32, i32) {
    %c0_i32 = arith.constant 0 : i32
    %c0_i32_0 = arith.constant 0 : i32
    return %arg0, %c0_i32 : i32, i32
  }
  func.func @transform_3(%arg0: i32) -> (i32, i32) {
    %c0_i32 = arith.constant 0 : i32
    %c0_i32_0 = arith.constant 0 : i32
    %c0_i32_1 = arith.constant 0 : i32
    return %c0_i32, %c0_i32_0 : i32, i32
  }
  func.func @transform_4(%arg0: i32) -> (i32, i32) {
    %c0_i32 = arith.constant 0 : i32
    %c0_i32_0 = arith.constant 0 : i32
    %c0_i32_1 = arith.constant 0 : i32
    return %c0_i32, %c0_i32_0 : i32, i32
  }
  func.func @transform_5(%arg0: i32) -> (i32, i32) {
    %c0_i32 = arith.constant 0 : i32
    %c0_i32_0 = arith.constant 0 : i32
    %c0_i32_1 = arith.constant 0 : i32
    return %c0_i32, %c0_i32_0 : i32, i32
  }
  func.func @transform_6(%arg0: i32) -> (i32, i32) {
    %c0_i32 = arith.constant 0 : i32
    %c0_i32_0 = arith.constant 0 : i32
    %c0_i32_1 = arith.constant 0 : i32
    return %c0_i32, %c0_i32_0 : i32, i32
  }
  func.func @transform_7(%arg0: i32) -> (i32, i32) {
    %c0_i32 = arith.constant 0 : i32
    %c0_i32_0 = arith.constant 0 : i32
    return %arg0, %c0_i32 : i32, i32
  }
}

module attributes {stable_mosaic.version = 11 : i64} {
  func.func @_dtp_edge_kernel(%arg0: i32, %arg1: memref<64x26xf32, #tpu.memory_space<vmem>>, %arg2: memref<26x64xf32, #tpu.memory_space<vmem>>, %arg3: memref<1x64xf32, #tpu.memory_space<vmem>>, %arg4: memref<1x64xf32, #tpu.memory_space<vmem>>, %arg5: memref<64x64xf32, #tpu.memory_space<vmem>>, %arg6: memref<1x64xf32, #tpu.memory_space<vmem>>, %arg7: memref<1x64xf32, #tpu.memory_space<vmem>>, %arg8: memref<64x48xf32, #tpu.memory_space<vmem>>, %arg9: memref<1x48xf32, #tpu.memory_space<vmem>>, %arg10: memref<64x64xf32, #tpu.memory_space<vmem>>, %arg11: memref<26x36xf32, #tpu.memory_space<vmem>>, %arg12: memref<26x36xf32, #tpu.memory_space<vmem>>, %arg13: memref<26x36xf32, #tpu.memory_space<vmem>>, %arg14: memref<26x48xf32, #tpu.memory_space<vmem>>, %arg15: memref<12x48xf32, #tpu.memory_space<vmem>>, %arg16: memref<12x36xf32, #tpu.memory_space<vmem>>, %arg17: memref<36x12xf32, #tpu.memory_space<vmem>>, %arg18: memref<48x16xf32, #tpu.memory_space<vmem>>, %arg19: memref<48x12xf32, #tpu.memory_space<vmem>>, %arg20: memref<36x16xf32, #tpu.memory_space<vmem>>, %arg21: memref<64x16xf32, #tpu.memory_space<vmem>>) attributes {dimension_semantics = [#tpu.dimension_semantics<parallel>], iteration_bounds = array<i64: 1>, scalar_prefetch = 0 : i64, scratch_operands = 0 : i64, tpu.core_type = #tpu.core_type<tc>, window_params = [{transform_indices = @transform_0, window_bounds = array<i64: 64, 26>}, {pipeline_mode = #tpu.pipeline_mode<synchronous>, transform_indices = @transform_1, window_bounds = array<i64: 26, 64>}, {pipeline_mode = #tpu.pipeline_mode<synchronous>, transform_indices = @transform_2, window_bounds = array<i64: 1, 64>}, {pipeline_mode = #tpu.pipeline_mode<synchronous>, transform_indices = @transform_3, window_bounds = array<i64: 1, 64>}, {pipeline_mode = #tpu.pipeline_mode<synchronous>, transform_indices = @transform_4, window_bounds = array<i64: 64, 64>}, {pipeline_mode = #tpu.pipeline_mode<synchronous>, transform_indices = @transform_5, window_bounds = array<i64: 1, 64>}, {pipeline_mode = #tpu.pipeline_mode<synchronous>, transform_indices = @transform_6, window_bounds = array<i64: 1, 64>}, {pipeline_mode = #tpu.pipeline_mode<synchronous>, transform_indices = @transform_7, window_bounds = array<i64: 64, 48>}, {pipeline_mode = #tpu.pipeline_mode<synchronous>, transform_indices = @transform_8, window_bounds = array<i64: 1, 48>}, {pipeline_mode = #tpu.pipeline_mode<synchronous>, transform_indices = @transform_9, window_bounds = array<i64: 64, 64>}, {pipeline_mode = #tpu.pipeline_mode<synchronous>, transform_indices = @transform_10, window_bounds = array<i64: 26, 36>}, {pipeline_mode = #tpu.pipeline_mode<synchronous>, transform_indices = @transform_11, window_bounds = array<i64: 26, 36>}, {pipeline_mode = #tpu.pipeline_mode<synchronous>, transform_indices = @transform_12, window_bounds = array<i64: 26, 36>}, {pipeline_mode = #tpu.pipeline_mode<synchronous>, transform_indices = @transform_13, window_bounds = array<i64: 26, 48>}, {pipeline_mode = #tpu.pipeline_mode<synchronous>, transform_indices = @transform_14, window_bounds = array<i64: 12, 48>}, {pipeline_mode = #tpu.pipeline_mode<synchronous>, transform_indices = @transform_15, window_bounds = array<i64: 12, 36>}, {pipeline_mode = #tpu.pipeline_mode<synchronous>, transform_indices = @transform_16, window_bounds = array<i64: 36, 12>}, {pipeline_mode = #tpu.pipeline_mode<synchronous>, transform_indices = @transform_17, window_bounds = array<i64: 48, 16>}, {pipeline_mode = #tpu.pipeline_mode<synchronous>, transform_indices = @transform_18, window_bounds = array<i64: 48, 12>}, {pipeline_mode = #tpu.pipeline_mode<synchronous>, transform_indices = @transform_19, window_bounds = array<i64: 36, 16>}, {transform_indices = @transform_20, window_bounds = array<i64: 64, 16>}]} {
    %c0 = arith.constant 0 : index
    %c0_0 = arith.constant 0 : index
    %0 = vector.load %arg1[%c0, %c0_0] : memref<64x26xf32, #tpu.memory_space<vmem>>, vector<64x26xf32>
    %c0_1 = arith.constant 0 : index
    %c0_2 = arith.constant 0 : index
    %1 = vector.load %arg10[%c0_1, %c0_2] : memref<64x64xf32, #tpu.memory_space<vmem>>, vector<64x64xf32>
    %c0_3 = arith.constant 0 : index
    %c0_4 = arith.constant 0 : index
    %2 = vector.load %arg2[%c0_3, %c0_4] : memref<26x64xf32, #tpu.memory_space<vmem>>, vector<26x64xf32>
    %cst = arith.constant dense<0.000000e+00> : vector<64x64xf32>
    %3 = tpu.matmul %0, %2, %cst {dimension_numbers = #tpu.dot_dimension_numbers<[1], [0], [0], [1], [0, 0, 1, 1], [], []>, precision = #tpu.contract_precision<fp32>} : vector<64x26xf32>, vector<26x64xf32>, vector<64x64xf32> -> vector<64x64xf32>
    %c0_5 = arith.constant 0 : index
    %c0_6 = arith.constant 0 : index
    %4 = vector.load %arg3[%c0_5, %c0_6] : memref<1x64xf32, #tpu.memory_space<vmem>>, vector<1x64xf32>
    %5 = vector.broadcast %4 : vector<1x64xf32> to vector<64x64xf32>
    %6 = arith.addf %3, %5 : vector<64x64xf32>
    %7 = arith.negf %6 : vector<64x64xf32>
    %8 = math.exp %7 : vector<64x64xf32>
    %cst_7 = arith.constant 1.000000e+00 : f32
    %9 = vector.broadcast %cst_7 : f32 to vector<64x64xf32>
    %10 = arith.addf %9, %8 : vector<64x64xf32>
    %11 = arith.divf %9, %10 : vector<64x64xf32>
    %12 = arith.mulf %6, %11 : vector<64x64xf32>
    %c0_8 = arith.constant 0 : index
    %c0_9 = arith.constant 0 : index
    %13 = vector.load %arg4[%c0_8, %c0_9] : memref<1x64xf32, #tpu.memory_space<vmem>>, vector<1x64xf32>
    %cst_10 = arith.constant dense<0.000000e+00> : vector<64x64xf32>
    %14 = tpu.matmul %12, %1, %cst_10 {dimension_numbers = #tpu.dot_dimension_numbers<[1], [0], [0], [1], [0, 0, 1, 1], [], []>, precision = #tpu.contract_precision<fp32>} : vector<64x64xf32>, vector<64x64xf32>, vector<64x64xf32> -> vector<64x64xf32>
    %15 = arith.subf %12, %14 : vector<64x64xf32>
    %16 = arith.mulf %15, %15 : vector<64x64xf32>
    %cst_11 = arith.constant dense<0.000000e+00> : vector<64x64xf32>
    %17 = tpu.matmul %16, %1, %cst_11 {dimension_numbers = #tpu.dot_dimension_numbers<[1], [0], [0], [1], [0, 0, 1, 1], [], []>, precision = #tpu.contract_precision<fp32>} : vector<64x64xf32>, vector<64x64xf32>, vector<64x64xf32> -> vector<64x64xf32>
    %cst_12 = arith.constant 9.99999974E-6 : f32
    %18 = vector.broadcast %cst_12 : f32 to vector<64x64xf32>
    %19 = arith.addf %17, %18 : vector<64x64xf32>
    %20 = math.rsqrt %19 : vector<64x64xf32>
    %21 = arith.mulf %15, %20 : vector<64x64xf32>
    %22 = vector.broadcast %13 : vector<1x64xf32> to vector<64x64xf32>
    %23 = arith.mulf %21, %22 : vector<64x64xf32>
    %c0_13 = arith.constant 0 : index
    %c0_14 = arith.constant 0 : index
    %24 = vector.load %arg5[%c0_13, %c0_14] : memref<64x64xf32, #tpu.memory_space<vmem>>, vector<64x64xf32>
    %cst_15 = arith.constant dense<0.000000e+00> : vector<64x64xf32>
    %25 = tpu.matmul %23, %24, %cst_15 {dimension_numbers = #tpu.dot_dimension_numbers<[1], [0], [0], [1], [0, 0, 1, 1], [], []>, precision = #tpu.contract_precision<fp32>} : vector<64x64xf32>, vector<64x64xf32>, vector<64x64xf32> -> vector<64x64xf32>
    %c0_16 = arith.constant 0 : index
    %c0_17 = arith.constant 0 : index
    %26 = vector.load %arg6[%c0_16, %c0_17] : memref<1x64xf32, #tpu.memory_space<vmem>>, vector<1x64xf32>
    %27 = vector.broadcast %26 : vector<1x64xf32> to vector<64x64xf32>
    %28 = arith.addf %25, %27 : vector<64x64xf32>
    %29 = arith.negf %28 : vector<64x64xf32>
    %30 = math.exp %29 : vector<64x64xf32>
    %cst_18 = arith.constant 1.000000e+00 : f32
    %31 = vector.broadcast %cst_18 : f32 to vector<64x64xf32>
    %32 = arith.addf %31, %30 : vector<64x64xf32>
    %33 = arith.divf %31, %32 : vector<64x64xf32>
    %34 = arith.mulf %28, %33 : vector<64x64xf32>
    %c0_19 = arith.constant 0 : index
    %c0_20 = arith.constant 0 : index
    %35 = vector.load %arg7[%c0_19, %c0_20] : memref<1x64xf32, #tpu.memory_space<vmem>>, vector<1x64xf32>
    %cst_21 = arith.constant dense<0.000000e+00> : vector<64x64xf32>
    %36 = tpu.matmul %34, %1, %cst_21 {dimension_numbers = #tpu.dot_dimension_numbers<[1], [0], [0], [1], [0, 0, 1, 1], [], []>, precision = #tpu.contract_precision<fp32>} : vector<64x64xf32>, vector<64x64xf32>, vector<64x64xf32> -> vector<64x64xf32>
    %37 = arith.subf %34, %36 : vector<64x64xf32>
    %38 = arith.mulf %37, %37 : vector<64x64xf32>
    %cst_22 = arith.constant dense<0.000000e+00> : vector<64x64xf32>
    %39 = tpu.matmul %38, %1, %cst_22 {dimension_numbers = #tpu.dot_dimension_numbers<[1], [0], [0], [1], [0, 0, 1, 1], [], []>, precision = #tpu.contract_precision<fp32>} : vector<64x64xf32>, vector<64x64xf32>, vector<64x64xf32> -> vector<64x64xf32>
    %cst_23 = arith.constant 9.99999974E-6 : f32
    %40 = vector.broadcast %cst_23 : f32 to vector<64x64xf32>
    %41 = arith.addf %39, %40 : vector<64x64xf32>
    %42 = math.rsqrt %41 : vector<64x64xf32>
    %43 = arith.mulf %37, %42 : vector<64x64xf32>
    %44 = vector.broadcast %35 : vector<1x64xf32> to vector<64x64xf32>
    %45 = arith.mulf %43, %44 : vector<64x64xf32>
    %c0_24 = arith.constant 0 : index
    %c0_25 = arith.constant 0 : index
    %46 = vector.load %arg8[%c0_24, %c0_25] : memref<64x48xf32, #tpu.memory_space<vmem>>, vector<64x48xf32>
    %cst_26 = arith.constant dense<0.000000e+00> : vector<64x48xf32>
    %47 = tpu.matmul %45, %46, %cst_26 {dimension_numbers = #tpu.dot_dimension_numbers<[1], [0], [0], [1], [0, 0, 1, 1], [], []>, precision = #tpu.contract_precision<fp32>} : vector<64x64xf32>, vector<64x48xf32>, vector<64x48xf32> -> vector<64x48xf32>
    %c0_27 = arith.constant 0 : index
    %c0_28 = arith.constant 0 : index
    %48 = vector.load %arg9[%c0_27, %c0_28] : memref<1x48xf32, #tpu.memory_space<vmem>>, vector<1x48xf32>
    %49 = vector.broadcast %48 : vector<1x48xf32> to vector<64x48xf32>
    %50 = arith.addf %47, %49 : vector<64x48xf32>
    %c0_29 = arith.constant 0 : index
    %c0_30 = arith.constant 0 : index
    %51 = vector.load %arg11[%c0_29, %c0_30] : memref<26x36xf32, #tpu.memory_space<vmem>>, vector<26x36xf32>
    %cst_31 = arith.constant dense<0.000000e+00> : vector<64x36xf32>
    %52 = tpu.matmul %0, %51, %cst_31 {dimension_numbers = #tpu.dot_dimension_numbers<[1], [0], [0], [1], [0, 0, 1, 1], [], []>, precision = #tpu.contract_precision<fp32>} : vector<64x26xf32>, vector<26x36xf32>, vector<64x36xf32> -> vector<64x36xf32>
    %c0_32 = arith.constant 0 : index
    %c0_33 = arith.constant 0 : index
    %53 = vector.load %arg12[%c0_32, %c0_33] : memref<26x36xf32, #tpu.memory_space<vmem>>, vector<26x36xf32>
    %cst_34 = arith.constant dense<0.000000e+00> : vector<64x36xf32>
    %54 = tpu.matmul %0, %53, %cst_34 {dimension_numbers = #tpu.dot_dimension_numbers<[1], [0], [0], [1], [0, 0, 1, 1], [], []>, precision = #tpu.contract_precision<fp32>} : vector<64x26xf32>, vector<26x36xf32>, vector<64x36xf32> -> vector<64x36xf32>
    %55 = arith.mulf %52, %54 : vector<64x36xf32>
    %c0_35 = arith.constant 0 : index
    %c0_36 = arith.constant 0 : index
    %56 = vector.load %arg17[%c0_35, %c0_36] : memref<36x12xf32, #tpu.memory_space<vmem>>, vector<36x12xf32>
    %cst_37 = arith.constant dense<0.000000e+00> : vector<64x12xf32>
    %57 = tpu.matmul %55, %56, %cst_37 {dimension_numbers = #tpu.dot_dimension_numbers<[1], [0], [0], [1], [0, 0, 1, 1], [], []>, precision = #tpu.contract_precision<fp32>} : vector<64x36xf32>, vector<36x12xf32>, vector<64x12xf32> -> vector<64x12xf32>
    %c0_38 = arith.constant 0 : index
    %c0_39 = arith.constant 0 : index
    %58 = vector.load %arg14[%c0_38, %c0_39] : memref<26x48xf32, #tpu.memory_space<vmem>>, vector<26x48xf32>
    %cst_40 = arith.constant dense<0.000000e+00> : vector<64x48xf32>
    %59 = tpu.matmul %0, %58, %cst_40 {dimension_numbers = #tpu.dot_dimension_numbers<[1], [0], [0], [1], [0, 0, 1, 1], [], []>, precision = #tpu.contract_precision<fp32>} : vector<64x26xf32>, vector<26x48xf32>, vector<64x48xf32> -> vector<64x48xf32>
    %c0_41 = arith.constant 0 : index
    %c0_42 = arith.constant 0 : index
    %60 = vector.load %arg15[%c0_41, %c0_42] : memref<12x48xf32, #tpu.memory_space<vmem>>, vector<12x48xf32>
    %cst_43 = arith.constant dense<0.000000e+00> : vector<64x48xf32>
    %61 = tpu.matmul %57, %60, %cst_43 {dimension_numbers = #tpu.dot_dimension_numbers<[1], [0], [0], [1], [0, 0, 1, 1], [], []>, precision = #tpu.contract_precision<fp32>} : vector<64x12xf32>, vector<12x48xf32>, vector<64x48xf32> -> vector<64x48xf32>
    %62 = arith.addf %59, %61 : vector<64x48xf32>
    %63 = arith.mulf %50, %62 : vector<64x48xf32>
    %c0_44 = arith.constant 0 : index
    %c0_45 = arith.constant 0 : index
    %64 = vector.load %arg19[%c0_44, %c0_45] : memref<48x12xf32, #tpu.memory_space<vmem>>, vector<48x12xf32>
    %cst_46 = arith.constant dense<0.000000e+00> : vector<64x12xf32>
    %65 = tpu.matmul %63, %64, %cst_46 {dimension_numbers = #tpu.dot_dimension_numbers<[1], [0], [0], [1], [0, 0, 1, 1], [], []>, precision = #tpu.contract_precision<fp32>} : vector<64x48xf32>, vector<48x12xf32>, vector<64x12xf32> -> vector<64x12xf32>
    %c0_47 = arith.constant 0 : index
    %c0_48 = arith.constant 0 : index
    %66 = vector.load %arg16[%c0_47, %c0_48] : memref<12x36xf32, #tpu.memory_space<vmem>>, vector<12x36xf32>
    %cst_49 = arith.constant dense<0.000000e+00> : vector<64x36xf32>
    %67 = tpu.matmul %65, %66, %cst_49 {dimension_numbers = #tpu.dot_dimension_numbers<[1], [0], [0], [1], [0, 0, 1, 1], [], []>, precision = #tpu.contract_precision<fp32>} : vector<64x12xf32>, vector<12x36xf32>, vector<64x36xf32> -> vector<64x36xf32>
    %c0_50 = arith.constant 0 : index
    %c0_51 = arith.constant 0 : index
    %68 = vector.load %arg13[%c0_50, %c0_51] : memref<26x36xf32, #tpu.memory_space<vmem>>, vector<26x36xf32>
    %cst_52 = arith.constant dense<0.000000e+00> : vector<64x36xf32>
    %69 = tpu.matmul %0, %68, %cst_52 {dimension_numbers = #tpu.dot_dimension_numbers<[1], [0], [0], [1], [0, 0, 1, 1], [], []>, precision = #tpu.contract_precision<fp32>} : vector<64x26xf32>, vector<26x36xf32>, vector<64x36xf32> -> vector<64x36xf32>
    %70 = arith.mulf %67, %69 : vector<64x36xf32>
    %c0_53 = arith.constant 0 : index
    %c0_54 = arith.constant 0 : index
    %71 = vector.load %arg20[%c0_53, %c0_54] : memref<36x16xf32, #tpu.memory_space<vmem>>, vector<36x16xf32>
    %cst_55 = arith.constant dense<0.000000e+00> : vector<64x16xf32>
    %72 = tpu.matmul %70, %71, %cst_55 {dimension_numbers = #tpu.dot_dimension_numbers<[1], [0], [0], [1], [0, 0, 1, 1], [], []>, precision = #tpu.contract_precision<fp32>} : vector<64x36xf32>, vector<36x16xf32>, vector<64x16xf32> -> vector<64x16xf32>
    %c0_56 = arith.constant 0 : index
    %c0_57 = arith.constant 0 : index
    %73 = vector.load %arg18[%c0_56, %c0_57] : memref<48x16xf32, #tpu.memory_space<vmem>>, vector<48x16xf32>
    %cst_58 = arith.constant dense<0.000000e+00> : vector<64x16xf32>
    %74 = tpu.matmul %63, %73, %cst_58 {dimension_numbers = #tpu.dot_dimension_numbers<[1], [0], [0], [1], [0, 0, 1, 1], [], []>, precision = #tpu.contract_precision<fp32>} : vector<64x48xf32>, vector<48x16xf32>, vector<64x16xf32> -> vector<64x16xf32>
    %75 = arith.addf %74, %72 : vector<64x16xf32>
    %c0_59 = arith.constant 0 : index
    %c0_60 = arith.constant 0 : index
    %76 = vector.load %arg21[%c0_59, %c0_60] : memref<64x16xf32, #tpu.memory_space<vmem>>, vector<64x16xf32>
    tpu.vector_store %arg21[%c0_59, %c0_60], %75 {strides = array<i32>} : memref<64x16xf32, #tpu.memory_space<vmem>>, vector<64x16xf32>,
    return
  }
  func.func @transform_0(%arg0: i32) -> (i32, i32) {
    %c0_i32 = arith.constant 0 : i32
    %c0_i32_0 = arith.constant 0 : i32
    return %arg0, %c0_i32 : i32, i32
  }
  func.func @transform_1(%arg0: i32) -> (i32, i32) {
    %c0_i32 = arith.constant 0 : i32
    %c0_i32_0 = arith.constant 0 : i32
    %c0_i32_1 = arith.constant 0 : i32
    return %c0_i32, %c0_i32_0 : i32, i32
  }
  func.func @transform_2(%arg0: i32) -> (i32, i32) {
    %c0_i32 = arith.constant 0 : i32
    %c0_i32_0 = arith.constant 0 : i32
    %c0_i32_1 = arith.constant 0 : i32
    return %c0_i32, %c0_i32_0 : i32, i32
  }
  func.func @transform_3(%arg0: i32) -> (i32, i32) {
    %c0_i32 = arith.constant 0 : i32
    %c0_i32_0 = arith.constant 0 : i32
    %c0_i32_1 = arith.constant 0 : i32
    return %c0_i32, %c0_i32_0 : i32, i32
  }
  func.func @transform_4(%arg0: i32) -> (i32, i32) {
    %c0_i32 = arith.constant 0 : i32
    %c0_i32_0 = arith.constant 0 : i32
    %c0_i32_1 = arith.constant 0 : i32
    return %c0_i32, %c0_i32_0 : i32, i32
  }
  func.func @transform_5(%arg0: i32) -> (i32, i32) {
    %c0_i32 = arith.constant 0 : i32
    %c0_i32_0 = arith.constant 0 : i32
    %c0_i32_1 = arith.constant 0 : i32
    return %c0_i32, %c0_i32_0 : i32, i32
  }
  func.func @transform_6(%arg0: i32) -> (i32, i32) {
    %c0_i32 = arith.constant 0 : i32
    %c0_i32_0 = arith.constant 0 : i32
    %c0_i32_1 = arith.constant 0 : i32
    return %c0_i32, %c0_i32_0 : i32, i32
  }
  func.func @transform_7(%arg0: i32) -> (i32, i32) {
    %c0_i32 = arith.constant 0 : i32
    %c0_i32_0 = arith.constant 0 : i32
    %c0_i32_1 = arith.constant 0 : i32
    return %c0_i32, %c0_i32_0 : i32, i32
  }
  func.func @transform_8(%arg0: i32) -> (i32, i32) {
    %c0_i32 = arith.constant 0 : i32
    %c0_i32_0 = arith.constant 0 : i32
    %c0_i32_1 = arith.constant 0 : i32
    return %c0_i32, %c0_i32_0 : i32, i32
  }
  func.func @transform_9(%arg0: i32) -> (i32, i32) {
    %c0_i32 = arith.constant 0 : i32
    %c0_i32_0 = arith.constant 0 : i32
    %c0_i32_1 = arith.constant 0 : i32
    return %c0_i32, %c0_i32_0 : i32, i32
  }
  func.func @transform_10(%arg0: i32) -> (i32, i32) {
    %c0_i32 = arith.constant 0 : i32
    %c0_i32_0 = arith.constant 0 : i32
    %c0_i32_1 = arith.constant 0 : i32
    return %c0_i32, %c0_i32_0 : i32, i32
  }
  func.func @transform_11(%arg0: i32) -> (i32, i32) {
    %c0_i32 = arith.constant 0 : i32
    %c0_i32_0 = arith.constant 0 : i32
    %c0_i32_1 = arith.constant 0 : i32
    return %c0_i32, %c0_i32_0 : i32, i32
  }
  func.func @transform_12(%arg0: i32) -> (i32, i32) {
    %c0_i32 = arith.constant 0 : i32
    %c0_i32_0 = arith.constant 0 : i32
    %c0_i32_1 = arith.constant 0 : i32
    return %c0_i32, %c0_i32_0 : i32, i32
  }
  func.func @transform_13(%arg0: i32) -> (i32, i32) {
    %c0_i32 = arith.constant 0 : i32
    %c0_i32_0 = arith.constant 0 : i32
    %c0_i32_1 = arith.constant 0 : i32
    return %c0_i32, %c0_i32_0 : i32, i32
  }
  func.func @transform_14(%arg0: i32) -> (i32, i32) {
    %c0_i32 = arith.constant 0 : i32
    %c0_i32_0 = arith.constant 0 : i32
    %c0_i32_1 = arith.constant 0 : i32
    return %c0_i32, %c0_i32_0 : i32, i32
  }
  func.func @transform_15(%arg0: i32) -> (i32, i32) {
    %c0_i32 = arith.constant 0 : i32
    %c0_i32_0 = arith.constant 0 : i32
    %c0_i32_1 = arith.constant 0 : i32
    return %c0_i32, %c0_i32_0 : i32, i32
  }
  func.func @transform_16(%arg0: i32) -> (i32, i32) {
    %c0_i32 = arith.constant 0 : i32
    %c0_i32_0 = arith.constant 0 : i32
    %c0_i32_1 = arith.constant 0 : i32
    return %c0_i32, %c0_i32_0 : i32, i32
  }
  func.func @transform_17(%arg0: i32) -> (i32, i32) {
    %c0_i32 = arith.constant 0 : i32
    %c0_i32_0 = arith.constant 0 : i32
    %c0_i32_1 = arith.constant 0 : i32
    return %c0_i32, %c0_i32_0 : i32, i32
  }
  func.func @transform_18(%arg0: i32) -> (i32, i32) {
    %c0_i32 = arith.constant 0 : i32
    %c0_i32_0 = arith.constant 0 : i32
    %c0_i32_1 = arith.constant 0 : i32
    return %c0_i32, %c0_i32_0 : i32, i32
  }
  func.func @transform_19(%arg0: i32) -> (i32, i32) {
    %c0_i32 = arith.constant 0 : i32
    %c0_i32_0 = arith.constant 0 : i32
    %c0_i32_1 = arith.constant 0 : i32
    return %c0_i32, %c0_i32_0 : i32, i32
  }
  func.func @transform_20(%arg0: i32) -> (i32, i32) {
    %c0_i32 = arith.constant 0 : i32
    %c0_i32_0 = arith.constant 0 : i32
    return %arg0, %c0_i32 : i32, i32
  }
}

</mosaic_0001>

<bundles_post_ra>
// kernel: dtp_forward.3
= control target key start
LH: loop header
LB: loop body
LE: loop exit
PB: predicated region body
PF: predicated region fallthrough
CT: control target
= control target key end

     0   :  { %vm38_vm0 = vcmask 1043456   ;;  %vm31_vm1 = vcmask 31744   ;;  %vm541_vm2 = vcmask 523264   ;;  %vm1146_vm3 = vcmask 130048   ;;  %s2939_s3 = inlined_call_operand.vmem [shape: f32[4,64], index: 3, kind: input, shape index: {}]   ;;  %s2940_s1 = inlined_call_operand.vmem [shape: f32[16,4], index: 1, kind: input, shape index: {}]   ;;  %s2941_s4 = inlined_call_operand.vmem [shape: f32[64,16], index: 4, kind: input, shape index: {}]   ;;  %s2942_s0 = inlined_call_operand.vmem [shape: f32[16,64], index: 0, kind: input, shape index: {}]   ;;  %s2943_s6 = inlined_call_operand.vmem [shape: f32[16,16], index: 6, kind: input, shape index: {}]   ;;  %s2944_s2 = inlined_call_operand.vmem [shape: f32[16,16], index: 2, kind: input, shape index: {}]   ;;  %s2945_s5 = inlined_call_operand.vmem [shape: f32[16,16], index: 5, kind: input, shape index: {}]   ;;  %s2946_s7 = inlined_call_operand.vmem [shape: f32[16,16], index: 7, kind: output, shape index: {}]  }
   0x1   :  { %v30_v0 = vld [vmem:[%s2939_s3] sm:$0xf]  ;;  %v2764_v2 = vld [vmem:[%s2940_s1 + $0x8] sm:$0xff]  ;;  %v2783_v8 = vld [vmem:[%s2941_s4 + $0x10] sm:$0xff] }
   0x2   :  { %v2759_v1 = vld [vmem:[%s2940_s1] sm:$0xff]  ;;  %v40_v3 = vsel %vm38_vm0, %v30_v0, 0  ;;  %v36_v5 = vsel %vm31_vm1, %v2764_v2, 0  ;;  %v2778_v7 = vld [vmem:[%s2941_s4 + $0x8] sm:$0xff]  ;;  %v2795_v13 = vld [vmem:[%s2941_s4 + $0x18] sm:$0xff]  ;;  %v555_v15 = vand.u32 4294901760, %v2783_v8 }
   0x3   :  { %v33_v4 = vsel %vm31_vm1, %v2759_v1, 0  ;;  %v2773_v6 = vld [vmem:[%s2941_s4] sm:$0xff]  ;;  %v2785_v9 = vand.u32 4294901760, %v40_v3  ;;  %v2789_v11 = vand.u32 4294901760, %v36_v5  ;;  %v552_v14 = vand.u32 4294901760, %v2778_v7  ;;  %v538_v50 = vld [vmem:[%s2941_s4 + $0x28] sm:$0xff] }
   0x4   :  { %v2787_v10 = vand.u32 4294901760, %v33_v4  ;;  %v549_v12 = vand.u32 4294901760, %v2773_v6  ;;  %v558_v16 = vand.u32 4294901760, %v2795_v13  ;;  %v2813_v25 = vsub.f32 %v2783_v8, %v555_v15  ;;  %v537_v49 = vld [vmem:[%s2941_s4 + $0x20] sm:$0xff]  ;;  %v539_v55 = vld [vmem:[%s2941_s4 + $0x30] sm:$0xff]  ;;  %v540_v56 = vld [vmem:[%s2941_s4 + $0x38] sm:$0xff] }
   0x5   :  { %v130_v17 = vsub.f32 %v40_v3, %v2785_v9  ;;  %v119_v19 = vsub.f32 %v36_v5, %v2789_v11  ;;  %2295 = vmatprep.subr.mxu1 %v2785_v9  ;;  %v2810_v21 = vsub.f32 %v2778_v7, %v552_v14  ;;  %v561_v51 = vand.u32 4294901760, %v537_v49 }
   0x6   :  { %2302 = vmatprep.mubr.f32.mxu0 %v2787_v10  ;;  %v109_v18 = vsub.f32 %v33_v4, %v2787_v10  ;;  %2296 = vmatpush3.msra.mxu1 %v2785_v9  ;;  %v2807_v20 = vsub.f32 %v2773_v6, %v549_v12  ;;  %v2818_v28 = vsub.f32 %v2795_v13, %v558_v16  ;;  %v658_v32 = vand.u32 4294901760, %v2813_v25 }
   0x7   :  { %v131_v22 = vand.u32 4294901760, %v130_v17  ;;  %v120_v24 = vand.u32 4294901760, %v119_v19  ;;  %v651_v27 = vand.u32 4294901760, %v2810_v21  ;;  %v2839_v47 = vpack.c.bf16 %v552_v14, %v549_v12 }
   0x8   :  { %v110_v23 = vand.u32 4294901760, %v109_v18  ;;  %v644_v26 = vand.u32 4294901760, %v2807_v20  ;;  %v665_v35 = vand.u32 4294901760, %v2818_v28  ;;  %v659_v39 = vsub.f32 %v2813_v25, %v658_v32 }
   0x9   :  { %v132_v29 = vsub.f32 %v130_v17, %v131_v22  ;;  %v121_v31 = vsub.f32 %v119_v19, %v120_v24  ;;  %v652_v34 = vsub.f32 %v2810_v21, %v651_v27  ;;  %v2845_v48 = vpack.c.bf16 %v558_v16, %v555_v15 }
   0xa   :  { %v111_v30 = vsub.f32 %v109_v18, %v110_v23  ;;  %v645_v33 = vsub.f32 %v2807_v20, %v644_v26  ;;  %v666_v42 = vsub.f32 %v2818_v28, %v665_v35  ;;  %v660_v43 = vand.u32 4294901760, %v659_v39 }
   0xb   :  { %v133_v36 = vand.u32 4294901760, %v132_v29  ;;  %v122_v38 = vand.u32 4294901760, %v121_v31  ;;  %v653_v41 = vand.u32 4294901760, %v652_v34  ;;  %v564_v52 = vand.u32 4294901760, %v538_v50  ;;  %v28_v34 = vld [vmem:[%s2942_s0] sm:$0xff] }
   0xc   :  { %v112_v37 = vand.u32 4294901760, %v111_v30  ;;  %v646_v40 = vand.u32 4294901760, %v645_v33  ;;  %v667_v45 = vand.u32 4294901760, %v666_v42  ;;  %v671_v53 = vsub.f32 %v537_v49, %v561_v51  ;;  %v29_v30 = vld [vmem:[%s2942_s0 + $0x8] sm:$0xff] }
   0xd   :  { %2300 = vmatprep.subr.mxu0 %v133_v36  ;;  %v678_v54 = vsub.f32 %v538_v50, %v564_v52  ;;  %v567_v59 = vand.u32 4294901760, %v539_v55  ;;  %v570_v60 = vand.u32 4294901760, %v540_v56  ;;  %v2555_v13 = vpack.c.bf16 %v2810_v21, %v2807_v20  ;;  %v1144_v20 = vld [vmem:[%s2943_s6] sm:$0xff]  ;;  %v1145_v21 = vld [vmem:[%s2943_s6 + $0x8] sm:$0xff] }
   0xe   :  { %2297 = vmatprep.mubr.f32.mxu1 %v112_v37  ;;  %2301 = vmatpush3.msra.mxu0 %v133_v36  ;;  %v2539_v44 = vpack.c.bf16 %v653_v41, %v646_v40  ;;  %v2543_v46 = vpack.c.bf16 %v667_v45, %v660_v43  ;;  %v672_v57 = vand.u32 4294901760, %v671_v53  ;;  %v2865_v14 = vpack.c.bf16 %v564_v52, %v561_v51 }
   0xf   :  { %2298 = vmatmul.mubr.f32.vlgmr.msra.gmra.mrb[0].mxu1 %v122_v38  ;;  %2303 = vmatmul.mubr.f32.vlgmr.msra.gmra.mrb[0].mxu0 %v2789_v11  ;;  %v679_v58 = vand.u32 4294901760, %v678_v54  ;;  %v685_v63 = vsub.f32 %v539_v55, %v567_v59  ;;  %v692_v0 = vsub.f32 %v540_v56, %v570_v60  ;;  %v2867_v15 = vpack.c.bf16 %v570_v60, %v567_v59 }
  0x10   :  { %2305 = vmatprep.subr.mxu0 %v130_v17  ;;  %2307 = vmatprep.mubr.f32.mxu0 %v109_v18  ;;  %v673_v61 = vsub.f32 %v671_v53, %v672_v57  ;;  %v2563_v16 = vpack.c.bf16 %v678_v54, %v671_v53  ;;  %v2559_v43 = vpack.c.bf16 %v2818_v28, %v2813_v25  ;;  %v1142_v25 = vld [vmem:[%s2944_s2] sm:$0xff]  ;;  %v1143_v28 = vld [vmem:[%s2944_s2 + $0x8] sm:$0xff] }
  0x11   :  { %2306 = vmatpush3.msra.mxu0 %v130_v17  ;;  %2540 = vmatprep.subr.bf16.mxu1 %v2539_v44  ;;  %v680_v62 = vsub.f32 %v678_v54, %v679_v58  ;;  %v686_v5 = vand.u32 4294901760, %v685_v63  ;;  %v693_v6 = vand.u32 4294901760, %v692_v0  ;;  %v2567_v17 = vpack.c.bf16 %v692_v0, %v685_v63 }
  0x12   :  { %2310 = vmatprep.subr.mxu0 %v2785_v9  ;;  %2542 = vmatpush3.bf16.msra.mxu1 %v2539_v44  ;;  %v674_v3 = vand.u32 4294901760, %v673_v61  ;;  %v2595_v18 = vpack.c.bf16 %v679_v58, %v672_v57  ;;  %v2587_v53 = vpack.c.bf16 %v651_v27, %v644_v26  ;;  %v2591_v54 = vpack.c.bf16 %v665_v35, %v658_v32 }
  0x13   :  { %2544 = vmatprep.subr.bf16.mxu1 %v2543_v46  ;;  %v681_v4 = vand.u32 4294901760, %v680_v62  ;;  %v687_v8 = vsub.f32 %v685_v63, %v686_v5  ;;  %v1154_v26 = vand.u32 4294901760, %v1144_v20  ;;  %v1157_v27 = vand.u32 4294901760, %v1145_v21 }
  0x14   :  { %v1148_v32 = vsel %vm1146_vm3, %v1142_v25, 0 }
  0x15   :  { %v2547_v7 = vpack.c.bf16 %v681_v4, %v674_v3  ;;  %v1220_v35 = vand.u32 4294901760, %v1148_v32  ;;  %v1242_v56 = vsub.f32 %v1144_v20, %v1154_v26  ;;  %v1249_v57 = vsub.f32 %v1145_v21, %v1157_v27 }
  0x16   :  { %2546 = vmatpush3.bf16.msra.mxu1 %v2543_v46 }
  0x17   :  { %2308 = vmatmul.mubr.f32.vlgmr.msra.gmra.mrb[0].mxu0 %v119_v19  ;;  %2548 = vmatprep.subr.bf16.mxu1 %v2547_v7  ;;  %v2599_v19 = vpack.c.bf16 %v693_v6, %v686_v5  ;;  %v1221_v58 = vsub.f32 %v1148_v32, %v1220_v35  ;;  %v1243_v60 = vand.u32 4294901760, %v1242_v56  ;;  %v1250_v61 = vand.u32 4294901760, %v1249_v57 }
  0x18   :  { %2311 = vmatpush3.msra.mxu0 %v2785_v9  ;;  %2312 = vmatprep.mubr.f32.mxu0 %v110_v23  ;;  %v1131_v23 = vsel %vm31_vm1, %v2764_v2, 0.0 }
  0x19   :  { %2315 = vmatprep.subr.mxu0 %v131_v22  ;;  %v1222_v62 = vand.u32 4294901760, %v1221_v58  ;;  %v1251_v3 = vsub.f32 %v1249_v57, %v1250_v61 }
  0x1a   :  { %2550 = vmatpush3.bf16.msra.mxu1 %v2547_v7 }
  0x1b   :  { %v1223_v4 = vsub.f32 %v1221_v58, %v1222_v62  ;;  %v1252_v7 = vand.u32 4294901760, %v1251_v3 }
  0x1f   :  { %2313 = vmatmul.mubr.f32.vlgmr.msra.gmra.mrb[0].mxu0 %v120_v24 }
  0x20   :  { %2316 = vmatpush3.msra.mxu0 %v131_v22  ;;  %2317 = vmatprep.mubr.f32.mxu0 %v2787_v10  ;;  %v1128_v22 = vsel %vm31_vm1, %v2759_v1, 0.0 }
  0x21   :  { %2320 = vmatprep.subr.mxu0 %v2785_v9  ;;  %1129 = vadd.xlane.f32.xlu0 %v1128_v22 }
  0x25   :  { %1132 = vadd.xlane.f32.xlu0 %v1131_v23 }
  0x27   :  { %2318 = vmatmul.mubr.f32.vlgmr.msra.gmra.mrb[0].mxu0 %v2789_v11 }
  0x28   :  { %2321 = vmatpush3.msra.mxu0 %v2785_v9  ;;  %2322 = vmatprep.mubr.f32.mxu0 %v2787_v10  ;;  %v694_v9 = vsub.f32 %v692_v0, %v693_v6  ;;  %v688_v10 = vand.u32 4294901760, %v687_v8  ;;  %v1244_v0 = vsub.f32 %v1242_v56, %v1243_v60  ;;  %v1224_v8 = vand.u32 4294901760, %v1223_v4 }
  0x29   :  { %2524 = vmatprep.subr.bf16.mxu0 %v2839_v47 }
  0x2a   :  { %v1245_v6 = vand.u32 4294901760, %v1244_v0 }
  0x2f   :  { %2323 = vmatmul.mubr.f32.vlgmr.msra.gmra.mrb[0].mxu0 %v2789_v11  ;;  %v695_v11 = vand.u32 4294901760, %v694_v9 }
  0x30   :  { %2526 = vmatpush3.bf16.msra.mxu0 %v2839_v47 }
  0x31   :  { %2528 = vmatprep.subr.bf16.mxu0 %v2845_v48  ;;  %v2551_v12 = vpack.c.bf16 %v695_v11, %v688_v10  ;;  %v2623_v10 = vpack.c.bf16 %v1252_v7, %v1245_v6  ;;  %v2627_v11 = vpack.c.bf16 %v1249_v57, %v1242_v56 }
  0x33   :  { %2552 = vmatprep.subr.bf16.mxu1 %v2551_v12 }
  0x34   :  { %2530 = vmatpush3.bf16.msra.mxu0 %v2845_v48  ;;  %2554 = vmatpush3.bf16.msra.mxu1 %v2551_v12  ;;  %v2635_v12 = vpack.c.bf16 %v1250_v61, %v1243_v60 }
  0x35   :  { %2556 = vmatprep.subr.bf16.mxu1 %v2555_v13  ;;  %2532 = vmatprep.subr.bf16.mxu0 %v2865_v14 }
  0x38   :  { %2534 = vmatpush3.bf16.msra.mxu0 %v2865_v14 }
  0x39   :  { %2536 = vmatprep.subr.bf16.mxu0 %v2867_v15 }
  0x3c   :  { %2538 = vmatpush3.bf16.msra.mxu0 %v2867_v15 }
  0xe2   :  { %v2299_v24 = vpop.f32.mrb[0].mxu1 }
  0xe3   :  { %v114_v29 = vpop.f32.mrb[1].mxu1 }
 0x102   :  { %v2324_v31 = vpop.f32.mrb[0].mxu0 }
 0x103   :  { %v2667_v33 = vadd.f32 %v2324_v31, %v2299_v24  ;;  %v521_v36 = vpop.f32.mrb[1].mxu0 }
 0x104   :  { %v2668_v1 = vadd.f32 %v521_v36, %v114_v29 }
 0x105   :  { %v532_v37 = vmul.f32 %v2667_v33, %v29_v30 }
 0x106   :  { %v531_v38 = vmul.f32 %v2668_v1, %v28_v34 }
 0x107   :  { %v546_v39 = vsel %vm541_vm2, %v532_v37, 0 }
 0x108   :  { %v631_v2 = vand.u32 4294901760, %v546_v39  ;;  %v543_v40 = vsel %vm541_vm2, %v531_v38, 0  ;;  %v1130_v38 = vpop.xlane.xlu0 %1129 }
 0x109   :  { %v621_v41 = vand.u32 4294901760, %v543_v40 }
 0x10a   :  { %v632_v42 = vsub.f32 %v546_v39, %v631_v2 }
 0x10b   :  { %2360 = vmatprep.mubr.f32.mxu1 %v621_v41  ;;  %v622_v44 = vsub.f32 %v543_v40, %v621_v41  ;;  %v1134_v40 = vmax.f32 %v1130_v38, 1.0 }
 0x10c   :  { %2361 = vmatmul.mubr.f32.vlgmr.msra.gmra.mrb[2].mxu1 %v631_v2  ;;  %v633_v45 = vand.u32 4294901760, %v632_v42  ;;  %v1133_v39 = vpop.xlane.xlu0 %1132 }
 0x10d   :  { %2558 = vmatpush3.bf16.msra.mxu1 %v2555_v13  ;;  %2379 = vmatprep.mubr.f32.mxu1 %v622_v44  ;;  %v623_v46 = vand.u32 4294901760, %v622_v44  ;;  %v1140_v13 = vld [vmem:[%s2945_s5] sm:$0xff] }
 0x10e   :  { %2560 = vmatprep.subr.bf16.mxu1 %v2559_v43  ;;  %v634_v49 = vsub.f32 %v632_v42, %v633_v45 }
 0x10f   :  { %v624_v50 = vsub.f32 %v622_v44, %v623_v46 }
 0x110   :  { %v635_v52 = vand.u32 4294901760, %v634_v49 }
 0x111   :  { %2562 = vmatpush3.bf16.msra.mxu1 %v2559_v43  ;;  %v625_v51 = vand.u32 4294901760, %v624_v50 }
 0x112   :  { %2564 = vmatprep.subr.bf16.mxu1 %v2563_v16 }
 0x113   :  { %2341 = vmatprep.mubr.f32.mxu0 %v625_v51 }
 0x114   :  { %2342 = vmatmul.mubr.f32.vlgmr.msra.gmra.mrb[2].mxu0 %v635_v52 }
 0x115   :  { %2566 = vmatpush3.bf16.msra.mxu1 %v2563_v16  ;;  %2443 = vmatprep.mubr.f32.mxu0 %v1224_v8 }
 0x116   :  { %2568 = vmatprep.subr.bf16.mxu1 %v2567_v17 }
 0x119   :  { %2570 = vmatpush3.bf16.msra.mxu1 %v2567_v17 }
 0x11a   :  { %2572 = vmatprep.subr.bf16.mxu1 %v2839_v47 }
 0x11c   :  { %2380 = vmatmul.mubr.f32.vlgmr.msra.gmra.mrb[2].mxu1 %v632_v42 }
 0x11d   :  { %2574 = vmatpush3.bf16.msra.mxu1 %v2839_v47  ;;  %2398 = vmatprep.mubr.f32.mxu1 %v623_v46 }
 0x11e   :  { %2576 = vmatprep.subr.bf16.mxu1 %v2845_v48 }
 0x121   :  { %2578 = vmatpush3.bf16.msra.mxu1 %v2845_v48 }
 0x122   :  { %2580 = vmatprep.subr.bf16.mxu1 %v2865_v14 }
 0x125   :  { %2582 = vmatpush3.bf16.msra.mxu1 %v2865_v14 }
 0x126   :  { %2584 = vmatprep.subr.bf16.mxu1 %v2867_v15 }
 0x129   :  { %2586 = vmatpush3.bf16.msra.mxu1 %v2867_v15 }
 0x12a   :  { %2588 = vmatprep.subr.bf16.mxu1 %v2587_v53 }
 0x12c   :  { %2399 = vmatmul.mubr.f32.vlgmr.msra.gmra.mrb[2].mxu1 %v633_v45 }
 0x12d   :  { %2590 = vmatpush3.bf16.msra.mxu1 %v2587_v53  ;;  %2417 = vmatprep.mubr.f32.mxu1 %v621_v41 }
 0x12e   :  { %2592 = vmatprep.subr.bf16.mxu1 %v2591_v54 }
 0x131   :  { %2594 = vmatpush3.bf16.msra.mxu1 %v2591_v54 }
 0x132   :  { %2596 = vmatprep.subr.bf16.mxu1 %v2595_v18 }
 0x135   :  { %2598 = vmatpush3.bf16.msra.mxu1 %v2595_v18 }
 0x136   :  { %2600 = vmatprep.subr.bf16.mxu1 %v2599_v19 }
 0x139   :  { %2602 = vmatpush3.bf16.msra.mxu1 %v2599_v19 }
 0x13a   :  { %2604 = vmatprep.subr.bf16.mxu1 %v2839_v47 }
 0x13c   :  { %2418 = vmatmul.mubr.f32.vlgmr.msra.gmra.mrb[2].mxu1 %v631_v2 }
 0x13d   :  { %2606 = vmatpush3.bf16.msra.mxu1 %v2839_v47  ;;  %2436 = vmatprep.mubr.f32.mxu1 %v621_v41  ;;  %v1151_v47 = vsel %vm1146_vm3, %v1143_v28, 0 }
 0x13e   :  { %2608 = vmatprep.subr.bf16.mxu1 %v2845_v48  ;;  %v1230_v55 = vand.u32 4294901760, %v1151_v47 }
 0x140   :  { %v1231_v59 = vsub.f32 %v1151_v47, %v1230_v55 }
 0x141   :  { %2610 = vmatpush3.bf16.msra.mxu1 %v2845_v48  ;;  %v2619_v48 = vpack.c.bf16 %v1157_v27, %v1154_v26 }
 0x142   :  { %2612 = vmatprep.subr.bf16.mxu1 %v2865_v14  ;;  %v1232_v63 = vand.u32 4294901760, %v1231_v59 }
 0x143   :  { %2620 = vmatprep.subr.bf16.mxu0 %v2619_v48 }
 0x144   :  { %2622 = vmatpush3.bf16.msra.mxu0 %v2619_v48  ;;  %v1233_v5 = vsub.f32 %v1231_v59, %v1232_v63 }
 0x145   :  { %2614 = vmatpush3.bf16.msra.mxu1 %v2865_v14  ;;  %2624 = vmatprep.subr.bf16.mxu0 %v2623_v10  ;;  %v1141_v14 = vld [vmem:[%s2945_s5 + $0x8] sm:$0xff] }
 0x146   :  { %2616 = vmatprep.subr.bf16.mxu1 %v2867_v15  ;;  %v1234_v9 = vand.u32 4294901760, %v1233_v5  ;;  %v1665_v16 = vand.u32 4294901760, %v1141_v14 }
 0x148   :  { %2444 = vmatmul.mubr.f32.vlgmr.msra.gmra.mrb[4].mxu0 %v1234_v9  ;;  %v1757_v19 = vsub.f32 %v1141_v14, %v1665_v16 }
 0x149   :  { %2618 = vmatpush3.bf16.msra.mxu1 %v2867_v15  ;;  %2626 = vmatpush3.bf16.msra.mxu0 %v2623_v10  ;;  %v1662_v15 = vand.u32 4294901760, %v1140_v13 }
 0x14a   :  { %2450 = vmatprep.mubr.f32.mxu0 %v1220_v35  ;;  %2628 = vmatprep.subr.bf16.mxu0 %v2627_v11  ;;  %v1758_v23 = vand.u32 4294901760, %v1757_v19 }
 0x14b   :  { %v2643_v17 = vpack.c.bf16 %v1665_v16, %v1662_v15  ;;  %v1750_v18 = vsub.f32 %v1140_v13, %v1662_v15 }
 0x14c   :  { %2437 = vmatmul.mubr.f32.vlgmr.msra.gmra.mrb[2].mxu1 %v631_v2  ;;  %v1759_v29 = vsub.f32 %v1757_v19, %v1758_v23  ;;  %v1135_v2 = vmax.f32 %v1133_v39, 1.0 }
 0x14d   :  { %v1751_v22 = vand.u32 4294901760, %v1750_v18  ;;  %v2651_v34 = vpack.c.bf16 %v1757_v19, %v1750_v18 }
 0x14e   :  { %v1760_v31 = vand.u32 4294901760, %v1759_v29  ;;  %2709 = vrcp.f32 %v1135_v2 }
 0x14f   :  { %v1752_v24 = vsub.f32 %v1750_v18, %v1751_v22  ;;  %v2659_v36 = vpack.c.bf16 %v1758_v23, %v1751_v22  ;;  %2711 = vrcp.f32 %v1134_v40 }
 0x150   :  { %2451 = vmatmul.mubr.f32.vlgmr.msra.gmra.mrb[4].mxu0 %v1230_v55 }
 0x151   :  { %2630 = vmatpush3.bf16.msra.mxu0 %v2627_v11  ;;  %2457 = vmatprep.mubr.f32.mxu0 %v1221_v58  ;;  %v1753_v30 = vand.u32 4294901760, %v1752_v24 }
 0x152   :  { %2632 = vmatprep.subr.bf16.mxu0 %v2619_v48 }
 0x153   :  { %v2647_v33 = vpack.c.bf16 %v1760_v31, %v1753_v30 }
 0x158   :  { %2458 = vmatmul.mubr.f32.vlgmr.msra.gmra.mrb[4].mxu0 %v1231_v59  ;;  %v2710_v41 = vpop.eup %2709 }
 0x159   :  { %2634 = vmatpush3.bf16.msra.mxu0 %v2619_v48  ;;  %2464 = vmatprep.mubr.f32.mxu0 %v1222_v62  ;;  %v2712_v46 = vpop.eup %2711 }
 0x15a   :  { %2636 = vmatprep.subr.bf16.mxu0 %v2635_v12 }
 0x160   :  { %2465 = vmatmul.mubr.f32.vlgmr.msra.gmra.mrb[4].mxu0 %v1232_v63 }
 0x161   :  { %2638 = vmatpush3.bf16.msra.mxu0 %v2635_v12  ;;  %2471 = vmatprep.mubr.f32.mxu0 %v1220_v35 }
 0x162   :  { %2640 = vmatprep.subr.bf16.mxu0 %v2619_v48 }
 0x168   :  { %2472 = vmatmul.mubr.f32.vlgmr.msra.gmra.mrb[4].mxu0 %v1230_v55 }
 0x169   :  { %2642 = vmatpush3.bf16.msra.mxu0 %v2619_v48  ;;  %2478 = vmatprep.mubr.f32.mxu0 %v1220_v35 }
 0x16a   :  { %2644 = vmatprep.subr.bf16.mxu0 %v2643_v17 }
 0x170   :  { %2479 = vmatmul.mubr.f32.vlgmr.msra.gmra.mrb[4].mxu0 %v1230_v55 }
 0x171   :  { %2646 = vmatpush3.bf16.msra.mxu0 %v2643_v17 }
 0x172   :  { %2648 = vmatprep.subr.bf16.mxu0 %v2647_v33 }
 0x1e7   :  { %v2343_v1 = vpop.f32.mrb[2].mxu0 }
 0x1e8   :  { %v627_v37 = vpop.f32.mrb[3].mxu0 }
 0x21f   :  { %v2438_v42 = vpop.f32.mrb[2].mxu1 }
 0x220   :  { %v2669_v43 = vadd.f32 %v2438_v42, %v2343_v1  ;;  %v1118_v44 = vpop.f32.mrb[3].mxu1 }
 0x221   :  { %v2670_v45 = vadd.f32 %v1118_v44, %v627_v37 }
 0x222   :  { %v1139_v49 = vmul.f32 %v2710_v41, %v2669_v43 }
 0x223   :  { %v1138_v50 = vmul.f32 %v2712_v46, %v2670_v45 }
 0x224   :  { %v1659_v51 = vsel %vm1146_vm3, %v1139_v49, 0 }
 0x225   :  { %v1738_v52 = vand.u32 4294901760, %v1659_v51  ;;  %v1656_v53 = vsel %vm1146_vm3, %v1138_v50, 0 }
 0x226   :  { %v1728_v54 = vand.u32 4294901760, %v1656_v53 }
 0x227   :  { %v1739_v20 = vsub.f32 %v1659_v51, %v1738_v52 }
 0x228   :  { %v1729_v21 = vsub.f32 %v1656_v53, %v1728_v54 }
 0x229   :  { %v1740_v25 = vand.u32 4294901760, %v1739_v20 }
 0x22a   :  { %v1730_v26 = vand.u32 4294901760, %v1729_v21 }
 0x22b   :  { %v1741_v27 = vsub.f32 %v1739_v20, %v1740_v25 }
 0x22c   :  { %v1731_v28 = vsub.f32 %v1729_v21, %v1730_v26 }
 0x22d   :  { %v1742_v35 = vand.u32 4294901760, %v1741_v27 }
 0x22e   :  { %v1732_v32 = vand.u32 4294901760, %v1731_v28 }
 0x230   :  { %2485 = vmatprep.mubr.f32.mxu0 %v1732_v32 }
 0x231   :  { %2486 = vmatmul.mubr.f32.vlgmr.msra.gmra.mrb[4].mxu0 %v1742_v35 }
 0x232   :  { %2650 = vmatpush3.bf16.msra.mxu0 %v2647_v33  ;;  %2492 = vmatprep.mubr.f32.mxu0 %v1728_v54 }
 0x233   :  { %2652 = vmatprep.subr.bf16.mxu0 %v2651_v34 }
 0x239   :  { %2493 = vmatmul.mubr.f32.vlgmr.msra.gmra.mrb[4].mxu0 %v1738_v52 }
 0x23a   :  { %2654 = vmatpush3.bf16.msra.mxu0 %v2651_v34  ;;  %2499 = vmatprep.mubr.f32.mxu0 %v1729_v21 }
 0x23b   :  { %2656 = vmatprep.subr.bf16.mxu0 %v2643_v17 }
 0x241   :  { %2500 = vmatmul.mubr.f32.vlgmr.msra.gmra.mrb[4].mxu0 %v1739_v20 }
 0x242   :  { %2658 = vmatpush3.bf16.msra.mxu0 %v2643_v17  ;;  %2506 = vmatprep.mubr.f32.mxu0 %v1730_v26 }
 0x243   :  { %2660 = vmatprep.subr.bf16.mxu0 %v2659_v36 }
 0x249   :  { %2507 = vmatmul.mubr.f32.vlgmr.msra.gmra.mrb[4].mxu0 %v1740_v25 }
 0x24a   :  { %2662 = vmatpush3.bf16.msra.mxu0 %v2659_v36  ;;  %2513 = vmatprep.mubr.f32.mxu0 %v1728_v54 }
 0x24b   :  { %2664 = vmatprep.subr.bf16.mxu0 %v2643_v17 }
 0x251   :  { %2514 = vmatmul.mubr.f32.vlgmr.msra.gmra.mrb[4].mxu0 %v1738_v52 }
 0x252   :  { %2666 = vmatpush3.bf16.msra.mxu0 %v2643_v17  ;;  %2520 = vmatprep.mubr.f32.mxu0 %v1728_v54 }
 0x259   :  { %2521 = vmatmul.mubr.f32.vlgmr.msra.gmra.mrb[4].mxu0 %v1738_v52 }
 0x32c   :  { %v2522_v47 = vpop.f32.mrb[4].mxu0 }
 0x32d   :  { %2164 = vst.msk [vmem:[%s2946_s7 + $0x8] sm:$0xff] %vm1146_vm3, %v2522_v47  ;;  %v2153_v48 = vpop.f32.mrb[5].mxu0 }
 0x32e   :  { %2163 = vst.msk [vmem:[%s2946_s7] sm:$0xff] %vm1146_vm3, %v2153_v48 }

// kernel: dtp_forward.2
= control target key start
LH: loop header
LB: loop body
LE: loop exit
PB: predicated region body
PF: predicated region fallthrough
CT: control target
= control target key end

     0   :  { %vm117_vm0 = vcmask 1041408   ;;  %vm92_vm1 = vcmask 211968   ;;  %vm964_vm2 = vcmask 523264   ;;  %vm7940_vm3 = vcmask 1043456   ;;  %s23358_s1 = inlined_call_operand.vmem [shape: f32[26,64], index: 1, kind: input, shape index: {}]   ;;  %s23359_s0 = inlined_call_operand.vmem [shape: f32[64,26], index: 0, kind: input, shape index: {}]   ;;  %s23360_s9 = inlined_call_operand.vmem [shape: f32[64,64], index: 9, kind: input, shape index: {}]   ;;  %s23361_s2 = inlined_call_operand.vmem [shape: f32[1,64], index: 2, kind: input, shape index: {}]   ;;  %s23362_s4 = inlined_call_operand.vmem [shape: f32[64,64], index: 4, kind: input, shape index: {}]   ;;  %s23363_s3 = inlined_call_operand.vmem [shape: f32[1,64], index: 3, kind: input, shape index: {}]   ;;  %s23364_s5 = inlined_call_operand.vmem [shape: f32[1,64], index: 5, kind: input, shape index: {}]   ;;  %s23365_s7 = inlined_call_operand.vmem [shape: f32[64,48], index: 7, kind: input, shape index: {}]   ;;  %s23366_s10 = inlined_call_operand.vmem [shape: f32[26,36], index: 10, kind: input, shape index: {}]   ;;  %s23367_s6 = inlined_call_operand.vmem [shape: f32[1,64], index: 6, kind: input, shape index: {}]   ;;  %s23368_s11 = inlined_call_operand.vmem [shape: f32[26,36], index: 11, kind: input, shape index: {}]   ;;  %s23369_s16 = inlined_call_operand.vmem [shape: f32[36,12], index: 16, kind: input, shape index: {}]   ;;  %s23370_s14 = inlined_call_operand.vmem [shape: f32[12,48], index: 14, kind: input, shape index: {}]   ;;  %s23371_s13 = inlined_call_operand.vmem [shape: f32[26,48], index: 13, kind: input, shape index: {}]   ;;  %s23372_s18 = inlined_call_operand.vmem [shape: f32[48,12], index: 18, kind: input, shape index: {}]   ;;  %s23373_s12 = inlined_call_operand.vmem [shape: f32[26,36], index: 12, kind: input, shape index: {}]   ;;  %s23374_s8 = inlined_call_operand.vmem [shape: f32[1,48], index: 8, kind: input, shape index: {}]   ;;  %s23375_s15 = inlined_call_operand.vmem [shape: f32[12,36], index: 15, kind: input, shape index: {}]   ;;  %s23376_s19 = inlined_call_operand.vmem [shape: f32[36,16], index: 19, kind: input, shape index: {}]   ;;  %s23377_s17 = inlined_call_operand.vmem [shape: f32[48,16], index: 17, kind: input, shape index: {}]   ;;  %s23378_s20 = inlined_call_operand.vmem [shape: f32[64,16], index: 20, kind: output, shape index: {}]  }
   0x1   :  { %23492 = sst [smem:[#allocation34_spill]] %s23358_s1  ;;  %vm7915_vm4 = vcmask 293888   ;;  %vm8749_vm5 = vcmask 97280   ;;  %vm10340_vm6 = vcmask 392192   ;;  %vm14416_vm7 = vcmask 130048  }
   0x2   :  { %23493 = sst [smem:[#allocation35_spill]] %s23359_s0  ;;  %s23497_s23 = sld [smem:[#allocation34_spill]] }
   0x3   :  { %23494 = sst [smem:[#allocation36_spill]] %s23360_s9  ;;  %s23498_s29 = sld [smem:[#allocation35_spill]] }
   0x4   :  { %23495 = sst [smem:[#allocation37_spill]] %s23361_s2  ;;  %s23531_s1 = sld [smem:[#allocation36_spill]] }
   0x5   :  { %23496 = sst [smem:[#allocation38_spill]] %s23362_s4  ;;  %s23532_s0 = sld [smem:[#allocation37_spill]] }
   0x8   :  { %v81_v0 = vld [vmem:[%s23497_s23] sm:$0xff]  ;;  %v82_v1 = vld [vmem:[%s23497_s23 + $0x8] sm:$0xff]  ;;  %v83_v2 = vld [vmem:[%s23497_s23 + $0x10] sm:$0xff] }
   0x9   :  { %v122_v3 = vand.u32 4294901760, %v81_v0  ;;  %v125_v4 = vand.u32 4294901760, %v82_v1  ;;  %v84_v5 = vld [vmem:[%s23497_s23 + $0x18] sm:$0x3]  ;;  %v128_v6 = vand.u32 4294901760, %v83_v2  ;;  %v65_v7 = vld [vmem:[%s23498_s29] sm:$0xff] }
   0xa   :  { %v119_v8 = vsel %vm117_vm0, %v84_v5, 0  ;;  %v94_v9 = vsel %vm92_vm1, %v65_v7, 0  ;;  %v66_v10 = vld [vmem:[%s23498_s29 + $0x8] sm:$0xff]  ;;  %v67_v11 = vld [vmem:[%s23498_s29 + $0x10] sm:$0xff]  ;;  %v68_v12 = vld [vmem:[%s23498_s29 + $0x18] sm:$0xff]  ;;  %s23538_s23 = sld [smem:[#allocation38_spill]] }
   0xb   :  { %v20255_v13 = vpack.c.bf16 %v125_v4, %v122_v3  ;;  %v131_v14 = vand.u32 4294901760, %v119_v8  ;;  %v20257_v15 = vand.u32 4294901760, %v94_v9  ;;  %v97_v16 = vsel %vm92_vm1, %v66_v10, 0  ;;  %v69_v21 = vld [vmem:[%s23498_s29 + $0x20] sm:$0xff]  ;;  %v70_v22 = vld [vmem:[%s23498_s29 + $0x28] sm:$0xff]  ;;  %v71_v51 = vld [vmem:[%s23498_s29 + $0x30] sm:$0xff] }
   0xc   :  { %v20260_v17 = vand.u32 4294901760, %v97_v16  ;;  %v20262_v18 = vsub.f32 %v81_v0, %v122_v3  ;;  %v20264_v19 = vsub.f32 %v82_v1, %v125_v4  ;;  %v100_v20 = vsel %vm92_vm1, %v67_v11, 0  ;;  %v72_v52 = vld [vmem:[%s23498_s29 + $0x38] sm:$0xff] }
   0xd   :  { %23499 = vst [vmem:[#allocation2_spill] sm:$0xff] %v20257_v15  ;;  %18183 = vmatprep.subr.bf16.mxu0 %v20255_v13  ;;  %v20274_v23 = vpack.c.bf16 %v131_v14, %v128_v6  ;;  %v20277_v24 = vsub.f32 %v94_v9, %v20257_v15  ;;  %v20279_v25 = vand.u32 4294901760, %v100_v20  ;;  %v103_v26 = vsel %vm92_vm1, %v68_v12, 0 }
   0xe   :  { %23500 = vst [vmem:[#allocation3_spill] sm:$0xff] %v20260_v17  ;;  %18185 = vmatpush3.bf16.msra.mxu0 %v20255_v13  ;;  %v20284_v27 = vsub.f32 %v97_v16, %v20260_v17  ;;  %v273_v28 = vand.u32 4294901760, %v20262_v18  ;;  %v280_v29 = vand.u32 4294901760, %v20264_v19  ;;  %v20288_v30 = vand.u32 4294901760, %v103_v26 }
   0xf   :  { %23501 = vst [vmem:[#allocation4_spill] sm:$0xff] %v20277_v24  ;;  %23502 = vst [vmem:[#allocation5_spill] sm:$0xff] %v20279_v25  ;;  %18187 = vmatprep.subr.bf16.mxu0 %v20274_v23  ;;  %v20292_v31 = vand.u32 4294901760, %v20277_v24  ;;  %v20295_v32 = vsub.f32 %v100_v20, %v20279_v25  ;;  %v106_v33 = vsel %vm92_vm1, %v69_v21, 0  ;;  %v109_v34 = vsel %vm92_vm1, %v70_v22, 0 }
  0x10   :  { %23503 = vst [vmem:[#allocation6_spill] sm:$0xff] %v20284_v27  ;;  %23504 = vst [vmem:[#allocation7_spill] sm:$0xff] %v20288_v30  ;;  %v20300_v35 = vand.u32 4294901760, %v20284_v27  ;;  %v274_v36 = vsub.f32 %v20262_v18, %v273_v28  ;;  %v281_v37 = vsub.f32 %v20264_v19, %v280_v29  ;;  %v20309_v38 = vsub.f32 %v103_v26, %v20288_v30 }
  0x11   :  { %23505 = vst [vmem:[#allocation8_spill] sm:$0xff] %v20292_v31  ;;  %23506 = vst [vmem:[#allocation9_spill] sm:$0xff] %v20295_v32  ;;  %v193_v39 = vsub.f32 %v20277_v24, %v20292_v31  ;;  %v20314_v40 = vand.u32 4294901760, %v20295_v32  ;;  %v20316_v41 = vand.u32 4294901760, %v106_v33  ;;  %v20318_v42 = vand.u32 4294901760, %v109_v34 }
  0x12   :  { %23507 = vst [vmem:[#allocation10_spill] sm:$0xff] %v20300_v35  ;;  %23508 = vst [vmem:[#allocation11_spill] sm:$0xff] %v20309_v38  ;;  %18189 = vmatpush3.bf16.msra.mxu0 %v20274_v23  ;;  %v203_v43 = vsub.f32 %v20284_v27, %v20300_v35  ;;  %v275_v44 = vand.u32 4294901760, %v274_v36  ;;  %v282_v45 = vand.u32 4294901760, %v281_v37  ;;  %v20324_v46 = vand.u32 4294901760, %v20309_v38 }
  0x13   :  { %23509 = vst [vmem:[#allocation12_spill] sm:$0xff] %v20314_v40  ;;  %23510 = vst [vmem:[#allocation13_spill] sm:$0xff] %v20316_v41  ;;  %v20326_v47 = vand.u32 4294901760, %v193_v39  ;;  %v213_v48 = vsub.f32 %v20295_v32, %v20314_v40  ;;  %v20331_v49 = vsub.f32 %v106_v33, %v20316_v41  ;;  %v20334_v50 = vsub.f32 %v109_v34, %v20318_v42 }
  0x14   :  { %23511 = vst [vmem:[#allocation14_spill] sm:$0xff] %v20318_v42  ;;  %23512 = vst [vmem:[#allocation15_spill] sm:$0xff] %v20324_v46  ;;  %v20342_v53 = vand.u32 4294901760, %v203_v43  ;;  %v18190_v54 = vpack.c.bf16 %v282_v45, %v275_v44  ;;  %v223_v55 = vsub.f32 %v20309_v38, %v20324_v46  ;;  %v20346_v56 = vsub.f32 %v83_v2, %v128_v6  ;;  %v76_v44 = vld [vmem:[%s23531_s1 + $0x18] sm:$0xff] }
  0x15   :  { %23513 = vst [vmem:[#allocation16_spill] sm:$0xff] %v20326_v47  ;;  %23514 = vst [vmem:[#allocation17_spill] sm:$0xff] %v20331_v49  ;;  %15838 = vmatprep.mubr.f32.mxu0 %v20326_v47  ;;  %v20349_v57 = vand.u32 4294901760, %v213_v48  ;;  %v20352_v58 = vand.u32 4294901760, %v20331_v49  ;;  %v20355_v59 = vand.u32 4294901760, %v20334_v50  ;;  %v20357_v60 = vsub.f32 %v119_v8, %v131_v14 }
  0x16   :  { %23515 = vst [vmem:[#allocation18_spill] sm:$0xff] %v20334_v50  ;;  %23516 = vst [vmem:[#allocation19_spill] sm:$0xff] %v20342_v53  ;;  %15839 = vmatmul.mubr.f32.vlgmr.msra.gmra.mrb[0].mxu0 %v20342_v53  ;;  %18191 = vmatprep.subr.bf16.mxu0 %v18190_v54  ;;  %v20360_v61 = vand.u32 4294901760, %v223_v55  ;;  %v287_v62 = vand.u32 4294901760, %v20346_v56  ;;  %v112_v63 = vsel %vm92_vm1, %v71_v51, 0  ;;  %v115_v0 = vsel %vm92_vm1, %v72_v52, 0 }
  0x17   :  { %23517 = vst [vmem:[#allocation20_spill] sm:$0xff] %v20349_v57  ;;  %23518 = vst [vmem:[#allocation21_spill] sm:$0xff] %v20352_v58  ;;  %18193 = vmatpush3.bf16.msra.mxu0 %v18190_v54  ;;  %15841 = vmatprep.mubr.f32.mxu0 %v20349_v57  ;;  %v233_v1 = vsub.f32 %v20331_v49, %v20352_v58  ;;  %v243_v2 = vsub.f32 %v20334_v50, %v20355_v59  ;;  %v294_v3 = vand.u32 4294901760, %v20357_v60  ;;  %v77_v52 = vld [vmem:[%s23531_s1 + $0x20] sm:$0xff]  ;;  %v78_v54 = vld [vmem:[%s23531_s1 + $0x28] sm:$0xff] }
  0x18   :  { %23519 = vst [vmem:[#allocation22_spill] sm:$0xff] %v20355_v59  ;;  %23520 = vst [vmem:[#allocation23_spill] sm:$0xff] %v20360_v61  ;;  %v20371_v4 = vand.u32 4294901760, %v112_v63  ;;  %v288_v5 = vsub.f32 %v20346_v56, %v287_v62  ;;  %v20374_v6 = vand.u32 4294901760, %v115_v0  ;;  %v18198_v26 = vpack.c.bf16 %v20264_v19, %v20262_v18  ;;  %v74_v18 = vld [vmem:[%s23531_s1 + $0x8] sm:$0xff] }
  0x19   :  { %v20376_v7 = vand.u32 4294901760, %v233_v1  ;;  %v295_v8 = vsub.f32 %v20357_v60, %v294_v3  ;;  %v20383_v10 = vand.u32 4294901760, %v243_v2  ;;  %v18202_v37 = vpack.c.bf16 %v20357_v60, %v20346_v56 }
  0x1a   :  { %23521 = vst [vmem:[#allocation24_spill] sm:$0xff] %v20371_v4  ;;  %23522 = vst [vmem:[#allocation25_spill] sm:$0xff] %v20374_v6  ;;  %v20380_v9 = vsub.f32 %v112_v63, %v20371_v4  ;;  %15842 = vmatmul.mubr.f32.gmra.mrb[2].mxu0 %v20360_v61  ;;  %v289_v11 = vand.u32 4294901760, %v288_v5  ;;  %v20386_v12 = vsub.f32 %v115_v0, %v20374_v6  ;;  %v999_v48 = vand.u32 4294901760, %v76_v44  ;;  %v80_v63 = vld [vmem:[%s23531_s1 + $0x38] sm:$0xff] }
  0x1b   :  { %23523 = vst [vmem:[#allocation26_spill] sm:$0xff] %v20376_v7  ;;  %23525 = vst [vmem:[#allocation28_spill] sm:$0xff] %v20383_v10  ;;  %15844 = vmatprep.mubr.f32.mxu0 %v20376_v7  ;;  %v296_v14 = vand.u32 4294901760, %v295_v8  ;;  %v18214_v39 = vpack.c.bf16 %v280_v29, %v273_v28  ;;  %v18218_v43 = vpack.c.bf16 %v294_v3, %v287_v62  ;;  %v75_v29 = vld [vmem:[%s23531_s1 + $0x10] sm:$0xff]  ;;  %v1002_v55 = vand.u32 4294901760, %v77_v52 }
  0x1c   :  { %23524 = vst [vmem:[#allocation27_spill] sm:$0xff] %v20380_v9  ;;  %23526 = vst [vmem:[#allocation29_spill] sm:$0xff] %v20386_v12  ;;  %v20390_v16 = vand.u32 4294901760, %v20380_v9  ;;  %v20393_v20 = vand.u32 4294901760, %v20386_v12  ;;  %v996_v45 = vand.u32 4294901760, %v75_v29  ;;  %v1005_v56 = vand.u32 4294901760, %v78_v54 }
  0x1d   :  { %v18194_v21 = vpack.c.bf16 %v296_v14, %v289_v11  ;;  %v79_v62 = vld [vmem:[%s23531_s1 + $0x30] sm:$0xff]  ;;  %v1011_v1 = vand.u32 4294901760, %v80_v63 }
  0x1e   :  { %23527 = vst [vmem:[#allocation30_spill] sm:$0xff] %v20390_v16  ;;  %23528 = vst [vmem:[#allocation31_spill] sm:$0xff] %v20393_v20  ;;  %v253_v22 = vsub.f32 %v20380_v9, %v20390_v16  ;;  %15845 = vmatmul.mubr.f32.gmra.mrb[4].mxu0 %v20383_v10  ;;  %v263_v33 = vsub.f32 %v20386_v12, %v20393_v20  ;;  %v20480_v51 = vpack.c.bf16 %v999_v48, %v996_v45 }
  0x1f   :  { %18195 = vmatprep.subr.bf16.mxu0 %v18194_v21  ;;  %v20492_v60 = vpack.c.bf16 %v1005_v56, %v1002_v55  ;;  %v1008_v0 = vand.u32 4294901760, %v79_v62 }
  0x20   :  { %v20402_v34 = vand.u32 4294901760, %v253_v22  ;;  %18197 = vmatpush3.bf16.msra.mxu0 %v18194_v21  ;;  %v20404_v36 = vand.u32 4294901760, %v263_v33  ;;  %v1165_v33 = vsub.f32 %v76_v44, %v999_v48 }
  0x21   :  { %18199 = vmatprep.subr.bf16.mxu0 %v18198_v26  ;;  %v20504_v2 = vpack.c.bf16 %v1011_v1, %v1008_v0 }
  0x22   :  { %23529 = vst [vmem:[#allocation32_spill] sm:$0xff] %v20402_v34  ;;  %23530 = vst [vmem:[#allocation33_spill] sm:$0xff] %v20404_v36  ;;  %15847 = vmatprep.mubr.f32.mxu0 %v20402_v34 }
  0x23   :  { %15848 = vmatmul.mubr.f32.gmra.mrb[6].mxu0 %v20404_v36 }
  0x24   :  { %15858 = vmatprep.mubr.f32.mxu0 %v20257_v15 }
  0x27   :  { %15859 = vmatmul.mubr.f32.vlgmr.msra.gmra.mrb[0].mxu0 %v20260_v17 }
  0x28   :  { %18201 = vmatpush3.bf16.msra.mxu0 %v18198_v26  ;;  %15861 = vmatprep.mubr.f32.mxu0 %v20279_v25  ;;  %v1158_v26 = vsub.f32 %v75_v29, %v996_v45 }
  0x29   :  { %18203 = vmatprep.subr.bf16.mxu0 %v18202_v37 }
  0x2b   :  { %15862 = vmatmul.mubr.f32.gmra.mrb[2].mxu0 %v20288_v30 }
  0x2c   :  { %15864 = vmatprep.mubr.f32.mxu0 %v20316_v41  ;;  %18205 = vmatpush3.bf16.msra.mxu0 %v18202_v37 }
  0x2d   :  { %18207 = vmatprep.subr.bf16.mxu0 %v20255_v13 }
  0x2f   :  { %15865 = vmatmul.mubr.f32.gmra.mrb[4].mxu0 %v20318_v42 }
  0x30   :  { %15867 = vmatprep.mubr.f32.mxu0 %v20371_v4 }
  0x33   :  { %15868 = vmatmul.mubr.f32.gmra.mrb[6].mxu0 %v20374_v6 }
  0x34   :  { %15878 = vmatprep.mubr.f32.mxu0 %v20277_v24 }
  0x37   :  { %15879 = vmatmul.mubr.f32.vlgmr.msra.gmra.mrb[0].mxu0 %v20284_v27 }
  0x38   :  { %18209 = vmatpush3.bf16.msra.mxu0 %v20255_v13  ;;  %15881 = vmatprep.mubr.f32.mxu0 %v20295_v32 }
  0x39   :  { %18211 = vmatprep.subr.bf16.mxu0 %v20274_v23 }
  0x3b   :  { %15882 = vmatmul.mubr.f32.gmra.mrb[2].mxu0 %v20309_v38 }
  0x3c   :  { %15884 = vmatprep.mubr.f32.mxu0 %v20331_v49  ;;  %18213 = vmatpush3.bf16.msra.mxu0 %v20274_v23 }
  0x3d   :  { %18215 = vmatprep.subr.bf16.mxu0 %v18214_v39 }
  0x3f   :  { %15885 = vmatmul.mubr.f32.gmra.mrb[4].mxu0 %v20334_v50 }
  0x40   :  { %15887 = vmatprep.mubr.f32.mxu0 %v20380_v9 }
  0x43   :  { %15888 = vmatmul.mubr.f32.gmra.mrb[6].mxu0 %v20386_v12 }
  0x44   :  { %15898 = vmatprep.mubr.f32.mxu0 %v20292_v31 }
  0x47   :  { %15899 = vmatmul.mubr.f32.vlgmr.msra.gmra.mrb[0].mxu0 %v20300_v35 }
  0x48   :  { %18217 = vmatpush3.bf16.msra.mxu0 %v18214_v39  ;;  %15901 = vmatprep.mubr.f32.mxu0 %v20314_v40 }
  0x49   :  { %18219 = vmatprep.subr.bf16.mxu0 %v18218_v43 }
  0x4b   :  { %15902 = vmatmul.mubr.f32.gmra.mrb[2].mxu0 %v20324_v46 }
  0x4c   :  { %15904 = vmatprep.mubr.f32.mxu0 %v20352_v58  ;;  %18221 = vmatpush3.bf16.msra.mxu0 %v18218_v43  ;;  %v1159_v43 = vand.u32 4294901760, %v1158_v26 }
  0x4d   :  { %18223 = vmatprep.subr.bf16.mxu0 %v20255_v13 }
  0x4f   :  { %15905 = vmatmul.mubr.f32.gmra.mrb[4].mxu0 %v20355_v59 }
  0x50   :  { %15907 = vmatprep.mubr.f32.mxu0 %v20390_v16 }
  0x53   :  { %15908 = vmatmul.mubr.f32.gmra.mrb[6].mxu0 %v20393_v20  ;;  %v1179_v20 = vsub.f32 %v78_v54, %v1005_v56 }
  0x54   :  { %15918 = vmatprep.mubr.f32.mxu0 %v20257_v15 }
  0x55   :  { %v1180_v29 = vand.u32 4294901760, %v1179_v20 }
  0x57   :  { %15919 = vmatmul.mubr.f32.vlgmr.msra.gmra.mrb[0].mxu0 %v20260_v17 }
  0x58   :  { %18225 = vmatpush3.bf16.msra.mxu0 %v20255_v13  ;;  %15921 = vmatprep.mubr.f32.mxu0 %v20279_v25  ;;  %v73_v13 = vld [vmem:[%s23531_s1] sm:$0xff] }
  0x59   :  { %18227 = vmatprep.subr.bf16.mxu0 %v20274_v23  ;;  %v990_v19 = vand.u32 4294901760, %v73_v13 }
  0x5b   :  { %15922 = vmatmul.mubr.f32.gmra.mrb[2].mxu0 %v20288_v30  ;;  %v1144_v3 = vsub.f32 %v73_v13, %v990_v19  ;;  %v1166_v13 = vand.u32 4294901760, %v1165_v33 }
  0x5c   :  { %15924 = vmatprep.mubr.f32.mxu0 %v20316_v41  ;;  %18229 = vmatpush3.bf16.msra.mxu0 %v20274_v23  ;;  %v993_v23 = vand.u32 4294901760, %v74_v18 }
  0x5d   :  { %v1145_v8 = vand.u32 4294901760, %v1144_v3  ;;  %v20515_v16 = vpack.c.bf16 %v1166_v13, %v1159_v43  ;;  %v1167_v59 = vsub.f32 %v1165_v33, %v1166_v13 }
  0x5e   :  { %v20468_v28 = vpack.c.bf16 %v993_v23, %v990_v19  ;;  %v1151_v5 = vsub.f32 %v74_v18, %v993_v23  ;;  %v1160_v19 = vsub.f32 %v1158_v26, %v1159_v43  ;;  %v1172_v23 = vsub.f32 %v77_v52, %v1002_v55 }
  0x5f   :  { %15925 = vmatmul.mubr.f32.gmra.mrb[4].mxu0 %v20318_v42  ;;  %v1146_v21 = vsub.f32 %v1144_v3, %v1145_v8  ;;  %v1168_v44 = vand.u32 4294901760, %v1167_v59 }
  0x60   :  { %15927 = vmatprep.mubr.f32.mxu0 %v20371_v4  ;;  %18279 = vmatprep.subr.bf16.mxu1 %v20468_v28  ;;  %v1152_v11 = vand.u32 4294901760, %v1151_v5 }
  0x61   :  { %18231 = vmatprep.subr.bf16.mxu0 %v20468_v28  ;;  %18281 = vmatpush3.bf16.msra.mxu1 %v20468_v28  ;;  %v1147_v37 = vand.u32 4294901760, %v1146_v21  ;;  %v1181_v21 = vsub.f32 %v1179_v20, %v1180_v29 }
  0x62   :  { %18283 = vmatprep.subr.bf16.mxu1 %v20480_v51  ;;  %v20510_v14 = vpack.c.bf16 %v1152_v11, %v1145_v8  ;;  %v1153_v22 = vsub.f32 %v1151_v5, %v1152_v11  ;;  %v1161_v8 = vand.u32 4294901760, %v1160_v19  ;;  %v1173_v11 = vand.u32 4294901760, %v1172_v23 }
  0x63   :  { %15928 = vmatmul.mubr.f32.gmra.mrb[6].mxu0 %v20374_v6  ;;  %v1182_v52 = vand.u32 4294901760, %v1181_v21 }
  0x64   :  { %15938 = vmatprep.mubr.f32.mxu0 %v20257_v15  ;;  %v1154_v39 = vand.u32 4294901760, %v1153_v22  ;;  %v20518_v45 = vpack.c.bf16 %v1180_v29, %v1173_v11  ;;  %v1174_v48 = vsub.f32 %v1172_v23, %v1173_v11  ;;  %v1186_v22 = vsub.f32 %v79_v62, %v1008_v0 }
  0x65   :  { %18285 = vmatpush3.bf16.msra.mxu1 %v20480_v51  ;;  %v20520_v58 = vpack.c.bf16 %v1168_v44, %v1161_v8  ;;  %v20528_v11 = vpack.c.bf16 %v1151_v5, %v1144_v3  ;;  %v20530_v62 = vpack.c.bf16 %v1165_v33, %v1158_v26  ;;  %v20532_v0 = vpack.c.bf16 %v1179_v20, %v1172_v23 }
  0x66   :  { %18287 = vmatprep.subr.bf16.mxu1 %v20492_v60  ;;  %v20513_v18 = vpack.c.bf16 %v1154_v39, %v1147_v37  ;;  %v1193_v37 = vsub.f32 %v80_v63, %v1011_v1  ;;  %v1175_v39 = vand.u32 4294901760, %v1174_v48  ;;  %v1187_v54 = vand.u32 4294901760, %v1186_v22  ;;  %v14429_v1 = vld [vmem:[%s23532_s0] ss:$0 sm:$0xff] }
  0x67   :  { %15939 = vmatmul.mubr.f32.vlgmr.msra.gmra.mrb[0].mxu0 %v20260_v17 }
  0x68   :  { %15941 = vmatprep.mubr.f32.mxu0 %v20279_v25  ;;  %18233 = vmatpush3.bf16.msra.mxu0 %v20468_v28  ;;  %v1194_v55 = vand.u32 4294901760, %v1193_v37  ;;  %v20522_v56 = vpack.c.bf16 %v1182_v52, %v1175_v39  ;;  %v1188_v43 = vsub.f32 %v1186_v22, %v1187_v54  ;;  %v20534_v63 = vpack.c.bf16 %v1193_v37, %v1186_v22 }
  0x69   :  { %18235 = vmatprep.subr.bf16.mxu0 %v20480_v51  ;;  %18289 = vmatpush3.bf16.msra.mxu1 %v20492_v60 }
  0x6a   :  { %18291 = vmatprep.subr.bf16.mxu1 %v20504_v2  ;;  %v20524_v13 = vpack.c.bf16 %v1194_v55, %v1187_v54  ;;  %v1195_v19 = vsub.f32 %v1193_v37, %v1194_v55  ;;  %v1189_v46 = vand.u32 4294901760, %v1188_v43 }
  0x6b   :  { %15942 = vmatmul.mubr.f32.gmra.mrb[2].mxu0 %v20288_v30 }
  0x6c   :  { %15944 = vmatprep.mubr.f32.mxu0 %v20316_v41  ;;  %18237 = vmatpush3.bf16.msra.mxu0 %v20480_v51  ;;  %v1196_v59 = vand.u32 4294901760, %v1195_v19 }
  0x6d   :  { %18239 = vmatprep.subr.bf16.mxu0 %v20492_v60  ;;  %18293 = vmatpush3.bf16.msra.mxu1 %v20504_v2 }
  0x6e   :  { %18295 = vmatprep.subr.bf16.mxu1 %v20510_v14  ;;  %v20526_v40 = vpack.c.bf16 %v1196_v59, %v1189_v46 }
  0x6f   :  { %15945 = vmatmul.mubr.f32.gmra.mrb[4].mxu0 %v20318_v42 }
  0x70   :  { %15947 = vmatprep.mubr.f32.mxu0 %v20371_v4  ;;  %18241 = vmatpush3.bf16.msra.mxu0 %v20492_v60 }
  0x71   :  { %18243 = vmatprep.subr.bf16.mxu0 %v20504_v2 }
  0x73   :  { %15948 = vmatmul.mubr.f32.gmra.mrb[6].mxu0 %v20374_v6 }
  0x74   :  { %18245 = vmatpush3.bf16.msra.mxu0 %v20504_v2 }
  0x75   :  { %18247 = vmatprep.subr.bf16.mxu0 %v20513_v18 }
 0x13a   :  { %v15940_v8 = vpop.f32.mrb[0].mxu0 }
 0x13b   :  { %v19292_v29 = vadd.f32 %v15940_v8, %v14429_v1  ;;  %v861_v44 = vpop.f32.mrb[1].mxu0 }
 0x13c   :  { %v19293_v48 = vadd.f32 %v14429_v1, %v861_v44 }
 0x13d   :  { %v14431_v21 = vmul.f32 -1.442695, %v19292_v29 }
 0x13e   :  { %v14430_v39 = vmul.f32 -1.442695, %v19293_v48  ;;  %v15943_v46 = vpop.f32.mrb[2].mxu0 }
 0x13f   :  { %20028 = vpow2.f32 %v14431_v21  ;;  %v19294_v3 = vadd.f32 %v15943_v46, %v14429_v1  ;;  %v873_v5 = vpop.f32.mrb[3].mxu0 }
 0x140   :  { %20030 = vpow2.f32 %v14430_v39  ;;  %v19295_v26 = vadd.f32 %v14429_v1, %v873_v5 }
 0x141   :  { %v14433_v20 = vmul.f32 -1.442695, %v19294_v3 }
 0x142   :  { %v14432_v33 = vmul.f32 -1.442695, %v19295_v26  ;;  %v15946_v23 = vpop.f32.mrb[4].mxu0 }
 0x143   :  { %20032 = vpow2.f32 %v14433_v20  ;;  %v19296_v22 = vadd.f32 %v15946_v23, %v14429_v1  ;;  %v885_v37 = vpop.f32.mrb[5].mxu0 }
 0x144   :  { %20034 = vpow2.f32 %v14432_v33  ;;  %v19297_v52 = vadd.f32 %v14429_v1, %v885_v37 }
 0x145   :  { %v14435_v54 = vmul.f32 -1.442695, %v19296_v22 }
 0x146   :  { %v14434_v55 = vmul.f32 -1.442695, %v19297_v52  ;;  %v15949_v43 = vpop.f32.mrb[6].mxu0 }
 0x147   :  { %20036 = vpow2.f32 %v14435_v54  ;;  %v20539_v19 = vadd.f32 %v15949_v43, %v14429_v1  ;;  %v897_v59 = vpop.f32.mrb[7].mxu0 }
 0x148   :  { %20038 = vpow2.f32 %v14434_v55  ;;  %v20541_v8 = vadd.f32 %v14429_v1, %v897_v59 }
 0x149   :  { %v20029_v44 = vpop.eup %20028  ;;  %v14437_v21 = vmul.f32 -1.442695, %v20539_v19 }
 0x14a   :  { %v20031_v39 = vpop.eup %20030  ;;  %v932_v46 = vadd.f32 1.0, %v20029_v44  ;;  %v14436_v5 = vmul.f32 -1.442695, %v20541_v8 }
 0x14b   :  { %v931_v20 = vadd.f32 1.0, %v20031_v39  ;;  %20040 = vpow2.f32 %v14437_v21 }
 0x14c   :  { %20042 = vrcp.f32 %v932_v46 }
 0x14d   :  { %v20033_v33 = vpop.eup %20032  ;;  %20044 = vrcp.f32 %v931_v20 }
 0x14e   :  { %v20035_v23 = vpop.eup %20034  ;;  %v934_v37 = vadd.f32 1.0, %v20033_v33  ;;  %20046 = vpow2.f32 %v14436_v5 }
 0x14f   :  { %v933_v54 = vadd.f32 1.0, %v20035_v23 }
 0x150   :  { %20048 = vrcp.f32 %v934_v37 }
 0x151   :  { %v20037_v55 = vpop.eup %20036  ;;  %20050 = vrcp.f32 %v933_v54 }
 0x152   :  { %v20039_v1 = vpop.eup %20038  ;;  %v936_v43 = vadd.f32 1.0, %v20037_v55 }
 0x153   :  { %v935_v59 = vadd.f32 1.0, %v20039_v1 }
 0x154   :  { %20052 = vrcp.f32 %v936_v43 }
 0x155   :  { %v20041_v35 = vpop.eup %20040  ;;  %20054 = vrcp.f32 %v935_v59 }
 0x156   :  { %v20043_v44 = vpop.eup %20042  ;;  %v938_v39 = vadd.f32 1.0, %v20041_v35 }
 0x157   :  { %v20045_v21 = vpop.eup %20044  ;;  %v20545_v46 = vmul.f32 %v20043_v44, %v19292_v29 }
 0x158   :  { %v20047_v20 = vpop.eup %20046  ;;  %v20547_v31 = vmul.f32 %v20045_v21, %v19293_v48  ;;  %20056 = vrcp.f32 %v938_v39 }
 0x159   :  { %v969_v5 = vsel %vm964_vm2, %v20545_v46, 0  ;;  %v937_v33 = vadd.f32 1.0, %v20047_v20 }
 0x15a   :  { %v20049_v23 = vpop.eup %20048  ;;  %v20551_v37 = vand.u32 4294901760, %v969_v5  ;;  %v966_v54 = vsel %vm964_vm2, %v20547_v31, 0 }
 0x15b   :  { %v20051_v55 = vpop.eup %20050  ;;  %v20555_v1 = vand.u32 4294901760, %v966_v54  ;;  %v20557_v35 = vmul.f32 %v20049_v23, %v19294_v3  ;;  %20058 = vrcp.f32 %v937_v33 }
 0x15c   :  { %v20560_v29 = vsub.f32 %v969_v5, %v20551_v37  ;;  %v20562_v48 = vmul.f32 %v20051_v55, %v19295_v26 }
 0x15d   :  { %v20565_v43 = vsub.f32 %v966_v54, %v20555_v1  ;;  %v975_v59 = vsel %vm964_vm2, %v20557_v35, 0 }
 0x15e   :  { %v20053_v44 = vpop.eup %20052  ;;  %v20569_v39 = vand.u32 4294901760, %v975_v59  ;;  %v972_v21 = vsel %vm964_vm2, %v20562_v48, 0  ;;  %v1074_v3 = vand.u32 4294901760, %v20560_v29 }
 0x15f   :  { %v20055_v20 = vpop.eup %20054  ;;  %v20574_v33 = vand.u32 4294901760, %v972_v21  ;;  %v20576_v5 = vmul.f32 %v20053_v44, %v19296_v22  ;;  %v1064_v26 = vand.u32 4294901760, %v20565_v43 }
 0x160   :  { %v20580_v23 = vsub.f32 %v975_v59, %v20569_v39  ;;  %v20582_v54 = vmul.f32 %v20055_v20, %v19297_v52  ;;  %v1075_v55 = vsub.f32 %v20560_v29, %v1074_v3 }
 0x161   :  { %v20586_v12 = vsub.f32 %v972_v21, %v20574_v33  ;;  %v981_v9 = vsel %vm964_vm2, %v20576_v5, 0  ;;  %v1065_v50 = vsub.f32 %v20565_v43, %v1064_v26  ;;  %16050 = vmatprep.mubr.f32.mxu1 %v1064_v26 }
 0x162   :  { %v20057_v22 = vpop.eup %20056  ;;  %v20591_v44 = vand.u32 4294901760, %v981_v9  ;;  %v978_v59 = vsel %vm964_vm2, %v20582_v54, 0  ;;  %16051 = vmatmul.mubr.f32.vlgmr.msra.gmra.mrb[0].mxu1 %v1074_v3  ;;  %v1094_v52 = vand.u32 4294901760, %v20580_v23  ;;  %v1076_v32 = vand.u32 4294901760, %v1075_v55 }
 0x163   :  { %v20596_v20 = vand.u32 4294901760, %v978_v59  ;;  %v20599_v21 = vmul.f32 %v20057_v22, %v20539_v19  ;;  %18297 = vmatpush3.bf16.msra.mxu1 %v20510_v14  ;;  %v1066_v49 = vand.u32 4294901760, %v1065_v50  ;;  %v1084_v38 = vand.u32 4294901760, %v20586_v12 }
 0x164   :  { %v20604_v26 = vsub.f32 %v981_v9, %v20591_v44  ;;  %18299 = vmatprep.subr.bf16.mxu1 %v20515_v16  ;;  %v1095_v3 = vsub.f32 %v20580_v23, %v1094_v52 }
 0x165   :  { %v20059_v27 = vpop.eup %20058  ;;  %v20609_v24 = vsub.f32 %v978_v59, %v20596_v20  ;;  %v987_v19 = vsel %vm964_vm2, %v20599_v21, 0  ;;  %15966 = vmatprep.mubr.f32.mxu0 %v1066_v49  ;;  %16053 = vmatprep.mubr.f32.mxu1 %v1084_v38  ;;  %v1085_v50 = vsub.f32 %v20586_v12, %v1084_v38 }
 0x166   :  { %v20614_v22 = vand.u32 4294901760, %v987_v19  ;;  %v20617_v9 = vmul.f32 %v20059_v27, %v20541_v8  ;;  %15967 = vmatmul.mubr.f32.vlgmr.msra.gmra.mrb[8].mxu0 %v1076_v32  ;;  %16054 = vmatmul.mubr.f32.gmra.mrb[2].mxu1 %v1094_v52  ;;  %v1114_v55 = vand.u32 4294901760, %v20604_v26  ;;  %v1096_v4 = vand.u32 4294901760, %v1095_v3 }
 0x167   :  { %18249 = vmatpush3.bf16.msra.mxu0 %v20513_v18  ;;  %18301 = vmatpush3.bf16.msra.mxu1 %v20515_v16  ;;  %v1086_v59 = vand.u32 4294901760, %v1085_v50  ;;  %v1104_v6 = vand.u32 4294901760, %v20609_v24 }
 0x168   :  { %v20624_v49 = vsub.f32 %v987_v19, %v20614_v22  ;;  %v984_v38 = vsel %vm964_vm2, %v20617_v9, 0  ;;  %18251 = vmatprep.subr.bf16.mxu0 %v20520_v58  ;;  %18303 = vmatprep.subr.bf16.mxu1 %v20518_v45  ;;  %v1115_v27 = vsub.f32 %v20604_v26, %v1114_v55 }
 0x169   :  { %v20631_v32 = vand.u32 4294901760, %v984_v38  ;;  %15969 = vmatprep.mubr.f32.mxu0 %v1086_v59  ;;  %16056 = vmatprep.mubr.f32.mxu1 %v1104_v6  ;;  %v1105_v8 = vsub.f32 %v20609_v24, %v1104_v6 }
 0x16a   :  { %15970 = vmatmul.mubr.f32.gmra.mrb[10].mxu0 %v1096_v4  ;;  %16057 = vmatmul.mubr.f32.gmra.mrb[4].mxu1 %v1114_v55  ;;  %v1134_v52 = vand.u32 4294901760, %v20624_v49  ;;  %v1116_v50 = vand.u32 4294901760, %v1115_v27 }
 0x16b   :  { %v20636_v19 = vsub.f32 %v984_v38, %v20631_v32  ;;  %18253 = vmatpush3.bf16.msra.mxu0 %v20520_v58  ;;  %18305 = vmatpush3.bf16.msra.mxu1 %v20518_v45  ;;  %v1106_v3 = vand.u32 4294901760, %v1105_v8 }
 0x16c   :  { %18255 = vmatprep.subr.bf16.mxu0 %v20522_v56  ;;  %18307 = vmatprep.subr.bf16.mxu1 %v20524_v13  ;;  %v1135_v4 = vsub.f32 %v20624_v49, %v1134_v52 }
 0x16d   :  { %15972 = vmatprep.mubr.f32.mxu0 %v1106_v3  ;;  %v1124_v6 = vand.u32 4294901760, %v20636_v19 }
 0x16e   :  { %15973 = vmatmul.mubr.f32.gmra.mrb[12].mxu0 %v1116_v50  ;;  %v1136_v38 = vand.u32 4294901760, %v1135_v4 }
 0x16f   :  { %16059 = vmatprep.mubr.f32.mxu1 %v1124_v6  ;;  %18257 = vmatpush3.bf16.msra.mxu0 %v20522_v56  ;;  %v1125_v55 = vsub.f32 %v20636_v19, %v1124_v6 }
 0x170   :  { %16060 = vmatmul.mubr.f32.gmra.mrb[6].mxu1 %v1134_v52  ;;  %18259 = vmatprep.subr.bf16.mxu0 %v20526_v40 }
 0x171   :  { %18309 = vmatpush3.bf16.msra.mxu1 %v20524_v13  ;;  %16078 = vmatprep.mubr.f32.mxu1 %v20555_v1  ;;  %v1126_v59 = vand.u32 4294901760, %v1125_v55 }
 0x172   :  { %18311 = vmatprep.subr.bf16.mxu1 %v20468_v28 }
 0x173   :  { %15975 = vmatprep.mubr.f32.mxu0 %v1126_v59  ;;  %18261 = vmatpush3.bf16.msra.mxu0 %v20526_v40 }
 0x174   :  { %15976 = vmatmul.mubr.f32.gmra.mrb[14].mxu0 %v1136_v38  ;;  %16079 = vmatmul.mubr.f32.vlgmr.msra.gmra.mrb[0].mxu1 %v20551_v37 }
 0x175   :  { %15994 = vmatprep.mubr.f32.mxu0 %v20555_v1  ;;  %16081 = vmatprep.mubr.f32.mxu1 %v20574_v33 }
 0x176   :  { %18313 = vmatpush3.bf16.msra.mxu1 %v20468_v28  ;;  %18263 = vmatprep.subr.bf16.mxu0 %v20528_v11 }
 0x177   :  { %18315 = vmatprep.subr.bf16.mxu1 %v20480_v51 }
 0x178   :  { %15995 = vmatmul.mubr.f32.vlgmr.msra.gmra.mrb[8].mxu0 %v20551_v37  ;;  %16082 = vmatmul.mubr.f32.gmra.mrb[2].mxu1 %v20569_v39 }
 0x179   :  { %15997 = vmatprep.mubr.f32.mxu0 %v20574_v33  ;;  %18265 = vmatpush3.bf16.msra.mxu0 %v20528_v11 }
 0x17a   :  { %16084 = vmatprep.mubr.f32.mxu1 %v20596_v20  ;;  %18317 = vmatpush3.bf16.msra.mxu1 %v20480_v51 }
 0x17b   :  { %18267 = vmatprep.subr.bf16.mxu0 %v20530_v62  ;;  %18319 = vmatprep.subr.bf16.mxu1 %v20492_v60 }
 0x17c   :  { %15998 = vmatmul.mubr.f32.gmra.mrb[10].mxu0 %v20569_v39  ;;  %16085 = vmatmul.mubr.f32.gmra.mrb[4].mxu1 %v20591_v44 }
 0x17d   :  { %16000 = vmatprep.mubr.f32.mxu0 %v20596_v20  ;;  %18269 = vmatpush3.bf16.msra.mxu0 %v20530_v62 }
 0x17e   :  { %16087 = vmatprep.mubr.f32.mxu1 %v20631_v32  ;;  %18321 = vmatpush3.bf16.msra.mxu1 %v20492_v60 }
 0x17f   :  { %18271 = vmatprep.subr.bf16.mxu0 %v20532_v0  ;;  %18323 = vmatprep.subr.bf16.mxu1 %v20504_v2 }
 0x180   :  { %16001 = vmatmul.mubr.f32.gmra.mrb[12].mxu0 %v20591_v44  ;;  %16088 = vmatmul.mubr.f32.gmra.mrb[6].mxu1 %v20614_v22 }
 0x181   :  { %16003 = vmatprep.mubr.f32.mxu0 %v20631_v32  ;;  %18273 = vmatpush3.bf16.msra.mxu0 %v20532_v0 }
 0x182   :  { %18325 = vmatpush3.bf16.msra.mxu1 %v20504_v2  ;;  %16106 = vmatprep.mubr.f32.mxu1 %v20555_v1 }
 0x183   :  { %18275 = vmatprep.subr.bf16.mxu0 %v20534_v63 }
 0x184   :  { %16004 = vmatmul.mubr.f32.gmra.mrb[14].mxu0 %v20614_v22 }
 0x185   :  { %16107 = vmatmul.mubr.f32.vlgmr.msra.gmra.mrb[0].mxu1 %v20551_v37  ;;  %18277 = vmatpush3.bf16.msra.mxu0 %v20534_v63 }
 0x186   :  { %16022 = vmatprep.mubr.f32.mxu0 %v20565_v43  ;;  %16109 = vmatprep.mubr.f32.mxu1 %v20574_v33 }
 0x187   :  { %18327 = vmatprep.subr.bf16.mxu0 %v20468_v28 }
 0x188   :  { %16023 = vmatmul.mubr.f32.vlgmr.msra.gmra.mrb[8].mxu0 %v20560_v29 }
 0x189   :  { %16110 = vmatmul.mubr.f32.gmra.mrb[2].mxu1 %v20569_v39  ;;  %16025 = vmatprep.mubr.f32.mxu0 %v20586_v12 }
 0x18a   :  { %16112 = vmatprep.mubr.f32.mxu1 %v20596_v20  ;;  %18329 = vmatpush3.bf16.msra.mxu0 %v20468_v28 }
 0x18b   :  { %18331 = vmatprep.subr.bf16.mxu0 %v20480_v51 }
 0x18c   :  { %16026 = vmatmul.mubr.f32.gmra.mrb[10].mxu0 %v20580_v23 }
 0x18d   :  { %16113 = vmatmul.mubr.f32.gmra.mrb[4].mxu1 %v20591_v44  ;;  %16028 = vmatprep.mubr.f32.mxu0 %v20609_v24 }
 0x18e   :  { %16115 = vmatprep.mubr.f32.mxu1 %v20631_v32  ;;  %18333 = vmatpush3.bf16.msra.mxu0 %v20480_v51 }
 0x18f   :  { %18335 = vmatprep.subr.bf16.mxu0 %v20492_v60 }
 0x190   :  { %16029 = vmatmul.mubr.f32.gmra.mrb[12].mxu0 %v20604_v26 }
 0x191   :  { %16116 = vmatmul.mubr.f32.gmra.mrb[6].mxu1 %v20614_v22  ;;  %16031 = vmatprep.mubr.f32.mxu0 %v20636_v19 }
 0x192   :  { %18337 = vmatpush3.bf16.msra.mxu0 %v20492_v60 }
 0x193   :  { %18339 = vmatprep.subr.bf16.mxu0 %v20504_v2 }
 0x194   :  { %16032 = vmatmul.mubr.f32.gmra.mrb[14].mxu0 %v20624_v49 }
 0x196   :  { %18341 = vmatpush3.bf16.msra.mxu0 %v20504_v2 }
 0x197   :  { %18343 = vmatprep.subr.bf16.mxu0 %v20513_v18 }
 0x258   :  { %v16108_v24 = vpop.f32.mrb[0].mxu1 }
 0x259   :  { %v1781_v12 = vpop.f32.mrb[1].mxu1 }
 0x25b   :  { %v16024_v37 = vpop.f32.mrb[8].mxu0 }
 0x25c   :  { %v19300_v1 = vadd.f32 %v16108_v24, %v16024_v37  ;;  %v16111_v29 = vpop.f32.mrb[2].mxu1  ;;  %v1379_v43 = vpop.f32.mrb[9].mxu0 }
 0x25d   :  { %v19301_v39 = vadd.f32 %v1781_v12, %v1379_v43  ;;  %v1793_v33 = vpop.f32.mrb[3].mxu1 }
 0x25e   :  { %v20707_v23 = vsub.f32 %v20545_v46, %v19300_v1 }
 0x25f   :  { %v20710_v44 = vsub.f32 %v20547_v31, %v19301_v39  ;;  %v16027_v20 = vpop.f32.mrb[10].mxu0 }
 0x260   :  { %v1836_v26 = vmul.f32 %v20707_v23, %v20707_v23  ;;  %v19302_v22 = vadd.f32 %v16111_v29, %v16027_v20  ;;  %v16114_v49 = vpop.f32.mrb[4].mxu1  ;;  %v1393_v27 = vpop.f32.mrb[11].mxu0 }
 0x261   :  { %v1835_v32 = vmul.f32 %v20710_v44, %v20710_v44  ;;  %v19303_v8 = vadd.f32 %v1793_v33, %v1393_v27  ;;  %v1805_v52 = vpop.f32.mrb[5].mxu1 }
 0x262   :  { %v1847_v19 = vsel %vm964_vm2, %v1836_v26, 0  ;;  %v20718_v46 = vsub.f32 %v20557_v35, %v19302_v22 }
 0x263   :  { %v20720_v3 = vand.u32 4294901760, %v1847_v19  ;;  %v1844_v31 = vsel %vm964_vm2, %v1835_v32, 0  ;;  %v20724_v50 = vsub.f32 %v20562_v48, %v19303_v8  ;;  %v16030_v6 = vpop.f32.mrb[12].mxu0 }
 0x264   :  { %v20726_v4 = vand.u32 4294901760, %v1844_v31  ;;  %v1838_v55 = vmul.f32 %v20718_v46, %v20718_v46  ;;  %v19304_v59 = vadd.f32 %v16114_v49, %v16030_v6  ;;  %v16117_v38 = vpop.f32.mrb[6].mxu1  ;;  %v1407_v24 = vpop.f32.mrb[13].mxu0 }
 0x265   :  { %v20731_v12 = vsub.f32 %v1847_v19, %v20720_v3  ;;  %v1837_v35 = vmul.f32 %v20724_v50, %v20724_v50  ;;  %v19305_v37 = vadd.f32 %v1805_v52, %v1407_v24  ;;  %v1817_v1 = vpop.f32.mrb[7].mxu1 }
 0x266   :  { %v20736_v48 = vsub.f32 %v1844_v31, %v20726_v4  ;;  %v1853_v29 = vsel %vm964_vm2, %v1838_v55, 0  ;;  %v20740_v43 = vsub.f32 %v20576_v5, %v19304_v59 }
 0x267   :  { %v23419_v39 = vand.u32 4294901760, %v20731_v12  ;;  %v20743_v33 = vand.u32 4294901760, %v1853_v29  ;;  %v1850_v20 = vsel %vm964_vm2, %v1837_v35, 0  ;;  %v20747_v26 = vsub.f32 %v20582_v54, %v19305_v37  ;;  %v16033_v22 = vpop.f32.mrb[14].mxu0 }
 0x268   :  { %v20749_v49 = vand.u32 4294901760, %v1850_v20  ;;  %v1840_v27 = vmul.f32 %v20740_v43, %v20740_v43  ;;  %v19306_v32 = vadd.f32 %v16117_v38, %v16033_v22  ;;  %v1421_v8 = vpop.f32.mrb[15].mxu0  ;;  %v23421_v5 = vand.u32 4294901760, %v20736_v48 }
 0x269   :  { %v1953_v52 = vsub.f32 %v20731_v12, %v23419_v39  ;;  %v20758_v19 = vsub.f32 %v1853_v29, %v20743_v33  ;;  %v1839_v54 = vmul.f32 %v20747_v26, %v20747_v26  ;;  %v19307_v31 = vadd.f32 %v1817_v1, %v1421_v8 }
 0x26a   :  { %v20763_v6 = vsub.f32 %v1850_v20, %v20749_v49  ;;  %v1859_v55 = vsel %vm964_vm2, %v1840_v27, 0  ;;  %v20767_v59 = vsub.f32 %v20599_v21, %v19306_v32  ;;  %v1943_v38 = vsub.f32 %v20736_v48, %v23421_v5 }
 0x26b   :  { %v20772_v24 = vand.u32 4294901760, %v1859_v55  ;;  %v1856_v35 = vsel %vm964_vm2, %v1839_v54, 0  ;;  %v20776_v37 = vsub.f32 %v20617_v9, %v19307_v31  ;;  %v1954_v32 = vand.u32 4294901760, %v1953_v52 }
 0x26c   :  { %v20778_v1 = vand.u32 4294901760, %v1856_v35  ;;  %v1842_v29 = vmul.f32 %v20767_v59, %v20767_v59  ;;  %v1944_v20 = vand.u32 4294901760, %v1943_v38  ;;  %v23420_v21 = vand.u32 4294901760, %v20763_v6 }
 0x26d   :  { %v20784_v22 = vsub.f32 %v1859_v55, %v20772_v24  ;;  %v1841_v27 = vmul.f32 %v20776_v37, %v20776_v37  ;;  %v23422_v8 = vand.u32 4294901760, %v20758_v19 }
 0x26e   :  { %v20790_v9 = vsub.f32 %v1856_v35, %v20778_v1  ;;  %v1865_v54 = vsel %vm964_vm2, %v1842_v29, 0  ;;  %16134 = vmatprep.mubr.f32.mxu0 %v1944_v20  ;;  %v1963_v31 = vsub.f32 %v20763_v6, %v23420_v21 }
 0x26f   :  { %v20796_v38 = vand.u32 4294901760, %v1865_v54  ;;  %v1862_v55 = vsel %vm964_vm2, %v1841_v27, 0  ;;  %16135 = vmatmul.mubr.f32.vlgmr.msra.gmra.mrb[16].mxu0 %v1954_v32  ;;  %v1973_v52 = vsub.f32 %v20758_v19, %v23422_v8  ;;  %v23425_v39 = vand.u32 4294901760, %v20784_v22 }
 0x270   :  { %v20803_v35 = vand.u32 4294901760, %v1862_v55  ;;  %18345 = vmatpush3.bf16.msra.mxu0 %v20513_v18  ;;  %v1964_v29 = vand.u32 4294901760, %v1963_v31  ;;  %v1982_v20 = vand.u32 4294901760, %v20790_v9 }
 0x271   :  { %v20808_v21 = vsub.f32 %v1865_v54, %v20796_v38  ;;  %v1974_v5 = vand.u32 4294901760, %v1973_v52  ;;  %18347 = vmatprep.subr.bf16.mxu0 %v20520_v58  ;;  %v1993_v27 = vsub.f32 %v20784_v22, %v23425_v39 }
 0x272   :  { %v20815_v32 = vsub.f32 %v1862_v55, %v20803_v35  ;;  %16137 = vmatprep.mubr.f32.mxu0 %v1964_v29  ;;  %v1983_v31 = vsub.f32 %v20790_v9, %v1982_v20 }
 0x273   :  { %16138 = vmatmul.mubr.f32.gmra.mrb[18].mxu0 %v1974_v5  ;;  %v2012_v8 = vand.u32 4294901760, %v20808_v21  ;;  %v1994_v42 = vand.u32 4294901760, %v1993_v27  ;;  %v23535_v27 = vand.u32 4294901760, %v20763_v6 }
 0x274   :  { %18349 = vmatpush3.bf16.msra.mxu0 %v20520_v58  ;;  %v1984_v54 = vand.u32 4294901760, %v1983_v31  ;;  %v2002_v52 = vand.u32 4294901760, %v20815_v32 }
 0x275   :  { %18351 = vmatprep.subr.bf16.mxu0 %v20522_v56  ;;  %v2013_v39 = vsub.f32 %v20808_v21, %v2012_v8 }
 0x276   :  { %16140 = vmatprep.mubr.f32.mxu0 %v1984_v54  ;;  %v2003_v55 = vsub.f32 %v20815_v32, %v2002_v52  ;;  %v2741_v54 = vld [vmem:[%s23538_s23 + $0x30] sm:$0xff] }
 0x277   :  { %16141 = vmatmul.mubr.f32.gmra.mrb[20].mxu0 %v1994_v42  ;;  %v2014_v5 = vand.u32 4294901760, %v2013_v39  ;;  %v23533_v42 = vand.u32 4294901760, %v20736_v48  ;;  %v23534_v39 = vand.u32 4294901760, %v20731_v12 }
 0x278   :  { %18353 = vmatpush3.bf16.msra.mxu0 %v20522_v56  ;;  %v2004_v29 = vand.u32 4294901760, %v2003_v55  ;;  %v2793_v55 = vand.u32 4294901760, %v2741_v54 }
 0x279   :  { %18355 = vmatprep.subr.bf16.mxu0 %v20526_v40 }
 0x27a   :  { %16143 = vmatprep.mubr.f32.mxu0 %v2004_v29 }
 0x27b   :  { %16144 = vmatmul.mubr.f32.gmra.mrb[22].mxu0 %v2014_v5 }
 0x27c   :  { %18357 = vmatpush3.bf16.msra.mxu0 %v20526_v40  ;;  %16162 = vmatprep.mubr.f32.mxu0 %v20726_v4 }
 0x27d   :  { %18359 = vmatprep.subr.bf16.mxu0 %v20528_v11 }
 0x27f   :  { %16163 = vmatmul.mubr.f32.vlgmr.msra.gmra.mrb[16].mxu0 %v20720_v3 }
 0x280   :  { %16165 = vmatprep.mubr.f32.mxu0 %v20749_v49  ;;  %18361 = vmatpush3.bf16.msra.mxu0 %v20528_v11 }
 0x281   :  { %18363 = vmatprep.subr.bf16.mxu0 %v20530_v62 }
 0x283   :  { %16166 = vmatmul.mubr.f32.gmra.mrb[18].mxu0 %v20743_v33 }
 0x284   :  { %16168 = vmatprep.mubr.f32.mxu0 %v20778_v1  ;;  %18365 = vmatpush3.bf16.msra.mxu0 %v20530_v62 }
 0x285   :  { %18367 = vmatprep.subr.bf16.mxu0 %v20532_v0 }
 0x287   :  { %16169 = vmatmul.mubr.f32.gmra.mrb[20].mxu0 %v20772_v24 }
 0x288   :  { %16171 = vmatprep.mubr.f32.mxu0 %v20803_v35  ;;  %18369 = vmatpush3.bf16.msra.mxu0 %v20532_v0 }
 0x289   :  { %18371 = vmatprep.subr.bf16.mxu0 %v20534_v63 }
 0x28b   :  { %16172 = vmatmul.mubr.f32.gmra.mrb[22].mxu0 %v20796_v38 }
 0x28c   :  { %18373 = vmatpush3.bf16.msra.mxu0 %v20534_v63  ;;  %16190 = vmatprep.mubr.f32.mxu0 %v20736_v48 }
 0x28d   :  { %18375 = vmatprep.subr.bf16.mxu0 %v20468_v28 }
 0x28f   :  { %16191 = vmatmul.mubr.f32.vlgmr.msra.gmra.mrb[16].mxu0 %v20731_v12  ;;  %v23537_v12 = vand.u32 4294901760, %v20784_v22 }
 0x290   :  { %16193 = vmatprep.mubr.f32.mxu0 %v20763_v6  ;;  %18377 = vmatpush3.bf16.msra.mxu0 %v20468_v28  ;;  %v2738_v6 = vld [vmem:[%s23538_s23 + $0x18] sm:$0xff] }
 0x291   :  { %18379 = vmatprep.subr.bf16.mxu0 %v20480_v51 }
 0x293   :  { %16194 = vmatmul.mubr.f32.gmra.mrb[18].mxu0 %v20758_v19 }
 0x294   :  { %16196 = vmatprep.mubr.f32.mxu0 %v20790_v9  ;;  %18381 = vmatpush3.bf16.msra.mxu0 %v20480_v51 }
 0x295   :  { %18383 = vmatprep.subr.bf16.mxu0 %v20492_v60 }
 0x297   :  { %16197 = vmatmul.mubr.f32.gmra.mrb[20].mxu0 %v20784_v22  ;;  %v2739_v22 = vld [vmem:[%s23538_s23 + $0x20] sm:$0xff] }
 0x298   :  { %16199 = vmatprep.mubr.f32.mxu0 %v20815_v32  ;;  %18385 = vmatpush3.bf16.msra.mxu0 %v20492_v60  ;;  %v23536_v32 = vand.u32 4294901760, %v20758_v19  ;;  %v2737_v19 = vld [vmem:[%s23538_s23 + $0x10] sm:$0xff]  ;;  %v2787_v9 = vand.u32 4294901760, %v2739_v22 }
 0x299   :  { %18387 = vmatprep.subr.bf16.mxu0 %v20504_v2 }
 0x29a   :  { %v2957_v17 = vsub.f32 %v2739_v22, %v2787_v9 }
 0x29b   :  { %16200 = vmatmul.mubr.f32.gmra.mrb[22].mxu0 %v20808_v21 }
 0x29c   :  { %18389 = vmatpush3.bf16.msra.mxu0 %v20504_v2  ;;  %16218 = vmatprep.mubr.f32.mxu0 %v23533_v42  ;;  %v2958_v10 = vand.u32 4294901760, %v2957_v17 }
 0x29d   :  { %18391 = vmatprep.subr.bf16.mxu0 %v20510_v14 }
 0x29f   :  { %16219 = vmatmul.mubr.f32.vlgmr.msra.gmra.mrb[16].mxu0 %v23534_v39 }
 0x2a0   :  { %16221 = vmatprep.mubr.f32.mxu0 %v23535_v27  ;;  %18393 = vmatpush3.bf16.msra.mxu0 %v20510_v14 }
 0x2a1   :  { %18395 = vmatprep.subr.bf16.mxu0 %v20515_v16 }
 0x2a3   :  { %16222 = vmatmul.mubr.f32.gmra.mrb[18].mxu0 %v23536_v32 }
 0x2a4   :  { %16224 = vmatprep.mubr.f32.mxu0 %v1982_v20  ;;  %18397 = vmatpush3.bf16.msra.mxu0 %v20515_v16 }
 0x2a5   :  { %18399 = vmatprep.subr.bf16.mxu0 %v20518_v45 }
 0x2a7   :  { %16225 = vmatmul.mubr.f32.gmra.mrb[20].mxu0 %v23537_v12 }
 0x2a8   :  { %16227 = vmatprep.mubr.f32.mxu0 %v2002_v52  ;;  %18401 = vmatpush3.bf16.msra.mxu0 %v20518_v45  ;;  %v2742_v52 = vld [vmem:[%s23538_s23 + $0x38] sm:$0xff] }
 0x2a9   :  { %18403 = vmatprep.subr.bf16.mxu0 %v20524_v13  ;;  %v2796_v29 = vand.u32 4294901760, %v2742_v52 }
 0x2ab   :  { %16228 = vmatmul.mubr.f32.gmra.mrb[22].mxu0 %v2012_v8  ;;  %v2740_v8 = vld [vmem:[%s23538_s23 + $0x28] sm:$0xff]  ;;  %v20950_v39 = vpack.c.bf16 %v2796_v29, %v2793_v55 }
 0x2ac   :  { %18405 = vmatpush3.bf16.msra.mxu0 %v20524_v13  ;;  %16246 = vmatprep.mubr.f32.mxu0 %v20726_v4 }
 0x2ad   :  { %18407 = vmatprep.subr.bf16.mxu0 %v20468_v28 }
 0x2af   :  { %16247 = vmatmul.mubr.f32.vlgmr.msra.gmra.mrb[16].mxu0 %v20720_v3 }
 0x2b0   :  { %16249 = vmatprep.mubr.f32.mxu0 %v20749_v49  ;;  %18409 = vmatpush3.bf16.msra.mxu0 %v20468_v28 }
 0x2b1   :  { %18411 = vmatprep.subr.bf16.mxu0 %v20480_v51 }
 0x2b3   :  { %16250 = vmatmul.mubr.f32.gmra.mrb[18].mxu0 %v20743_v33 }
 0x2b4   :  { %16252 = vmatprep.mubr.f32.mxu0 %v20778_v1  ;;  %18413 = vmatpush3.bf16.msra.mxu0 %v20480_v51 }
 0x2b5   :  { %18415 = vmatprep.subr.bf16.mxu0 %v20492_v60 }
 0x2b7   :  { %16253 = vmatmul.mubr.f32.gmra.mrb[20].mxu0 %v20772_v24 }
 0x2b8   :  { %16255 = vmatprep.mubr.f32.mxu0 %v20803_v35  ;;  %18417 = vmatpush3.bf16.msra.mxu0 %v20492_v60 }
 0x2b9   :  { %18419 = vmatprep.subr.bf16.mxu0 %v20504_v2 }
 0x2bb   :  { %16256 = vmatmul.mubr.f32.gmra.mrb[22].mxu0 %v20796_v38 }
 0x2bc   :  { %18421 = vmatpush3.bf16.msra.mxu0 %v20504_v2  ;;  %16274 = vmatprep.mubr.f32.mxu0 %v20726_v4  ;;  %v2736_v4 = vld [vmem:[%s23538_s23 + $0x8] sm:$0xff] }
 0x2bd   :  { %18519 = vmatprep.subr.bf16.mxu0 %v20468_v28 }
 0x2bf   :  { %16275 = vmatmul.mubr.f32.vlgmr.msra.gmra.mrb[16].mxu0 %v20720_v3  ;;  %v2735_v3 = vld [vmem:[%s23538_s23] sm:$0xff] }
 0x2c0   :  { %16277 = vmatprep.mubr.f32.mxu0 %v20749_v49  ;;  %18521 = vmatpush3.bf16.msra.mxu0 %v20468_v28  ;;  %v2775_v48 = vand.u32 4294901760, %v2735_v3 }
 0x2c1   :  { %18523 = vmatprep.subr.bf16.mxu0 %v20480_v51 }
 0x2c2   :  { %v2929_v20 = vsub.f32 %v2735_v3, %v2775_v48 }
 0x2c3   :  { %16278 = vmatmul.mubr.f32.gmra.mrb[18].mxu0 %v20743_v33  ;;  %v2778_v33 = vand.u32 4294901760, %v2736_v4 }
 0x2c4   :  { %16280 = vmatprep.mubr.f32.mxu0 %v20778_v1  ;;  %18525 = vmatpush3.bf16.msra.mxu0 %v20480_v51  ;;  %v2784_v1 = vand.u32 4294901760, %v2738_v6  ;;  %v2930_v5 = vand.u32 4294901760, %v2929_v20 }
 0x2c5   :  { %18527 = vmatprep.subr.bf16.mxu0 %v20492_v60  ;;  %v20920_v49 = vpack.c.bf16 %v2778_v33, %v2775_v48  ;;  %v2936_v31 = vsub.f32 %v2736_v4, %v2778_v33 }
 0x2c6   :  { %v2931_v27 = vsub.f32 %v2929_v20, %v2930_v5  ;;  %v2950_v3 = vsub.f32 %v2738_v6, %v2784_v1 }
 0x2c7   :  { %16281 = vmatmul.mubr.f32.gmra.mrb[20].mxu0 %v20772_v24  ;;  %18423 = vmatprep.subr.bf16.mxu1 %v20920_v49  ;;  %v2781_v24 = vand.u32 4294901760, %v2737_v19  ;;  %v2937_v42 = vand.u32 4294901760, %v2936_v31  ;;  %v20963_v47 = vpack.c.bf16 %v2936_v31, %v2929_v20 }
 0x2c8   :  { %16283 = vmatprep.mubr.f32.mxu0 %v20803_v35  ;;  %18529 = vmatpush3.bf16.msra.mxu0 %v20492_v60  ;;  %v2932_v4 = vand.u32 4294901760, %v2931_v27  ;;  %v2951_v41 = vand.u32 4294901760, %v2950_v3  ;;  %v2971_v27 = vsub.f32 %v2741_v54, %v2793_v55 }
 0x2c9   :  { %18531 = vmatprep.subr.bf16.mxu0 %v20504_v2  ;;  %18425 = vmatpush3.bf16.msra.mxu1 %v20920_v49  ;;  %v20930_v21 = vpack.c.bf16 %v2784_v1, %v2781_v24  ;;  %v2938_v32 = vsub.f32 %v2936_v31, %v2937_v42  ;;  %v2943_v12 = vsub.f32 %v2737_v19, %v2781_v24 }
 0x2ca   :  { %v2952_v36 = vsub.f32 %v2950_v3, %v2951_v41  ;;  %v2959_v24 = vsub.f32 %v2957_v17, %v2958_v10 }
 0x2cb   :  { %16284 = vmatmul.mubr.f32.gmra.mrb[22].mxu0 %v20796_v38  ;;  %18427 = vmatprep.subr.bf16.mxu1 %v20930_v21  ;;  %v2790_v38 = vand.u32 4294901760, %v2740_v8  ;;  %v2939_v48 = vand.u32 4294901760, %v2938_v32  ;;  %v2944_v33 = vand.u32 4294901760, %v2943_v12  ;;  %v2978_v32 = vsub.f32 %v2742_v52, %v2796_v29 }
 0x2cc   :  { %18533 = vmatpush3.bf16.msra.mxu0 %v20504_v2  ;;  %v2953_v6 = vand.u32 4294901760, %v2952_v36  ;;  %v2960_v61 = vand.u32 4294901760, %v2959_v24  ;;  %v20965_v36 = vpack.c.bf16 %v2950_v3, %v2943_v12  ;;  %v20971_v52 = vpack.c.bf16 %v2937_v42, %v2930_v5 }
 0x2cd   :  { %18535 = vmatprep.subr.bf16.mxu0 %v20513_v18  ;;  %18429 = vmatpush3.bf16.msra.mxu1 %v20930_v21  ;;  %v20940_v35 = vpack.c.bf16 %v2790_v38, %v2787_v9  ;;  %v20954_v30 = vpack.c.bf16 %v2939_v48, %v2932_v4  ;;  %v2945_v25 = vsub.f32 %v2943_v12, %v2944_v33  ;;  %v2972_v4 = vand.u32 4294901760, %v2971_v27 }
 0x2ce   :  { %v2964_v15 = vsub.f32 %v2740_v8, %v2790_v38  ;;  %v2979_v48 = vand.u32 4294901760, %v2978_v32  ;;  %v20973_v55 = vpack.c.bf16 %v2951_v41, %v2944_v33  ;;  %v14438_v33 = vld [vmem:[%s23363_s3] ss:$0 sm:$0xff] }
 0x2cf   :  { %18431 = vmatprep.subr.bf16.mxu1 %v20940_v35  ;;  %v2946_v34 = vand.u32 4294901760, %v2945_v25  ;;  %v2973_v22 = vsub.f32 %v2971_v27, %v2972_v4 }
 0x2d0   :  { %v2965_v19 = vand.u32 4294901760, %v2964_v15  ;;  %v2980_v8 = vsub.f32 %v2978_v32, %v2979_v48  ;;  %v20967_v54 = vpack.c.bf16 %v2964_v15, %v2957_v17 }
 0x2d1   :  { %18433 = vmatpush3.bf16.msra.mxu1 %v20940_v35  ;;  %v20957_v7 = vpack.c.bf16 %v2953_v6, %v2946_v34  ;;  %v2974_v9 = vand.u32 4294901760, %v2973_v22  ;;  %v20969_v34 = vpack.c.bf16 %v2978_v32, %v2971_v27 }
 0x2d2   :  { %18435 = vmatprep.subr.bf16.mxu1 %v20950_v39  ;;  %v2966_v1 = vsub.f32 %v2964_v15, %v2965_v19  ;;  %v2981_v38 = vand.u32 4294901760, %v2980_v8 }
 0x2d4   :  { %v2967_v57 = vand.u32 4294901760, %v2966_v1  ;;  %v20961_v25 = vpack.c.bf16 %v2981_v38, %v2974_v9 }
 0x2d5   :  { %18437 = vmatpush3.bf16.msra.mxu1 %v20950_v39 }
 0x2d6   :  { %18439 = vmatprep.subr.bf16.mxu1 %v20954_v30  ;;  %v20959_v53 = vpack.c.bf16 %v2967_v57, %v2960_v61  ;;  %v20975_v57 = vpack.c.bf16 %v2965_v19, %v2958_v10  ;;  %v20977_v61 = vpack.c.bf16 %v2979_v48, %v2972_v4 }
 0x392   :  { %v16276_v29 = vpop.f32.mrb[16].mxu0 }
 0x393   :  { %v19308_v6 = vadd.f32 1e-05, %v16276_v29  ;;  %v2659_v24 = vpop.f32.mrb[17].mxu0 }
 0x394   :  { %v19309_v1 = vadd.f32 1e-05, %v2659_v24 }
 0x395   :  { %20060 = vrsqrt.f32 %v19308_v6 }
 0x396   :  { %20062 = vrsqrt.f32 %v19309_v1  ;;  %v16279_v20 = vpop.f32.mrb[18].mxu0 }
 0x397   :  { %v19310_v31 = vadd.f32 1e-05, %v16279_v20  ;;  %v2671_v15 = vpop.f32.mrb[19].mxu0 }
 0x398   :  { %v19311_v17 = vadd.f32 1e-05, %v2671_v15 }
 0x399   :  { %20064 = vrsqrt.f32 %v19310_v31 }
 0x39a   :  { %20066 = vrsqrt.f32 %v19311_v17  ;;  %v16282_v5 = vpop.f32.mrb[20].mxu0 }
 0x39b   :  { %v19312_v42 = vadd.f32 1e-05, %v16282_v5  ;;  %v2683_v41 = vpop.f32.mrb[21].mxu0 }
 0x39c   :  { %v19313_v12 = vadd.f32 1e-05, %v2683_v41 }
 0x39d   :  { %20068 = vrsqrt.f32 %v19312_v42 }
 0x39e   :  { %20070 = vrsqrt.f32 %v19313_v12  ;;  %v16285_v10 = vpop.f32.mrb[22].mxu0 }
 0x39f   :  { %v20061_v3 = vpop.eup %20060  ;;  %v19314_v19 = vadd.f32 1e-05, %v16285_v10  ;;  %v2695_v27 = vpop.f32.mrb[23].mxu0 }
 0x3a0   :  { %v20063_v32 = vpop.eup %20062  ;;  %v2714_v4 = vmul.f32 %v20061_v3, %v20707_v23  ;;  %v19315_v48 = vadd.f32 1e-05, %v2695_v27 }
 0x3a1   :  { %v2713_v22 = vmul.f32 %v20063_v32, %v20710_v44  ;;  %20072 = vrsqrt.f32 %v19314_v19 }
 0x3a2   :  { %v2728_v8 = vmul.f32 %v14438_v33, %v2714_v4  ;;  %20074 = vrsqrt.f32 %v19315_v48 }
 0x3a3   :  { %v20065_v9 = vpop.eup %20064  ;;  %v2727_v38 = vmul.f32 %v14438_v33, %v2713_v22 }
 0x3a4   :  { %v20067_v29 = vpop.eup %20066  ;;  %v2754_v6 = vsel %vm964_vm2, %v2728_v8, 0  ;;  %v2716_v24 = vmul.f32 %v20065_v9, %v20718_v46 }
 0x3a5   :  { %v20986_v1 = vand.u32 4294901760, %v2754_v6  ;;  %v2715_v20 = vmul.f32 %v20067_v29, %v20724_v50  ;;  %v2751_v31 = vsel %vm964_vm2, %v2727_v38, 0 }
 0x3a6   :  { %v20990_v23 = vand.u32 4294901760, %v2751_v31  ;;  %v2730_v15 = vmul.f32 %v14438_v33, %v2716_v24 }
 0x3a7   :  { %v20069_v44 = vpop.eup %20068  ;;  %v20993_v17 = vsub.f32 %v2754_v6, %v20986_v1  ;;  %v2729_v5 = vmul.f32 %v14438_v33, %v2715_v20 }
 0x3a8   :  { %v20071_v42 = vpop.eup %20070  ;;  %v2718_v41 = vmul.f32 %v20069_v44, %v20740_v43  ;;  %v20997_v12 = vsub.f32 %v2751_v31, %v20990_v23  ;;  %v2760_v46 = vsel %vm964_vm2, %v2730_v15, 0 }
 0x3a9   :  { %v2717_v50 = vmul.f32 %v20071_v42, %v20747_v26  ;;  %v2859_v10 = vand.u32 4294901760, %v20993_v17  ;;  %v2757_v3 = vsel %vm964_vm2, %v2729_v5, 0  ;;  %v21003_v19 = vand.u32 4294901760, %v2760_v46 }
 0x3aa   :  { %v2849_v27 = vand.u32 4294901760, %v20997_v12  ;;  %v21006_v32 = vand.u32 4294901760, %v2757_v3  ;;  %v2732_v4 = vmul.f32 %v14438_v33, %v2718_v41 }
 0x3ab   :  { %v20073_v48 = vpop.eup %20072  ;;  %v2860_v43 = vsub.f32 %v20993_v17, %v2859_v10  ;;  %v21012_v22 = vsub.f32 %v2760_v46, %v21003_v19  ;;  %v2731_v26 = vmul.f32 %v14438_v33, %v2717_v50 }
 0x3ac   :  { %v20075_v8 = vpop.eup %20074  ;;  %v2720_v9 = vmul.f32 %v20073_v48, %v20767_v59  ;;  %v2850_v38 = vsub.f32 %v20997_v12, %v2849_v27  ;;  %v21019_v29 = vsub.f32 %v2757_v3, %v21006_v32  ;;  %v2766_v6 = vsel %vm964_vm2, %v2732_v4, 0 }
 0x3ad   :  { %v2719_v24 = vmul.f32 %v20075_v8, %v20776_v37  ;;  %v2879_v20 = vand.u32 4294901760, %v21012_v22  ;;  %v2763_v31 = vsel %vm964_vm2, %v2731_v26, 0  ;;  %v21028_v59 = vand.u32 4294901760, %v2766_v6 }
 0x3ae   :  { %v2851_v15 = vand.u32 4294901760, %v2850_v38  ;;  %v2869_v44 = vand.u32 4294901760, %v21019_v29  ;;  %v21026_v5 = vand.u32 4294901760, %v2763_v31  ;;  %v2861_v42 = vand.u32 4294901760, %v2860_v43 }
 0x3af   :  { %v2880_v41 = vsub.f32 %v21012_v22, %v2879_v20  ;;  %v2733_v46 = vmul.f32 %v14438_v33, %v2719_v24  ;;  %v2734_v50 = vmul.f32 %v14438_v33, %v2720_v9  ;;  %v21040_v4 = vsub.f32 %v2766_v6, %v21028_v59 }
 0x3b0   :  { %16302 = vmatprep.mubr.f32.mxu1 %v2851_v15  ;;  %v2870_v37 = vsub.f32 %v21019_v29, %v2869_v44  ;;  %v21037_v3 = vsub.f32 %v2763_v31, %v21026_v5 }
 0x3b1   :  { %16303 = vmatmul.mubr.f32.vlgmr.msra.gmra.mrb[8].mxu1 %v2861_v42  ;;  %v2769_v48 = vsel %vm964_vm2, %v2733_v46, 0  ;;  %v2772_v43 = vsel %vm964_vm2, %v2734_v50, 0  ;;  %v2899_v8 = vand.u32 4294901760, %v21040_v4  ;;  %v2881_v38 = vand.u32 4294901760, %v2880_v41 }
 0x3b2   :  { %18441 = vmatpush3.bf16.msra.mxu1 %v20954_v30  ;;  %v2871_v26 = vand.u32 4294901760, %v2870_v37  ;;  %v2889_v33 = vand.u32 4294901760, %v21037_v3  ;;  %v21047_v9 = vand.u32 4294901760, %v2769_v48  ;;  %v21050_v24 = vand.u32 4294901760, %v2772_v43 }
 0x3b3   :  { %18443 = vmatprep.subr.bf16.mxu1 %v20957_v7  ;;  %v2900_v30 = vsub.f32 %v21040_v4, %v2899_v8 }
 0x3b4   :  { %16305 = vmatprep.mubr.f32.mxu1 %v2871_v26  ;;  %v2890_v6 = vsub.f32 %v21037_v3, %v2889_v33  ;;  %v21059_v31 = vsub.f32 %v2769_v48, %v21047_v9  ;;  %v21062_v15 = vsub.f32 %v2772_v43, %v21050_v24 }
 0x3b5   :  { %16306 = vmatmul.mubr.f32.gmra.mrb[10].mxu1 %v2881_v38  ;;  %v2901_v46 = vand.u32 4294901760, %v2900_v30 }
 0x3b6   :  { %18445 = vmatpush3.bf16.msra.mxu1 %v20957_v7  ;;  %v2891_v42 = vand.u32 4294901760, %v2890_v6  ;;  %v2909_v41 = vand.u32 4294901760, %v21059_v31  ;;  %v2919_v50 = vand.u32 4294901760, %v21062_v15 }
 0x3b7   :  { %18447 = vmatprep.subr.bf16.mxu1 %v20959_v53 }
 0x3b8   :  { %16308 = vmatprep.mubr.f32.mxu1 %v2891_v42  ;;  %v2910_v37 = vsub.f32 %v21059_v31, %v2909_v41  ;;  %v2920_v48 = vsub.f32 %v21062_v15, %v2919_v50 }
 0x3b9   :  { %16309 = vmatmul.mubr.f32.gmra.mrb[12].mxu1 %v2901_v46 }
 0x3ba   :  { %18449 = vmatpush3.bf16.msra.mxu1 %v20959_v53  ;;  %v2911_v43 = vand.u32 4294901760, %v2910_v37  ;;  %v2921_v26 = vand.u32 4294901760, %v2920_v48 }
 0x3bb   :  { %18451 = vmatprep.subr.bf16.mxu1 %v20961_v25 }
 0x3bc   :  { %16311 = vmatprep.mubr.f32.mxu1 %v2911_v43 }
 0x3bd   :  { %16312 = vmatmul.mubr.f32.gmra.mrb[14].mxu1 %v2921_v26 }
 0x3be   :  { %18453 = vmatpush3.bf16.msra.mxu1 %v20961_v25  ;;  %16330 = vmatprep.mubr.f32.mxu1 %v20990_v23 }
 0x3bf   :  { %18455 = vmatprep.subr.bf16.mxu1 %v20963_v47 }
 0x3c1   :  { %16331 = vmatmul.mubr.f32.vlgmr.msra.gmra.mrb[8].mxu1 %v20986_v1 }
 0x3c2   :  { %16333 = vmatprep.mubr.f32.mxu1 %v21006_v32  ;;  %18457 = vmatpush3.bf16.msra.mxu1 %v20963_v47  ;;  %v14439_v47 = vld [vmem:[%s23364_s5] ss:$0 sm:$0xff] }
 0x3c3   :  { %18459 = vmatprep.subr.bf16.mxu1 %v20965_v36 }
 0x3c5   :  { %16334 = vmatmul.mubr.f32.gmra.mrb[10].mxu1 %v21003_v19 }
 0x3c6   :  { %16336 = vmatprep.mubr.f32.mxu1 %v21026_v5  ;;  %18461 = vmatpush3.bf16.msra.mxu1 %v20965_v36 }
 0x3c7   :  { %18463 = vmatprep.subr.bf16.mxu1 %v20967_v54 }
 0x3c9   :  { %16337 = vmatmul.mubr.f32.gmra.mrb[12].mxu1 %v21028_v59 }
 0x3ca   :  { %16339 = vmatprep.mubr.f32.mxu1 %v21047_v9  ;;  %18465 = vmatpush3.bf16.msra.mxu1 %v20967_v54 }
 0x3cb   :  { %18467 = vmatprep.subr.bf16.mxu1 %v20969_v34 }
 0x3cd   :  { %16340 = vmatmul.mubr.f32.gmra.mrb[14].mxu1 %v21050_v24 }
 0x3ce   :  { %18469 = vmatpush3.bf16.msra.mxu1 %v20969_v34  ;;  %16358 = vmatprep.mubr.f32.mxu1 %v20997_v12 }
 0x3cf   :  { %18471 = vmatprep.subr.bf16.mxu1 %v20920_v49 }
 0x3d1   :  { %16359 = vmatmul.mubr.f32.vlgmr.msra.gmra.mrb[8].mxu1 %v20993_v17 }
 0x3d2   :  { %16361 = vmatprep.mubr.f32.mxu1 %v21019_v29  ;;  %18473 = vmatpush3.bf16.msra.mxu1 %v20920_v49 }
 0x3d3   :  { %18475 = vmatprep.subr.bf16.mxu1 %v20930_v21 }
 0x3d5   :  { %16362 = vmatmul.mubr.f32.gmra.mrb[10].mxu1 %v21012_v22 }
 0x3d6   :  { %16364 = vmatprep.mubr.f32.mxu1 %v21037_v3  ;;  %18477 = vmatpush3.bf16.msra.mxu1 %v20930_v21 }
 0x3d7   :  { %18479 = vmatprep.subr.bf16.mxu1 %v20940_v35 }
 0x3d9   :  { %16365 = vmatmul.mubr.f32.gmra.mrb[12].mxu1 %v21040_v4 }
 0x3da   :  { %16367 = vmatprep.mubr.f32.mxu1 %v21059_v31  ;;  %18481 = vmatpush3.bf16.msra.mxu1 %v20940_v35 }
 0x3db   :  { %18483 = vmatprep.subr.bf16.mxu1 %v20950_v39 }
 0x3dd   :  { %16368 = vmatmul.mubr.f32.gmra.mrb[14].mxu1 %v21062_v15 }
 0x3de   :  { %18485 = vmatpush3.bf16.msra.mxu1 %v20950_v39  ;;  %16386 = vmatprep.mubr.f32.mxu1 %v2849_v27 }
 0x3df   :  { %18487 = vmatprep.subr.bf16.mxu1 %v20971_v52 }
 0x3e1   :  { %16387 = vmatmul.mubr.f32.vlgmr.msra.gmra.mrb[8].mxu1 %v2859_v10 }
 0x3e2   :  { %16389 = vmatprep.mubr.f32.mxu1 %v2869_v44  ;;  %18489 = vmatpush3.bf16.msra.mxu1 %v20971_v52 }
 0x3e3   :  { %18491 = vmatprep.subr.bf16.mxu1 %v20973_v55 }
 0x3e5   :  { %16390 = vmatmul.mubr.f32.gmra.mrb[10].mxu1 %v2879_v20 }
 0x3e6   :  { %16392 = vmatprep.mubr.f32.mxu1 %v2889_v33  ;;  %18493 = vmatpush3.bf16.msra.mxu1 %v20973_v55 }
 0x3e7   :  { %18495 = vmatprep.subr.bf16.mxu1 %v20975_v57 }
 0x3e9   :  { %16393 = vmatmul.mubr.f32.gmra.mrb[12].mxu1 %v2899_v8 }
 0x3ea   :  { %16395 = vmatprep.mubr.f32.mxu1 %v2909_v41  ;;  %18497 = vmatpush3.bf16.msra.mxu1 %v20975_v57 }
 0x3eb   :  { %18499 = vmatprep.subr.bf16.mxu1 %v20977_v61 }
 0x3ed   :  { %16396 = vmatmul.mubr.f32.gmra.mrb[14].mxu1 %v2919_v50 }
 0x3ee   :  { %18501 = vmatpush3.bf16.msra.mxu1 %v20977_v61  ;;  %16414 = vmatprep.mubr.f32.mxu1 %v20990_v23 }
 0x3ef   :  { %18503 = vmatprep.subr.bf16.mxu1 %v20920_v49 }
 0x3f1   :  { %16415 = vmatmul.mubr.f32.vlgmr.msra.gmra.mrb[8].mxu1 %v20986_v1 }
 0x3f2   :  { %16417 = vmatprep.mubr.f32.mxu1 %v21006_v32  ;;  %18505 = vmatpush3.bf16.msra.mxu1 %v20920_v49 }
 0x3f3   :  { %18507 = vmatprep.subr.bf16.mxu1 %v20930_v21 }
 0x3f5   :  { %16418 = vmatmul.mubr.f32.gmra.mrb[10].mxu1 %v21003_v19 }
 0x3f6   :  { %16420 = vmatprep.mubr.f32.mxu1 %v21026_v5  ;;  %18509 = vmatpush3.bf16.msra.mxu1 %v20930_v21 }
 0x3f7   :  { %18511 = vmatprep.subr.bf16.mxu1 %v20940_v35 }
 0x3f9   :  { %16421 = vmatmul.mubr.f32.gmra.mrb[12].mxu1 %v21028_v59 }
 0x3fa   :  { %16423 = vmatprep.mubr.f32.mxu1 %v21047_v9  ;;  %18513 = vmatpush3.bf16.msra.mxu1 %v20940_v35 }
 0x3fb   :  { %18515 = vmatprep.subr.bf16.mxu1 %v20950_v39 }
 0x3fd   :  { %16424 = vmatmul.mubr.f32.gmra.mrb[14].mxu1 %v21050_v24 }
 0x3fe   :  { %18517 = vmatpush3.bf16.msra.mxu1 %v20950_v39  ;;  %16442 = vmatprep.mubr.f32.mxu1 %v20990_v23 }
 0x3ff   :  { %18615 = vmatprep.subr.bf16.mxu1 %v20468_v28 }
 0x401   :  { %16443 = vmatmul.mubr.f32.vlgmr.msra.gmra.mrb[8].mxu1 %v20986_v1 }
 0x402   :  { %16445 = vmatprep.mubr.f32.mxu1 %v21006_v32  ;;  %18617 = vmatpush3.bf16.msra.mxu1 %v20468_v28 }
 0x403   :  { %18619 = vmatprep.subr.bf16.mxu1 %v20480_v51 }
 0x405   :  { %16446 = vmatmul.mubr.f32.gmra.mrb[10].mxu1 %v21003_v19 }
 0x406   :  { %16448 = vmatprep.mubr.f32.mxu1 %v21026_v5  ;;  %18621 = vmatpush3.bf16.msra.mxu1 %v20480_v51 }
 0x407   :  { %18623 = vmatprep.subr.bf16.mxu1 %v20492_v60 }
 0x409   :  { %16449 = vmatmul.mubr.f32.gmra.mrb[12].mxu1 %v21028_v59 }
 0x40a   :  { %16451 = vmatprep.mubr.f32.mxu1 %v21047_v9  ;;  %18625 = vmatpush3.bf16.msra.mxu1 %v20492_v60 }
 0x40b   :  { %18627 = vmatprep.subr.bf16.mxu1 %v20504_v2 }
 0x40d   :  { %16452 = vmatmul.mubr.f32.gmra.mrb[14].mxu1 %v21050_v24 }
 0x40e   :  { %18629 = vmatpush3.bf16.msra.mxu1 %v20504_v2 }
 0x40f   :  { %18631 = vmatprep.subr.bf16.mxu1 %v20513_v18 }
 0x4d4   :  { %v16444_v53 = vpop.f32.mrb[8].mxu1 }
 0x4d5   :  { %v19316_v7 = vadd.f32 %v16444_v53, %v14439_v47  ;;  %v3566_v49 = vpop.f32.mrb[9].mxu1 }
 0x4d6   :  { %v19317_v21 = vadd.f32 %v14439_v47, %v3566_v49 }
 0x4d7   :  { %v14441_v35 = vmul.f32 -1.442695, %v19316_v7 }
 0x4d8   :  { %v14440_v39 = vmul.f32 -1.442695, %v19317_v21  ;;  %v16447_v25 = vpop.f32.mrb[10].mxu1 }
 0x4d9   :  { %20076 = vpow2.f32 %v14441_v35  ;;  %v19318_v36 = vadd.f32 %v16447_v25, %v14439_v47  ;;  %v3578_v54 = vpop.f32.mrb[11].mxu1 }
 0x4da   :  { %20078 = vpow2.f32 %v14440_v39  ;;  %v19319_v34 = vadd.f32 %v14439_v47, %v3578_v54 }
 0x4db   :  { %v14443_v52 = vmul.f32 -1.442695, %v19318_v36 }
 0x4dc   :  { %v14442_v55 = vmul.f32 -1.442695, %v19319_v34  ;;  %v16450_v57 = vpop.f32.mrb[12].mxu1 }
 0x4dd   :  { %20080 = vpow2.f32 %v14443_v52  ;;  %v19320_v61 = vadd.f32 %v16450_v57, %v14439_v47  ;;  %v3590_v1 = vpop.f32.mrb[13].mxu1 }
 0x4de   :  { %20082 = vpow2.f32 %v14442_v55  ;;  %v19321_v23 = vadd.f32 %v14439_v47, %v3590_v1 }
 0x4df   :  { %v14445_v17 = vmul.f32 -1.442695, %v19320_v61 }
 0x4e0   :  { %v14444_v12 = vmul.f32 -1.442695, %v19321_v23  ;;  %v16453_v10 = vpop.f32.mrb[14].mxu1 }
 0x4e1   :  { %20084 = vpow2.f32 %v14445_v17  ;;  %v21161_v19 = vadd.f32 %v16453_v10, %v14439_v47  ;;  %v3602_v27 = vpop.f32.mrb[15].mxu1 }
 0x4e2   :  { %20086 = vpow2.f32 %v14444_v12  ;;  %v21163_v32 = vadd.f32 %v14439_v47, %v3602_v27 }
 0x4e3   :  { %v20077_v22 = vpop.eup %20076  ;;  %v14447_v29 = vmul.f32 -1.442695, %v21161_v19 }
 0x4e4   :  { %v20079_v20 = vpop.eup %20078  ;;  %v3637_v44 = vadd.f32 1.0, %v20077_v22  ;;  %v14446_v5 = vmul.f32 -1.442695, %v21163_v32 }
 0x4e5   :  { %v3636_v59 = vadd.f32 1.0, %v20079_v20  ;;  %20088 = vpow2.f32 %v14447_v29 }
 0x4e6   :  { %20090 = vrcp.f32 %v3637_v44 }
 0x4e7   :  { %v20081_v3 = vpop.eup %20080  ;;  %20092 = vrcp.f32 %v3636_v59 }
 0x4e8   :  { %v20083_v4 = vpop.eup %20082  ;;  %v3639_v33 = vadd.f32 1.0, %v20081_v3  ;;  %20094 = vpow2.f32 %v14446_v5 }
 0x4e9   :  { %v3638_v8 = vadd.f32 1.0, %v20083_v4 }
 0x4ea   :  { %20096 = vrcp.f32 %v3639_v33 }
 0x4eb   :  { %v20085_v9 = vpop.eup %20084  ;;  %20098 = vrcp.f32 %v3638_v8 }
 0x4ec   :  { %v20087_v38 = vpop.eup %20086  ;;  %v3641_v24 = vadd.f32 1.0, %v20085_v9 }
 0x4ed   :  { %v3640_v6 = vadd.f32 1.0, %v20087_v38 }
 0x4ee   :  { %20100 = vrcp.f32 %v3641_v24 }
 0x4ef   :  { %v20089_v30 = vpop.eup %20088  ;;  %20102 = vrcp.f32 %v3640_v6 }
 0x4f0   :  { %v20091_v31 = vpop.eup %20090  ;;  %v3643_v15 = vadd.f32 1.0, %v20089_v30 }
 0x4f1   :  { %v20093_v42 = vpop.eup %20092  ;;  %v21167_v41 = vmul.f32 %v20091_v31, %v19316_v7 }
 0x4f2   :  { %v20095_v46 = vpop.eup %20094  ;;  %v21169_v50 = vmul.f32 %v20093_v42, %v19317_v21  ;;  %20104 = vrcp.f32 %v3643_v15 }
 0x4f3   :  { %v3673_v37 = vsel %vm964_vm2, %v21167_v41, 0  ;;  %v3642_v48 = vadd.f32 1.0, %v20095_v46 }
 0x4f4   :  { %v20097_v43 = vpop.eup %20096  ;;  %v21173_v26 = vand.u32 4294901760, %v3673_v37  ;;  %v3670_v47 = vsel %vm964_vm2, %v21169_v50, 0 }
 0x4f5   :  { %v20099_v53 = vpop.eup %20098  ;;  %v21177_v49 = vand.u32 4294901760, %v3670_v47  ;;  %v21179_v35 = vmul.f32 %v20097_v43, %v19318_v36  ;;  %20106 = vrcp.f32 %v3642_v48 }
 0x4f6   :  { %v21182_v7 = vsub.f32 %v3673_v37, %v21173_v26  ;;  %v21184_v21 = vmul.f32 %v20099_v53, %v19319_v34 }
 0x4f7   :  { %v21187_v39 = vsub.f32 %v3670_v47, %v21177_v49  ;;  %v3679_v25 = vsel %vm964_vm2, %v21179_v35, 0 }
 0x4f8   :  { %v20101_v54 = vpop.eup %20100  ;;  %v3778_v52 = vand.u32 4294901760, %v21182_v7  ;;  %v21192_v55 = vand.u32 4294901760, %v3679_v25  ;;  %v3676_v36 = vsel %vm964_vm2, %v21184_v21, 0 }
 0x4f9   :  { %v20103_v57 = vpop.eup %20102  ;;  %v21196_v1 = vand.u32 4294901760, %v3676_v36  ;;  %v21198_v17 = vmul.f32 %v20101_v54, %v19320_v61  ;;  %v3768_v34 = vand.u32 4294901760, %v21187_v39 }
 0x4fa   :  { %v3779_v12 = vsub.f32 %v21182_v7, %v3778_v52  ;;  %v21205_v10 = vsub.f32 %v3679_v25, %v21192_v55  ;;  %v21207_v27 = vmul.f32 %v20103_v57, %v19321_v23 }
 0x4fb   :  { %v21210_v22 = vsub.f32 %v3676_v36, %v21196_v1  ;;  %v3685_v29 = vsel %vm964_vm2, %v21198_v17, 0  ;;  %v3769_v61 = vsub.f32 %v21187_v39, %v3768_v34 }
 0x4fc   :  { %v20105_v20 = vpop.eup %20104  ;;  %v21217_v44 = vand.u32 4294901760, %v3685_v29  ;;  %v3682_v5 = vsel %vm964_vm2, %v21207_v27, 0  ;;  %v3798_v59 = vand.u32 4294901760, %v21205_v10  ;;  %v3780_v8 = vand.u32 4294901760, %v3779_v12 }
 0x4fd   :  { %v21222_v23 = vand.u32 4294901760, %v3682_v5  ;;  %v21225_v3 = vmul.f32 %v20105_v20, %v21161_v19  ;;  %v3770_v4 = vand.u32 4294901760, %v3769_v61  ;;  %v3788_v33 = vand.u32 4294901760, %v21210_v22 }
 0x4fe   :  { %v21229_v9 = vsub.f32 %v3685_v29, %v21217_v44  ;;  %v3799_v38 = vsub.f32 %v21205_v10, %v3798_v59 }
 0x4ff   :  { %v20107_v24 = vpop.eup %20106  ;;  %v21235_v6 = vsub.f32 %v3682_v5, %v21222_v23  ;;  %v3691_v30 = vsel %vm964_vm2, %v21225_v3, 0  ;;  %16470 = vmatprep.mubr.f32.mxu0 %v3770_v4  ;;  %v3789_v19 = vsub.f32 %v21210_v22, %v3788_v33 }
 0x500   :  { %v21242_v31 = vand.u32 4294901760, %v3691_v30  ;;  %v21245_v15 = vmul.f32 %v20107_v24, %v21163_v32  ;;  %16471 = vmatmul.mubr.f32.vlgmr.msra.gmra.mrb[24].mxu0 %v3780_v8  ;;  %v3818_v42 = vand.u32 4294901760, %v21229_v9  ;;  %v3800_v47 = vand.u32 4294901760, %v3799_v38 }
 0x501   :  { %18537 = vmatpush3.bf16.msra.mxu0 %v20513_v18  ;;  %v3790_v46 = vand.u32 4294901760, %v3789_v19  ;;  %v3808_v37 = vand.u32 4294901760, %v21235_v6 }
 0x502   :  { %v21251_v48 = vsub.f32 %v3691_v30, %v21242_v31  ;;  %v3688_v43 = vsel %vm964_vm2, %v21245_v15, 0  ;;  %18539 = vmatprep.subr.bf16.mxu0 %v20520_v58  ;;  %v3819_v32 = vsub.f32 %v21229_v9, %v3818_v42 }
 0x503   :  { %v21259_v53 = vand.u32 4294901760, %v3688_v43  ;;  %16473 = vmatprep.mubr.f32.mxu0 %v3790_v46  ;;  %v3809_v25 = vsub.f32 %v21235_v6, %v3808_v37 }
 0x504   :  { %16474 = vmatmul.mubr.f32.gmra.mrb[26].mxu0 %v3800_v47  ;;  %v3838_v54 = vand.u32 4294901760, %v21251_v48  ;;  %v3820_v12 = vand.u32 4294901760, %v3819_v32 }
 0x505   :  { %v3827_v36 = vsub.f32 %v3688_v43, %v21259_v53  ;;  %18541 = vmatpush3.bf16.msra.mxu0 %v20520_v58  ;;  %v3810_v57 = vand.u32 4294901760, %v3809_v25 }
 0x506   :  { %18543 = vmatprep.subr.bf16.mxu0 %v20522_v56  ;;  %v3839_v61 = vsub.f32 %v21251_v48, %v3838_v54 }
 0x507   :  { %16476 = vmatprep.mubr.f32.mxu0 %v3810_v57  ;;  %v3828_v29 = vand.u32 4294901760, %v3827_v36 }
 0x508   :  { %16477 = vmatmul.mubr.f32.gmra.mrb[28].mxu0 %v3820_v12  ;;  %v3840_v4 = vand.u32 4294901760, %v3839_v61 }
 0x509   :  { %18545 = vmatpush3.bf16.msra.mxu0 %v20522_v56  ;;  %v3829_v20 = vsub.f32 %v3827_v36, %v3828_v29 }
 0x50a   :  { %18547 = vmatprep.subr.bf16.mxu0 %v20526_v40 }
 0x50b   :  { %v3830_v5 = vand.u32 4294901760, %v3829_v20 }
 0x50d   :  { %16479 = vmatprep.mubr.f32.mxu0 %v3830_v5  ;;  %18549 = vmatpush3.bf16.msra.mxu0 %v20526_v40 }
 0x50e   :  { %16480 = vmatmul.mubr.f32.gmra.mrb[30].mxu0 %v3840_v4  ;;  %18551 = vmatprep.subr.bf16.mxu0 %v20528_v11 }
 0x50f   :  { %16498 = vmatprep.mubr.f32.mxu0 %v21177_v49 }
 0x512   :  { %16499 = vmatmul.mubr.f32.vlgmr.msra.gmra.mrb[24].mxu0 %v21173_v26 }
 0x513   :  { %16501 = vmatprep.mubr.f32.mxu0 %v21196_v1  ;;  %18553 = vmatpush3.bf16.msra.mxu0 %v20528_v11 }
 0x514   :  { %18555 = vmatprep.subr.bf16.mxu0 %v20530_v62 }
 0x516   :  { %16502 = vmatmul.mubr.f32.gmra.mrb[26].mxu0 %v21192_v55 }
 0x517   :  { %16504 = vmatprep.mubr.f32.mxu0 %v21222_v23  ;;  %18557 = vmatpush3.bf16.msra.mxu0 %v20530_v62 }
 0x518   :  { %18559 = vmatprep.subr.bf16.mxu0 %v20532_v0 }
 0x51a   :  { %16505 = vmatmul.mubr.f32.gmra.mrb[28].mxu0 %v21217_v44 }
 0x51b   :  { %16507 = vmatprep.mubr.f32.mxu0 %v21259_v53  ;;  %18561 = vmatpush3.bf16.msra.mxu0 %v20532_v0 }
 0x51c   :  { %18563 = vmatprep.subr.bf16.mxu0 %v20534_v63 }
 0x51e   :  { %16508 = vmatmul.mubr.f32.gmra.mrb[30].mxu0 %v21242_v31 }
 0x51f   :  { %18565 = vmatpush3.bf16.msra.mxu0 %v20534_v63  ;;  %16526 = vmatprep.mubr.f32.mxu0 %v21187_v39 }
 0x520   :  { %18567 = vmatprep.subr.bf16.mxu0 %v20468_v28 }
 0x522   :  { %16527 = vmatmul.mubr.f32.vlgmr.msra.gmra.mrb[24].mxu0 %v21182_v7 }
 0x523   :  { %16529 = vmatprep.mubr.f32.mxu0 %v21210_v22  ;;  %18569 = vmatpush3.bf16.msra.mxu0 %v20468_v28 }
 0x524   :  { %18571 = vmatprep.subr.bf16.mxu0 %v20480_v51 }
 0x526   :  { %16530 = vmatmul.mubr.f32.gmra.mrb[26].mxu0 %v21205_v10 }
 0x527   :  { %16532 = vmatprep.mubr.f32.mxu0 %v21235_v6  ;;  %18573 = vmatpush3.bf16.msra.mxu0 %v20480_v51 }
 0x528   :  { %18575 = vmatprep.subr.bf16.mxu0 %v20492_v60 }
 0x52a   :  { %16533 = vmatmul.mubr.f32.gmra.mrb[28].mxu0 %v21229_v9 }
 0x52b   :  { %16535 = vmatprep.mubr.f32.mxu0 %v3827_v36  ;;  %18577 = vmatpush3.bf16.msra.mxu0 %v20492_v60 }
 0x52c   :  { %18579 = vmatprep.subr.bf16.mxu0 %v20504_v2 }
 0x52e   :  { %16536 = vmatmul.mubr.f32.gmra.mrb[30].mxu0 %v21251_v48 }
 0x52f   :  { %18581 = vmatpush3.bf16.msra.mxu0 %v20504_v2  ;;  %16554 = vmatprep.mubr.f32.mxu0 %v3768_v34 }
 0x530   :  { %18583 = vmatprep.subr.bf16.mxu0 %v20510_v14 }
 0x532   :  { %16555 = vmatmul.mubr.f32.vlgmr.msra.gmra.mrb[24].mxu0 %v3778_v52 }
 0x533   :  { %16557 = vmatprep.mubr.f32.mxu0 %v3788_v33  ;;  %18585 = vmatpush3.bf16.msra.mxu0 %v20510_v14 }
 0x534   :  { %18587 = vmatprep.subr.bf16.mxu0 %v20515_v16 }
 0x536   :  { %16558 = vmatmul.mubr.f32.gmra.mrb[26].mxu0 %v3798_v59 }
 0x537   :  { %16560 = vmatprep.mubr.f32.mxu0 %v3808_v37  ;;  %18589 = vmatpush3.bf16.msra.mxu0 %v20515_v16 }
 0x538   :  { %18591 = vmatprep.subr.bf16.mxu0 %v20518_v45 }
 0x53a   :  { %16561 = vmatmul.mubr.f32.gmra.mrb[28].mxu0 %v3818_v42 }
 0x53b   :  { %16563 = vmatprep.mubr.f32.mxu0 %v3828_v29  ;;  %18593 = vmatpush3.bf16.msra.mxu0 %v20518_v45 }
 0x53c   :  { %18595 = vmatprep.subr.bf16.mxu0 %v20524_v13 }
 0x53e   :  { %16564 = vmatmul.mubr.f32.gmra.mrb[30].mxu0 %v3838_v54 }
 0x53f   :  { %18597 = vmatpush3.bf16.msra.mxu0 %v20524_v13  ;;  %16582 = vmatprep.mubr.f32.mxu0 %v21177_v49 }
 0x540   :  { %18599 = vmatprep.subr.bf16.mxu0 %v20468_v28 }
 0x542   :  { %16583 = vmatmul.mubr.f32.vlgmr.msra.gmra.mrb[24].mxu0 %v21173_v26 }
 0x543   :  { %16585 = vmatprep.mubr.f32.mxu0 %v21196_v1  ;;  %18601 = vmatpush3.bf16.msra.mxu0 %v20468_v28 }
 0x544   :  { %18603 = vmatprep.subr.bf16.mxu0 %v20480_v51 }
 0x546   :  { %16586 = vmatmul.mubr.f32.gmra.mrb[26].mxu0 %v21192_v55 }
 0x547   :  { %16588 = vmatprep.mubr.f32.mxu0 %v21222_v23  ;;  %18605 = vmatpush3.bf16.msra.mxu0 %v20480_v51 }
 0x548   :  { %18607 = vmatprep.subr.bf16.mxu0 %v20492_v60 }
 0x54a   :  { %16589 = vmatmul.mubr.f32.gmra.mrb[28].mxu0 %v21217_v44 }
 0x54b   :  { %16591 = vmatprep.mubr.f32.mxu0 %v21259_v53  ;;  %18609 = vmatpush3.bf16.msra.mxu0 %v20492_v60 }
 0x54c   :  { %18611 = vmatprep.subr.bf16.mxu0 %v20504_v2 }
 0x54e   :  { %16592 = vmatmul.mubr.f32.gmra.mrb[30].mxu0 %v21242_v31 }
 0x54f   :  { %18613 = vmatpush3.bf16.msra.mxu0 %v20504_v2  ;;  %16610 = vmatprep.mubr.f32.mxu0 %v21177_v49 }
 0x552   :  { %16611 = vmatmul.mubr.f32.vlgmr.msra.gmra.mrb[24].mxu0 %v21173_v26 }
 0x553   :  { %16613 = vmatprep.mubr.f32.mxu0 %v21196_v1 }
 0x556   :  { %16614 = vmatmul.mubr.f32.gmra.mrb[26].mxu0 %v21192_v55 }
 0x557   :  { %16616 = vmatprep.mubr.f32.mxu0 %v21222_v23 }
 0x55a   :  { %16617 = vmatmul.mubr.f32.gmra.mrb[28].mxu0 %v21217_v44 }
 0x55b   :  { %16619 = vmatprep.mubr.f32.mxu0 %v21259_v53 }
 0x55e   :  { %16620 = vmatmul.mubr.f32.gmra.mrb[30].mxu0 %v21242_v31 }
 0x625   :  { %v16612_v7 = vpop.f32.mrb[24].mxu0 }
 0x626   :  { %v21352_v39 = vsub.f32 %v21167_v41, %v16612_v7  ;;  %v4485_v52 = vpop.f32.mrb[25].mxu0 }
 0x627   :  { %v21355_v49 = vsub.f32 %v21169_v50, %v4485_v52 }
 0x628   :  { %v4540_v26 = vmul.f32 %v21352_v39, %v21352_v39 }
 0x629   :  { %v4539_v55 = vmul.f32 %v21355_v49, %v21355_v49  ;;  %v16615_v1 = vpop.f32.mrb[26].mxu0 }
 0x62a   :  { %v4551_v34 = vsel %vm964_vm2, %v4540_v26, 0  ;;  %v21363_v10 = vsub.f32 %v21179_v35, %v16615_v1  ;;  %v4497_v22 = vpop.f32.mrb[27].mxu0 }
 0x62b   :  { %v21365_v44 = vand.u32 4294901760, %v4551_v34  ;;  %v4548_v41 = vsel %vm964_vm2, %v4539_v55, 0  ;;  %v21369_v50 = vsub.f32 %v21184_v21, %v4497_v22 }
 0x62c   :  { %v21371_v59 = vand.u32 4294901760, %v4548_v41  ;;  %v4542_v23 = vmul.f32 %v21363_v10, %v21363_v10 }
 0x62d   :  { %v21376_v33 = vsub.f32 %v4551_v34, %v21365_v44  ;;  %v4541_v35 = vmul.f32 %v21369_v50, %v21369_v50  ;;  %v16618_v8 = vpop.f32.mrb[28].mxu0 }
 0x62e   :  { %v21381_v9 = vsub.f32 %v4548_v41, %v21371_v59  ;;  %v4557_v38 = vsel %vm964_vm2, %v4542_v23, 0  ;;  %v21385_v21 = vsub.f32 %v21198_v17, %v16618_v8  ;;  %v4509_v24 = vpop.f32.mrb[29].mxu0 }
 0x62f   :  { %v4656_v6 = vand.u32 4294901760, %v21376_v33  ;;  %v21388_v30 = vand.u32 4294901760, %v4557_v38  ;;  %v4554_v19 = vsel %vm964_vm2, %v4541_v35, 0  ;;  %v21392_v31 = vsub.f32 %v21207_v27, %v4509_v24 }
 0x630   :  { %v21394_v42 = vand.u32 4294901760, %v4554_v19  ;;  %v4544_v46 = vmul.f32 %v21385_v21, %v21385_v21  ;;  %v4646_v37 = vand.u32 4294901760, %v21381_v9 }
 0x631   :  { %v4657_v17 = vsub.f32 %v21376_v33, %v4656_v6  ;;  %v21403_v48 = vsub.f32 %v4557_v38, %v21388_v30  ;;  %v4543_v43 = vmul.f32 %v21392_v31, %v21392_v31  ;;  %v16621_v47 = vpop.f32.mrb[30].mxu0 }
 0x632   :  { %v21408_v27 = vsub.f32 %v4554_v19, %v21394_v42  ;;  %v4563_v32 = vsel %vm964_vm2, %v4544_v46, 0  ;;  %v21412_v53 = vsub.f32 %v21225_v3, %v16621_v47  ;;  %v4521_v25 = vpop.f32.mrb[31].mxu0  ;;  %v4647_v54 = vsub.f32 %v21381_v9, %v4646_v37 }
 0x633   :  { %v21417_v36 = vand.u32 4294901760, %v4563_v32  ;;  %v4560_v57 = vsel %vm964_vm2, %v4543_v43, 0  ;;  %v21421_v12 = vsub.f32 %v21245_v15, %v4521_v25  ;;  %v4658_v5 = vand.u32 4294901760, %v4657_v17 }
 0x634   :  { %v21423_v29 = vand.u32 4294901760, %v4560_v57  ;;  %v4546_v61 = vmul.f32 %v21412_v53, %v21412_v53  ;;  %v4648_v20 = vand.u32 4294901760, %v4647_v54  ;;  %v4666_v3 = vand.u32 4294901760, %v21408_v27 }
 0x635   :  { %v21429_v4 = vsub.f32 %v4563_v32, %v21417_v36  ;;  %v4545_v7 = vmul.f32 %v21421_v12, %v21421_v12  ;;  %v4676_v52 = vand.u32 4294901760, %v21403_v48 }
 0x636   :  { %v21435_v15 = vsub.f32 %v4560_v57, %v21423_v29  ;;  %v4569_v26 = vsel %vm964_vm2, %v4546_v61, 0  ;;  %16638 = vmatprep.mubr.f32.mxu1 %v4648_v20  ;;  %v4667_v55 = vsub.f32 %v21408_v27, %v4666_v3 }
 0x637   :  { %v21441_v1 = vand.u32 4294901760, %v4569_v26  ;;  %v4566_v34 = vsel %vm964_vm2, %v4545_v7, 0  ;;  %16639 = vmatmul.mubr.f32.vlgmr.msra.gmra.mrb[16].mxu1 %v4658_v5  ;;  %v4677_v22 = vsub.f32 %v21403_v48, %v4676_v52  ;;  %v4696_v41 = vand.u32 4294901760, %v21429_v4 }
 0x638   :  { %v21448_v23 = vand.u32 4294901760, %v4566_v34  ;;  %18633 = vmatpush3.bf16.msra.mxu1 %v20513_v18  ;;  %v4668_v35 = vand.u32 4294901760, %v4667_v55  ;;  %v4686_v8 = vand.u32 4294901760, %v21435_v15 }
 0x639   :  { %v21453_v38 = vsub.f32 %v4569_v26, %v21441_v1  ;;  %v4678_v24 = vand.u32 4294901760, %v4677_v22  ;;  %18635 = vmatprep.subr.bf16.mxu1 %v20520_v58  ;;  %v4697_v19 = vsub.f32 %v21429_v4, %v4696_v41 }
 0x63a   :  { %v21460_v46 = vsub.f32 %v4566_v34, %v21448_v23  ;;  %16641 = vmatprep.mubr.f32.mxu1 %v4668_v35  ;;  %v4687_v18 = vsub.f32 %v21435_v15, %v4686_v8 }
 0x63b   :  { %16642 = vmatmul.mubr.f32.gmra.mrb[18].mxu1 %v4678_v24  ;;  %v4716_v17 = vand.u32 4294901760, %v21453_v38  ;;  %v4698_v32 = vand.u32 4294901760, %v4697_v19  ;;  %v6316_v24 = vld [vmem:[%s23366_s10] sm:$0xff]  ;;  %v6317_v19 = vld [vmem:[%s23366_s10 + $0x8] sm:$0xff] }
 0x63c   :  { %18637 = vmatpush3.bf16.msra.mxu1 %v20520_v58  ;;  %v4688_v43 = vand.u32 4294901760, %v4687_v18  ;;  %v4706_v47 = vand.u32 4294901760, %v21460_v46  ;;  %v5439_v58 = vld [vmem:[%s23365_s7] sm:$0xff] }
 0x63d   :  { %18639 = vmatprep.subr.bf16.mxu1 %v20522_v56  ;;  %v4717_v25 = vsub.f32 %v21453_v38, %v4716_v17 }
 0x63e   :  { %16644 = vmatprep.mubr.f32.mxu1 %v4688_v43  ;;  %v4707_v54 = vsub.f32 %v21460_v46, %v4706_v47  ;;  %v6324_v43 = vand.u32 4294901760, %v6316_v24 }
 0x63f   :  { %16645 = vmatmul.mubr.f32.gmra.mrb[20].mxu1 %v4698_v32  ;;  %v4718_v61 = vand.u32 4294901760, %v4717_v25 }
 0x640   :  { %18641 = vmatpush3.bf16.msra.mxu1 %v20522_v56  ;;  %v4708_v57 = vand.u32 4294901760, %v4707_v54 }
 0x641   :  { %18643 = vmatprep.subr.bf16.mxu1 %v20526_v40 }
 0x642   :  { %16647 = vmatprep.mubr.f32.mxu1 %v4708_v57 }
 0x643   :  { %16648 = vmatmul.mubr.f32.gmra.mrb[22].mxu1 %v4718_v61 }
 0x644   :  { %18645 = vmatpush3.bf16.msra.mxu1 %v20526_v40  ;;  %16666 = vmatprep.mubr.f32.mxu1 %v21371_v59  ;;  %v23539_v40 = vld [vmem:[#allocation16_spill] sm:$0xff] }
 0x645   :  { %18647 = vmatprep.subr.bf16.mxu1 %v20528_v11 }
 0x647   :  { %16667 = vmatmul.mubr.f32.vlgmr.msra.gmra.mrb[16].mxu1 %v21365_v44 }
 0x648   :  { %16669 = vmatprep.mubr.f32.mxu1 %v21394_v42  ;;  %18649 = vmatpush3.bf16.msra.mxu1 %v20528_v11  ;;  %v5443_v11 = vld [vmem:[%s23365_s7 + $0x20] sm:$0xff] }
 0x649   :  { %18651 = vmatprep.subr.bf16.mxu1 %v20530_v62 }
 0x64b   :  { %16670 = vmatmul.mubr.f32.gmra.mrb[18].mxu1 %v21388_v30 }
 0x64c   :  { %16672 = vmatprep.mubr.f32.mxu1 %v21423_v29  ;;  %18653 = vmatpush3.bf16.msra.mxu1 %v20530_v62  ;;  %v5444_v62 = vld [vmem:[%s23365_s7 + $0x28] sm:$0xff] }
 0x64d   :  { %18655 = vmatprep.subr.bf16.mxu1 %v20532_v0 }
 0x64f   :  { %16673 = vmatmul.mubr.f32.gmra.mrb[20].mxu1 %v21417_v36 }
 0x650   :  { %16675 = vmatprep.mubr.f32.mxu1 %v21448_v23  ;;  %18657 = vmatpush3.bf16.msra.mxu1 %v20532_v0  ;;  %v5491_v0 = vand.u32 4294901760, %v5443_v11 }
 0x651   :  { %18659 = vmatprep.subr.bf16.mxu1 %v20534_v63 }
 0x652   :  { %v21614_v55 = vsub.f32 %v5443_v11, %v5491_v0 }
 0x653   :  { %16676 = vmatmul.mubr.f32.gmra.mrb[22].mxu1 %v21441_v1 }
 0x654   :  { %18661 = vmatpush3.bf16.msra.mxu1 %v20534_v63  ;;  %16694 = vmatprep.mubr.f32.mxu1 %v21381_v9  ;;  %v5494_v63 = vand.u32 4294901760, %v5444_v62  ;;  %v5445_v9 = vld [vmem:[%s23365_s7 + $0x30] sm:$0xff] }
 0x655   :  { %18663 = vmatprep.subr.bf16.mxu1 %v20468_v28 }
 0x657   :  { %16695 = vmatmul.mubr.f32.vlgmr.msra.gmra.mrb[16].mxu1 %v21376_v33 }
 0x658   :  { %16697 = vmatprep.mubr.f32.mxu1 %v21408_v27  ;;  %18665 = vmatpush3.bf16.msra.mxu1 %v20468_v28 }
 0x659   :  { %18667 = vmatprep.subr.bf16.mxu1 %v20480_v51 }
 0x65b   :  { %16698 = vmatmul.mubr.f32.gmra.mrb[18].mxu1 %v21403_v48 }
 0x65c   :  { %16700 = vmatprep.mubr.f32.mxu1 %v21435_v15  ;;  %18669 = vmatpush3.bf16.msra.mxu1 %v20480_v51 }
 0x65d   :  { %18671 = vmatprep.subr.bf16.mxu1 %v20492_v60 }
 0x65f   :  { %16701 = vmatmul.mubr.f32.gmra.mrb[20].mxu1 %v21429_v4 }
 0x660   :  { %16703 = vmatprep.mubr.f32.mxu1 %v21460_v46  ;;  %18673 = vmatpush3.bf16.msra.mxu1 %v20492_v60 }
 0x661   :  { %18675 = vmatprep.subr.bf16.mxu1 %v20504_v2 }
 0x663   :  { %16704 = vmatmul.mubr.f32.gmra.mrb[22].mxu1 %v21453_v38 }
 0x664   :  { %18677 = vmatpush3.bf16.msra.mxu1 %v20504_v2  ;;  %16722 = vmatprep.mubr.f32.mxu1 %v4646_v37 }
 0x665   :  { %18679 = vmatprep.subr.bf16.mxu1 %v20510_v14 }
 0x667   :  { %16723 = vmatmul.mubr.f32.vlgmr.msra.gmra.mrb[16].mxu1 %v4656_v6  ;;  %v5446_v6 = vld [vmem:[%s23365_s7 + $0x38] sm:$0xff] }
 0x668   :  { %16725 = vmatprep.mubr.f32.mxu1 %v4666_v3  ;;  %18681 = vmatpush3.bf16.msra.mxu1 %v20510_v14  ;;  %v5442_v14 = vld [vmem:[%s23365_s7 + $0x18] sm:$0xff] }
 0x669   :  { %18683 = vmatprep.subr.bf16.mxu1 %v20515_v16  ;;  %v5488_v56 = vand.u32 4294901760, %v5442_v14 }
 0x66b   :  { %16726 = vmatmul.mubr.f32.gmra.mrb[18].mxu1 %v4676_v52  ;;  %v21603_v3 = vsub.f32 %v5442_v14, %v5488_v56 }
 0x66c   :  { %16728 = vmatprep.mubr.f32.mxu1 %v4686_v8  ;;  %18685 = vmatpush3.bf16.msra.mxu1 %v20515_v16  ;;  %v5440_v16 = vld [vmem:[%s23365_s7 + $0x8] sm:$0xff] }
 0x66d   :  { %18687 = vmatprep.subr.bf16.mxu1 %v20518_v45  ;;  %v5655_v52 = vand.u32 4294901760, %v21603_v3 }
 0x66f   :  { %16729 = vmatmul.mubr.f32.gmra.mrb[20].mxu1 %v4696_v41  ;;  %v5656_v34 = vsub.f32 %v21603_v3, %v5655_v52  ;;  %v5662_v41 = vand.u32 4294901760, %v21614_v55 }
 0x670   :  { %16731 = vmatprep.mubr.f32.mxu1 %v4706_v47  ;;  %18689 = vmatpush3.bf16.msra.mxu1 %v20518_v45  ;;  %v6327_v47 = vand.u32 4294901760, %v6317_v19 }
 0x671   :  { %18691 = vmatprep.subr.bf16.mxu1 %v20524_v13  ;;  %v5657_v35 = vand.u32 4294901760, %v5656_v34  ;;  %v5663_v8 = vsub.f32 %v21614_v55, %v5662_v41 }
 0x672   :  { %v21644_v61 = vpack.c.bf16 %v6327_v47, %v6324_v43 }
 0x673   :  { %16732 = vmatmul.mubr.f32.gmra.mrb[22].mxu1 %v4716_v17  ;;  %v5664_v32 = vand.u32 4294901760, %v5663_v8  ;;  %v23542_v8 = vld [vmem:[#allocation23_spill] sm:$0xff] }
 0x674   :  { %18693 = vmatpush3.bf16.msra.mxu1 %v20524_v13  ;;  %16750 = vmatprep.mubr.f32.mxu1 %v21371_v59 }
 0x675   :  { %18695 = vmatprep.subr.bf16.mxu1 %v20468_v28 }
 0x677   :  { %16751 = vmatmul.mubr.f32.vlgmr.msra.gmra.mrb[16].mxu1 %v21365_v44 }
 0x678   :  { %16753 = vmatprep.mubr.f32.mxu1 %v21394_v42  ;;  %18697 = vmatpush3.bf16.msra.mxu1 %v20468_v28  ;;  %v5479_v28 = vand.u32 4294901760, %v5439_v58 }
 0x679   :  { %18699 = vmatprep.subr.bf16.mxu1 %v20480_v51 }
 0x67b   :  { %16754 = vmatmul.mubr.f32.gmra.mrb[18].mxu1 %v21388_v30 }
 0x67c   :  { %16756 = vmatprep.mubr.f32.mxu1 %v21423_v29  ;;  %18701 = vmatpush3.bf16.msra.mxu1 %v20480_v51  ;;  %v5482_v51 = vand.u32 4294901760, %v5440_v16 }
 0x67d   :  { %18703 = vmatprep.subr.bf16.mxu1 %v20492_v60 }
 0x67e   :  { %v21581_v33 = vsub.f32 %v5440_v16, %v5482_v51 }
 0x67f   :  { %16757 = vmatmul.mubr.f32.gmra.mrb[20].mxu1 %v21417_v36 }
 0x680   :  { %16759 = vmatprep.mubr.f32.mxu1 %v21448_v23  ;;  %18705 = vmatpush3.bf16.msra.mxu1 %v20492_v60  ;;  %v21557_v60 = vpack.c.bf16 %v5482_v51, %v5479_v28  ;;  %v5641_v48 = vand.u32 4294901760, %v21581_v33 }
 0x681   :  { %18707 = vmatprep.subr.bf16.mxu1 %v20504_v2 }
 0x682   :  { %18711 = vmatprep.subr.bf16.mxu0 %v21557_v60 }
 0x683   :  { %16760 = vmatmul.mubr.f32.gmra.mrb[22].mxu1 %v21441_v1  ;;  %18713 = vmatpush3.bf16.msra.mxu0 %v21557_v60 }
 0x684   :  { %18709 = vmatpush3.bf16.msra.mxu1 %v20504_v2  ;;  %16778 = vmatprep.mubr.f32.mxu1 %v21371_v59  ;;  %v5441_v2 = vld [vmem:[%s23365_s7 + $0x10] sm:$0xff]  ;;  %v21579_v59 = vsub.f32 %v5439_v58, %v5479_v28  ;;  %v6319_v58 = vld [vmem:[%s23366_s10 + $0x18] sm:$0x3] }
 0x685   :  { %v5485_v45 = vand.u32 4294901760, %v5441_v2  ;;  %v6321_v14 = vsel %vm117_vm0, %v6319_v58, 0  ;;  %18807 = vmatprep.subr.bf16.mxu1 %v21644_v61 }
 0x686   :  { %v5634_v37 = vand.u32 4294901760, %v21579_v59 }
 0x687   :  { %16779 = vmatmul.mubr.f32.vlgmr.msra.gmra.mrb[16].mxu1 %v21365_v44  ;;  %v21567_v13 = vpack.c.bf16 %v5488_v56, %v5485_v45  ;;  %v21577_v44 = vpack.c.bf16 %v5494_v63, %v5491_v0  ;;  %v21601_v20 = vsub.f32 %v5441_v2, %v5485_v45  ;;  %v6318_v2 = vld [vmem:[%s23366_s10 + $0x10] sm:$0xff]  ;;  %v6333_v56 = vand.u32 4294901760, %v6321_v14 }
 0x688   :  { %16781 = vmatprep.mubr.f32.mxu1 %v21394_v42  ;;  %v5500_v42 = vand.u32 4294901760, %v5446_v6  ;;  %v6330_v45 = vand.u32 4294901760, %v6318_v2  ;;  %18809 = vmatpush3.bf16.msra.mxu1 %v21644_v61 }
 0x689   :  { %18715 = vmatprep.subr.bf16.mxu0 %v21567_v13  ;;  %v5648_v7 = vand.u32 4294901760, %v21601_v20 }
 0x68a   :  { %18717 = vmatpush3.bf16.msra.mxu0 %v21567_v13  ;;  %v21638_v18 = vsub.f32 %v5446_v6, %v5500_v42  ;;  %v21663_v0 = vpack.c.bf16 %v6333_v56, %v6330_v45  ;;  %v21671_v6 = vsub.f32 %v6317_v19, %v6327_v47  ;;  %v21687_v34 = vsub.f32 %v6318_v2, %v6330_v45  ;;  %v23543_v47 = vld [vmem:[#allocation26_spill] sm:$0xff]  ;;  %v23545_v45 = vld [vmem:[#allocation32_spill] sm:$0xff] }
 0x68b   :  { %16782 = vmatmul.mubr.f32.gmra.mrb[18].mxu1 %v21388_v30  ;;  %18719 = vmatprep.subr.bf16.mxu0 %v21577_v44  ;;  %v5497_v30 = vand.u32 4294901760, %v5445_v9  ;;  %v5649_v26 = vsub.f32 %v21601_v20, %v5648_v7 }
 0x68c   :  { %16784 = vmatprep.mubr.f32.mxu1 %v21423_v29  ;;  %v5642_v29 = vsub.f32 %v21581_v33, %v5641_v48  ;;  %v23454_v57 = vand.u32 4294901760, %v21638_v18  ;;  %18811 = vmatprep.subr.bf16.mxu1 %v21663_v0  ;;  %v6489_v19 = vand.u32 4294901760, %v21687_v34 }
 0x68d   :  { %v21593_v27 = vpack.c.bf16 %v5500_v42, %v5497_v30  ;;  %v5650_v22 = vand.u32 4294901760, %v5649_v26  ;;  %v21636_v46 = vsub.f32 %v5445_v9, %v5497_v30  ;;  %18813 = vmatpush3.bf16.msra.mxu1 %v21663_v0  ;;  %v21669_v9 = vsub.f32 %v6316_v24, %v6324_v43  ;;  %v23540_v42 = vld [vmem:[#allocation19_spill] sm:$0xff] }
 0x68e   :  { %18721 = vmatpush3.bf16.msra.mxu0 %v21577_v44  ;;  %v5643_v4 = vand.u32 4294901760, %v5642_v29  ;;  %v5684_v51 = vsub.f32 %v21638_v18, %v23454_v57  ;;  %v21675_v30 = vpack.c.bf16 %v21581_v33, %v21579_v59  ;;  %v23452_v29 = vand.u32 4294901760, %v21671_v6  ;;  %v23557_v57 = vld [vmem:[#allocation9_spill] sm:$0xff] }
 0x68f   :  { %16785 = vmatmul.mubr.f32.gmra.mrb[20].mxu1 %v21417_v36  ;;  %v5635_v36 = vsub.f32 %v21579_v59, %v5634_v37  ;;  %18723 = vmatprep.subr.bf16.mxu0 %v21593_v27  ;;  %v21640_v17 = vpack.c.bf16 %v5657_v35, %v5650_v22  ;;  %v5676_v54 = vand.u32 4294901760, %v21636_v46  ;;  %v21689_v22 = vsub.f32 %v6321_v14, %v6333_v56  ;;  %v23559_v59 = vld [vmem:[#allocation17_spill] sm:$0xff] }
 0x690   :  { %16787 = vmatprep.mubr.f32.mxu1 %v21448_v23  ;;  %v6483_v26 = vsub.f32 %v21671_v6, %v23452_v29  ;;  %v21693_v35 = vpack.c.bf16 %v21603_v3, %v21601_v20  ;;  %v23555_v29 = vld [vmem:[#allocation4_spill] sm:$0xff]  ;;  %v23562_v20 = vand.u32 4294901760, %v21638_v18 }
 0x691   :  { %v5636_v5 = vand.u32 4294901760, %v5635_v36  ;;  %v5677_v28 = vsub.f32 %v21636_v46, %v5676_v54  ;;  %v23453_v36 = vand.u32 4294901760, %v21669_v9  ;;  %v6496_v43 = vand.u32 4294901760, %v21689_v22 }
 0x692   :  { %18725 = vmatpush3.bf16.msra.mxu0 %v21593_v27  ;;  %v6484_v24 = vand.u32 4294901760, %v6483_v26  ;;  %v23548_v26 = vld [vmem:[#allocation3_spill] sm:$0xff]  ;;  %v21757_v3 = vpack.c.bf16 %v23562_v20, %v5676_v54  ;;  %v23572_v54 = vld [vmem:[#allocation30_spill] sm:$0xff] }
 0x693   :  { %16788 = vmatmul.mubr.f32.gmra.mrb[22].mxu1 %v21441_v1  ;;  %v21609_v15 = vpack.c.bf16 %v5643_v4, %v5636_v5  ;;  %v21616_v1 = vsub.f32 %v5444_v62, %v5494_v63  ;;  %v5678_v11 = vand.u32 4294901760, %v5677_v28  ;;  %v5685_v62 = vand.u32 4294901760, %v5684_v51  ;;  %v23541_v5 = vld [vmem:[#allocation20_spill] sm:$0xff] }
 0x694   :  { %16966 = vmatprep.mubr.f32.mxu1 %v23539_v40  ;;  %v6476_v4 = vsub.f32 %v21669_v9, %v23453_v36  ;;  %v6497_v58 = vsub.f32 %v21689_v22, %v6496_v43  ;;  %v23544_v51 = vld [vmem:[#allocation28_spill] sm:$0xff]  ;;  %v21730_v36 = vpack.c.bf16 %v5641_v48, %v5634_v37  ;;  %v23560_v37 = vld [vmem:[#allocation18_spill] sm:$0xff]  ;;  %v23561_v48 = vld [vmem:[#allocation27_spill] sm:$0xff]  ;;  %v18842_v20 = vpack.c.bf16 %v6496_v43, %v6489_v19 }
 0x695   :  { %18727 = vmatprep.subr.bf16.mxu0 %v21609_v15  ;;  %v5669_v23 = vand.u32 4294901760, %v21616_v1  ;;  %v21665_v63 = vpack.c.bf16 %v5685_v62, %v5678_v11  ;;  %v21703_v28 = vpack.c.bf16 %v21616_v1, %v21614_v55  ;;  %v21709_v11 = vpack.c.bf16 %v21638_v18, %v21636_v46  ;;  %v23546_v62 = vld [vmem:[#allocation33_spill] sm:$0xff]  ;;  %v23566_v55 = vld [vmem:[#allocation12_spill] sm:$0xff]  ;;  %v23571_v18 = vld [vmem:[#allocation22_spill] sm:$0xff] }
 0x696   :  { %v6498_v14 = vand.u32 4294901760, %v6497_v58  ;;  %v23552_v58 = vld [vmem:[#allocation14_spill] sm:$0xff]  ;;  %v23570_v46 = vand.u32 4294901760, %v21671_v6 }
 0x697   :  { %v5670_v38 = vsub.f32 %v21616_v1, %v5669_v23  ;;  %16967 = vmatmul.mubr.f32.vlgmr.msra.gmra.mrb[24].mxu1 %v23540_v42  ;;  %v21749_v33 = vpack.c.bf16 %v5669_v23, %v5662_v41  ;;  %v23567_v1 = vld [vmem:[#allocation15_spill] sm:$0xff]  ;;  %v23568_v41 = vld [vmem:[#allocation21_spill] sm:$0xff]  ;;  %v23569_v23 = vand.u32 4294901760, %v21669_v9 }
 0x698   :  { %16969 = vmatprep.mubr.f32.mxu1 %v23541_v5 }
 0x699   :  { %v5671_v25 = vand.u32 4294901760, %v5670_v38  ;;  %v6477_v38 = vand.u32 4294901760, %v6476_v4  ;;  %v23547_v4 = vld [vmem:[#allocation2_spill] sm:$0xff] }
 0x69b   :  { %v21649_v16 = vpack.c.bf16 %v5671_v25, %v5664_v32  ;;  %16970 = vmatmul.mubr.f32.gmra.mrb[26].mxu1 %v23542_v8  ;;  %v18814_v32 = vpack.c.bf16 %v6484_v24, %v6477_v38  ;;  %v6490_v25 = vsub.f32 %v21687_v34, %v6489_v19  ;;  %v23549_v38 = vld [vmem:[#allocation5_spill] sm:$0xff]  ;;  %v23550_v24 = vld [vmem:[#allocation7_spill] sm:$0xff] }
 0x69c   :  { %16972 = vmatprep.mubr.f32.mxu1 %v23543_v47 }
 0x69d   :  { %18815 = vmatprep.subr.bf16.mxu1 %v18814_v32  ;;  %v6491_v2 = vand.u32 4294901760, %v6490_v25  ;;  %v18822_v25 = vpack.c.bf16 %v21671_v6, %v21669_v9 }
 0x69e   :  { %18817 = vmatpush3.bf16.msra.mxu1 %v18814_v32  ;;  %v23551_v32 = vld [vmem:[#allocation13_spill] sm:$0xff] }
 0x69f   :  { %16973 = vmatmul.mubr.f32.gmra.mrb[28].mxu1 %v23544_v51  ;;  %v18818_v56 = vpack.c.bf16 %v6498_v14, %v6491_v2  ;;  %v23553_v2 = vld [vmem:[#allocation24_spill] sm:$0xff]  ;;  %v18826_v14 = vpack.c.bf16 %v21689_v22, %v21687_v34  ;;  %v21740_v34 = vpack.c.bf16 %v5655_v52, %v5648_v7  ;;  %v23558_v22 = vld [vmem:[#allocation11_spill] sm:$0xff]  ;;  %v23563_v7 = vld [vmem:[#allocation29_spill] sm:$0xff] }
 0x6a0   :  { %16975 = vmatprep.mubr.f32.mxu1 %v23545_v45  ;;  %v23564_v52 = vld [vmem:[#allocation8_spill] sm:$0xff] }
 0x6a1   :  { %18819 = vmatprep.subr.bf16.mxu1 %v18818_v56 }
 0x6a2   :  { %18821 = vmatpush3.bf16.msra.mxu1 %v18818_v56  ;;  %v23554_v56 = vld [vmem:[#allocation25_spill] sm:$0xff] }
 0x6a3   :  { %16976 = vmatmul.mubr.f32.gmra.mrb[30].mxu1 %v23546_v62  ;;  %18823 = vmatprep.subr.bf16.mxu1 %v18822_v25 }
 0x6a4   :  { %16986 = vmatprep.mubr.f32.mxu1 %v23547_v4 }
 0x6a7   :  { %16987 = vmatmul.mubr.f32.vlgmr.msra.gmra.mrb[24].mxu1 %v23548_v26 }
 0x6a8   :  { %16989 = vmatprep.mubr.f32.mxu1 %v23549_v38  ;;  %18825 = vmatpush3.bf16.msra.mxu1 %v18822_v25  ;;  %v23556_v25 = vld [vmem:[#allocation6_spill] sm:$0xff] }
 0x6a9   :  { %18827 = vmatprep.subr.bf16.mxu1 %v18826_v14 }
 0x6ab   :  { %16990 = vmatmul.mubr.f32.gmra.mrb[26].mxu1 %v23550_v24 }
 0x6ac   :  { %16992 = vmatprep.mubr.f32.mxu1 %v23551_v32  ;;  %18829 = vmatpush3.bf16.msra.mxu1 %v18826_v14  ;;  %v23565_v14 = vld [vmem:[#allocation10_spill] sm:$0xff] }
 0x6ad   :  { %18831 = vmatprep.subr.bf16.mxu1 %v21644_v61 }
 0x6af   :  { %16993 = vmatmul.mubr.f32.gmra.mrb[28].mxu1 %v23552_v58 }
 0x6b0   :  { %16995 = vmatprep.mubr.f32.mxu1 %v23553_v2 }
 0x6b3   :  { %16996 = vmatmul.mubr.f32.gmra.mrb[30].mxu1 %v23554_v56 }
 0x6b4   :  { %17006 = vmatprep.mubr.f32.mxu1 %v23555_v29 }
 0x6b7   :  { %17007 = vmatmul.mubr.f32.vlgmr.msra.gmra.mrb[24].mxu1 %v23556_v25 }
 0x6b8   :  { %17009 = vmatprep.mubr.f32.mxu1 %v23557_v57  ;;  %18833 = vmatpush3.bf16.msra.mxu1 %v21644_v61 }
 0x6b9   :  { %18835 = vmatprep.subr.bf16.mxu1 %v21663_v0 }
 0x6bb   :  { %17010 = vmatmul.mubr.f32.gmra.mrb[26].mxu1 %v23558_v22 }
 0x6bc   :  { %17012 = vmatprep.mubr.f32.mxu1 %v23559_v59  ;;  %18837 = vmatpush3.bf16.msra.mxu1 %v21663_v0 }
 0x6bf   :  { %17013 = vmatmul.mubr.f32.gmra.mrb[28].mxu1 %v23560_v37 }
 0x6c0   :  { %17015 = vmatprep.mubr.f32.mxu1 %v23561_v48  ;;  %v18838_v48 = vpack.c.bf16 %v23570_v46, %v23569_v23 }
 0x6c2   :  { %18839 = vmatprep.subr.bf16.mxu1 %v18838_v48 }
 0x6c3   :  { %17016 = vmatmul.mubr.f32.gmra.mrb[30].mxu1 %v23563_v7 }
 0x6c4   :  { %17026 = vmatprep.mubr.f32.mxu1 %v23564_v52  ;;  %v23573_v52 = vld [vmem:[#allocation31_spill] sm:$0xff] }
 0x6c7   :  { %17027 = vmatmul.mubr.f32.vlgmr.msra.gmra.mrb[24].mxu1 %v23565_v14 }
 0x6c8   :  { %17029 = vmatprep.mubr.f32.mxu1 %v23566_v55  ;;  %18841 = vmatpush3.bf16.msra.mxu1 %v18838_v48 }
 0x6c9   :  { %18843 = vmatprep.subr.bf16.mxu1 %v18842_v20 }
 0x6cb   :  { %17030 = vmatmul.mubr.f32.gmra.mrb[26].mxu1 %v23567_v1 }
 0x6cc   :  { %17032 = vmatprep.mubr.f32.mxu1 %v23568_v41  ;;  %18845 = vmatpush3.bf16.msra.mxu1 %v18842_v20 }
 0x6cd   :  { %18847 = vmatprep.subr.bf16.mxu1 %v21644_v61 }
 0x6cf   :  { %17033 = vmatmul.mubr.f32.gmra.mrb[28].mxu1 %v23571_v18 }
 0x6d0   :  { %17035 = vmatprep.mubr.f32.mxu1 %v23572_v54 }
 0x6d3   :  { %17036 = vmatmul.mubr.f32.gmra.mrb[30].mxu1 %v23573_v52 }
 0x6d4   :  { %17046 = vmatprep.mubr.f32.mxu1 %v23547_v4 }
 0x6d7   :  { %17047 = vmatmul.mubr.f32.vlgmr.msra.gmra.mrb[24].mxu1 %v23548_v26 }
 0x6d8   :  { %17049 = vmatprep.mubr.f32.mxu1 %v23549_v38  ;;  %18849 = vmatpush3.bf16.msra.mxu1 %v21644_v61 }
 0x6d9   :  { %18851 = vmatprep.subr.bf16.mxu1 %v21663_v0 }
 0x6db   :  { %17050 = vmatmul.mubr.f32.gmra.mrb[26].mxu1 %v23550_v24 }
 0x6dc   :  { %17052 = vmatprep.mubr.f32.mxu1 %v23551_v32  ;;  %18853 = vmatpush3.bf16.msra.mxu1 %v21663_v0 }
 0x6df   :  { %17053 = vmatmul.mubr.f32.gmra.mrb[28].mxu1 %v23552_v58 }
 0x6e0   :  { %17055 = vmatprep.mubr.f32.mxu1 %v23553_v2 }
 0x6e3   :  { %17056 = vmatmul.mubr.f32.gmra.mrb[30].mxu1 %v23554_v56 }
 0x6e4   :  { %17066 = vmatprep.mubr.f32.mxu1 %v23547_v4 }
 0x6e7   :  { %17067 = vmatmul.mubr.f32.vlgmr.msra.gmra.mrb[24].mxu1 %v23548_v26 }
 0x6e8   :  { %17069 = vmatprep.mubr.f32.mxu1 %v23549_v38 }
 0x6eb   :  { %17070 = vmatmul.mubr.f32.gmra.mrb[26].mxu1 %v23550_v24 }
 0x6ec   :  { %17072 = vmatprep.mubr.f32.mxu1 %v23551_v32 }
 0x6ef   :  { %17073 = vmatmul.mubr.f32.gmra.mrb[28].mxu1 %v23552_v58 }
 0x6f0   :  { %17075 = vmatprep.mubr.f32.mxu1 %v23553_v2 }
 0x6f3   :  { %17076 = vmatmul.mubr.f32.gmra.mrb[30].mxu1 %v23554_v56 }
 0x75a   :  { %v16780_v9 = vpop.f32.mrb[16].mxu1 }
 0x75b   :  { %v19324_v61 = vadd.f32 1e-05, %v16780_v9  ;;  %v5363_v6 = vpop.f32.mrb[17].mxu1 }
 0x75c   :  { %v19325_v19 = vadd.f32 1e-05, %v5363_v6 }
 0x75d   :  { %20108 = vrsqrt.f32 %v19324_v61 }
 0x75e   :  { %20110 = vrsqrt.f32 %v19325_v19  ;;  %v16783_v43 = vpop.f32.mrb[18].mxu1 }
 0x75f   :  { %v19326_v0 = vadd.f32 1e-05, %v16783_v43  ;;  %v5375_v48 = vpop.f32.mrb[19].mxu1  ;;  %v14448_v43 = vld [vmem:[%s23367_s6] ss:$0 sm:$0xff] }
 0x760   :  { %v19327_v23 = vadd.f32 1e-05, %v5375_v48 }
 0x761   :  { %20112 = vrsqrt.f32 %v19326_v0 }
 0x762   :  { %20114 = vrsqrt.f32 %v19327_v23  ;;  %v16786_v46 = vpop.f32.mrb[20].mxu1 }
 0x763   :  { %v19328_v20 = vadd.f32 1e-05, %v16786_v46  ;;  %v5387_v9 = vpop.f32.mrb[21].mxu1 }
 0x764   :  { %v19329_v6 = vadd.f32 1e-05, %v5387_v9 }
 0x765   :  { %20116 = vrsqrt.f32 %v19328_v20 }
 0x766   :  { %20118 = vrsqrt.f32 %v19329_v6  ;;  %v16789_v61 = vpop.f32.mrb[22].mxu1 }
 0x767   :  { %v20109_v19 = vpop.eup %20108  ;;  %v19330_v0 = vadd.f32 1e-05, %v16789_v61  ;;  %v5399_v48 = vpop.f32.mrb[23].mxu1 }
 0x768   :  { %v20111_v23 = vpop.eup %20110  ;;  %v5418_v52 = vmul.f32 %v20109_v19, %v21352_v39  ;;  %v19331_v46 = vadd.f32 1e-05, %v5399_v48 }
 0x769   :  { %v5417_v54 = vmul.f32 %v20111_v23, %v21355_v49  ;;  %20120 = vrsqrt.f32 %v19330_v0 }
 0x76a   :  { %v5432_v9 = vmul.f32 %v14448_v43, %v5418_v52  ;;  %20122 = vrsqrt.f32 %v19331_v46 }
 0x76b   :  { %v20113_v20 = vpop.eup %20112  ;;  %v5431_v6 = vmul.f32 %v14448_v43, %v5417_v54 }
 0x76c   :  { %v20115_v18 = vpop.eup %20114  ;;  %v5458_v41 = vsel %vm964_vm2, %v5432_v9, 0  ;;  %v5420_v1 = vmul.f32 %v20113_v20, %v21363_v10 }
 0x76d   :  { %v21799_v55 = vand.u32 4294901760, %v5458_v41  ;;  %v5419_v61 = vmul.f32 %v20115_v18, %v21369_v50  ;;  %v5455_v14 = vsel %vm964_vm2, %v5431_v6, 0 }
 0x76e   :  { %v21803_v39 = vand.u32 4294901760, %v5455_v14  ;;  %v5434_v19 = vmul.f32 %v14448_v43, %v5420_v1 }
 0x76f   :  { %v20117_v49 = vpop.eup %20116  ;;  %v21806_v52 = vsub.f32 %v5458_v41, %v21799_v55  ;;  %v5433_v0 = vmul.f32 %v14448_v43, %v5419_v61 }
 0x770   :  { %v20119_v54 = vpop.eup %20118  ;;  %v5422_v48 = vmul.f32 %v20117_v49, %v21385_v21  ;;  %v21810_v23 = vsub.f32 %v5455_v14, %v21803_v39  ;;  %v5464_v10 = vsel %vm964_vm2, %v5434_v19, 0 }
 0x771   :  { %v5421_v50 = vmul.f32 %v20119_v54, %v21392_v31  ;;  %v23455_v18 = vand.u32 4294901760, %v21806_v52  ;;  %v5461_v46 = vsel %vm964_vm2, %v5433_v0, 0  ;;  %v21816_v1 = vand.u32 4294901760, %v5464_v10 }
 0x772   :  { %v23456_v41 = vand.u32 4294901760, %v21810_v23  ;;  %v21819_v9 = vand.u32 4294901760, %v5461_v46  ;;  %v5436_v20 = vmul.f32 %v14448_v43, %v5422_v48 }
 0x773   :  { %v20121_v6 = vpop.eup %20120  ;;  %v5564_v21 = vsub.f32 %v21806_v52, %v23455_v18  ;;  %v21825_v14 = vsub.f32 %v5464_v10, %v21816_v1  ;;  %v5435_v31 = vmul.f32 %v14448_v43, %v5421_v50 }
 0x774   :  { %v20123_v61 = vpop.eup %20122  ;;  %v5424_v19 = vmul.f32 %v20121_v6, %v21412_v53  ;;  %v5554_v49 = vsub.f32 %v21810_v23, %v23456_v41  ;;  %v21832_v0 = vsub.f32 %v5461_v46, %v21819_v9  ;;  %v5470_v54 = vsel %vm964_vm2, %v5436_v20, 0 }
 0x775   :  { %v5423_v48 = vmul.f32 %v20123_v61, %v21421_v12  ;;  %v23457_v18 = vand.u32 4294901760, %v21825_v14  ;;  %v5467_v10 = vsel %vm964_vm2, %v5435_v31, 0  ;;  %v21841_v53 = vand.u32 4294901760, %v5470_v54 }
 0x776   :  { %v5555_v7 = vand.u32 4294901760, %v5554_v49  ;;  %v5573_v50 = vand.u32 4294901760, %v21832_v0  ;;  %v21839_v37 = vand.u32 4294901760, %v5467_v10  ;;  %v5565_v6 = vand.u32 4294901760, %v5564_v21 }
 0x777   :  { %v5584_v46 = vsub.f32 %v21825_v14, %v23457_v18  ;;  %v5437_v41 = vmul.f32 %v14448_v43, %v5423_v48  ;;  %v5438_v20 = vmul.f32 %v14448_v43, %v5424_v19  ;;  %v21853_v61 = vsub.f32 %v5470_v54, %v21841_v53 }
 0x778   :  { %16806 = vmatprep.mubr.f32.mxu0 %v5555_v7  ;;  %v5574_v12 = vsub.f32 %v21832_v0, %v5573_v50  ;;  %v21850_v31 = vsub.f32 %v5467_v10, %v21839_v37 }
 0x779   :  { %16807 = vmatmul.mubr.f32.vlgmr.msra.gmra.mrb[32].mxu0 %v5565_v6  ;;  %v5473_v21 = vsel %vm964_vm2, %v5437_v41, 0  ;;  %v5476_v49 = vsel %vm964_vm2, %v5438_v20, 0  ;;  %v23458_v43 = vand.u32 4294901760, %v21853_v61  ;;  %v5585_v18 = vand.u32 4294901760, %v5584_v46 }
 0x77a   :  { %18729 = vmatpush3.bf16.msra.mxu0 %v21609_v15  ;;  %v5575_v48 = vand.u32 4294901760, %v5574_v12  ;;  %v5593_v7 = vand.u32 4294901760, %v21850_v31  ;;  %v21860_v19 = vand.u32 4294901760, %v5473_v21  ;;  %v21863_v10 = vand.u32 4294901760, %v5476_v49 }
 0x77b   :  { %18731 = vmatprep.subr.bf16.mxu0 %v21640_v17  ;;  %v5604_v15 = vsub.f32 %v21853_v61, %v23458_v43 }
 0x77c   :  { %16809 = vmatprep.mubr.f32.mxu0 %v5575_v48  ;;  %v5594_v41 = vsub.f32 %v21850_v31, %v5593_v7  ;;  %v21872_v54 = vsub.f32 %v5473_v21, %v21860_v19  ;;  %v21875_v6 = vsub.f32 %v5476_v49, %v21863_v10 }
 0x77d   :  { %16810 = vmatmul.mubr.f32.gmra.mrb[34].mxu0 %v5585_v18  ;;  %v5605_v12 = vand.u32 4294901760, %v5604_v15 }
 0x77e   :  { %18733 = vmatpush3.bf16.msra.mxu0 %v21640_v17  ;;  %v5595_v46 = vand.u32 4294901760, %v5594_v41  ;;  %v5613_v20 = vand.u32 4294901760, %v21872_v54  ;;  %v5623_v48 = vand.u32 4294901760, %v21875_v6  ;;  %v23574_v17 = vand.u32 4294901760, %v21810_v23 }
 0x77f   :  { %18735 = vmatprep.subr.bf16.mxu0 %v21649_v16 }
 0x780   :  { %16812 = vmatprep.mubr.f32.mxu0 %v5595_v46  ;;  %v5614_v43 = vsub.f32 %v21872_v54, %v5613_v20  ;;  %v5624_v21 = vsub.f32 %v21875_v6, %v5623_v48 }
 0x781   :  { %16813 = vmatmul.mubr.f32.gmra.mrb[36].mxu0 %v5605_v12  ;;  %v23580_v12 = vld [vmem:[#allocation29_spill] sm:$0xff] }
 0x782   :  { %18737 = vmatpush3.bf16.msra.mxu0 %v21649_v16  ;;  %v5615_v18 = vand.u32 4294901760, %v5614_v43  ;;  %v5625_v49 = vand.u32 4294901760, %v5624_v21  ;;  %v23575_v16 = vand.u32 4294901760, %v21806_v52 }
 0x783   :  { %18739 = vmatprep.subr.bf16.mxu0 %v21665_v63 }
 0x784   :  { %16815 = vmatprep.mubr.f32.mxu0 %v5615_v18  ;;  %v23582_v18 = vld [vmem:[#allocation10_spill] sm:$0xff] }
 0x785   :  { %16816 = vmatmul.mubr.f32.gmra.mrb[38].mxu0 %v5625_v49  ;;  %v23583_v49 = vld [vmem:[#allocation12_spill] sm:$0xff] }
 0x786   :  { %18741 = vmatpush3.bf16.msra.mxu0 %v21665_v63  ;;  %16834 = vmatprep.mubr.f32.mxu0 %v21803_v39  ;;  %v23576_v63 = vand.u32 4294901760, %v21825_v14 }
 0x787   :  { %18743 = vmatprep.subr.bf16.mxu0 %v21675_v30 }
 0x789   :  { %16835 = vmatmul.mubr.f32.vlgmr.msra.gmra.mrb[32].mxu0 %v21799_v55 }
 0x78a   :  { %16837 = vmatprep.mubr.f32.mxu0 %v21819_v9  ;;  %18745 = vmatpush3.bf16.msra.mxu0 %v21675_v30  ;;  %v23577_v30 = vand.u32 4294901760, %v21853_v61 }
 0x78b   :  { %18747 = vmatprep.subr.bf16.mxu0 %v21693_v35 }
 0x78d   :  { %16838 = vmatmul.mubr.f32.gmra.mrb[34].mxu0 %v21816_v1 }
 0x78e   :  { %16840 = vmatprep.mubr.f32.mxu0 %v21839_v37  ;;  %18749 = vmatpush3.bf16.msra.mxu0 %v21693_v35  ;;  %v7110_v35 = vld [vmem:[%s23368_s11 + $0x8] sm:$0xff] }
 0x78f   :  { %18751 = vmatprep.subr.bf16.mxu0 %v21703_v28 }
 0x791   :  { %16841 = vmatmul.mubr.f32.gmra.mrb[36].mxu0 %v21841_v53 }
 0x792   :  { %16843 = vmatprep.mubr.f32.mxu0 %v21860_v19  ;;  %18753 = vmatpush3.bf16.msra.mxu0 %v21703_v28 }
 0x793   :  { %18755 = vmatprep.subr.bf16.mxu0 %v21709_v11 }
 0x795   :  { %16844 = vmatmul.mubr.f32.gmra.mrb[38].mxu0 %v21863_v10 }
 0x796   :  { %18757 = vmatpush3.bf16.msra.mxu0 %v21709_v11  ;;  %16862 = vmatprep.mubr.f32.mxu0 %v21810_v23  ;;  %v7120_v11 = vand.u32 4294901760, %v7110_v35 }
 0x797   :  { %18759 = vmatprep.subr.bf16.mxu0 %v21557_v60 }
 0x799   :  { %16863 = vmatmul.mubr.f32.vlgmr.msra.gmra.mrb[32].mxu0 %v21806_v52 }
 0x79a   :  { %16865 = vmatprep.mubr.f32.mxu0 %v21832_v0  ;;  %18761 = vmatpush3.bf16.msra.mxu0 %v21557_v60 }
 0x79b   :  { %18763 = vmatprep.subr.bf16.mxu0 %v21567_v13 }
 0x79d   :  { %16866 = vmatmul.mubr.f32.gmra.mrb[34].mxu0 %v21825_v14 }
 0x79e   :  { %16868 = vmatprep.mubr.f32.mxu0 %v21850_v31  ;;  %18765 = vmatpush3.bf16.msra.mxu0 %v21567_v13 }
 0x79f   :  { %18767 = vmatprep.subr.bf16.mxu0 %v21577_v44 }
 0x7a1   :  { %16869 = vmatmul.mubr.f32.gmra.mrb[36].mxu0 %v21853_v61 }
 0x7a2   :  { %16871 = vmatprep.mubr.f32.mxu0 %v21872_v54  ;;  %18769 = vmatpush3.bf16.msra.mxu0 %v21577_v44 }
 0x7a3   :  { %18771 = vmatprep.subr.bf16.mxu0 %v21593_v27 }
 0x7a5   :  { %16872 = vmatmul.mubr.f32.gmra.mrb[38].mxu0 %v21875_v6 }
 0x7a6   :  { %18773 = vmatpush3.bf16.msra.mxu0 %v21593_v27  ;;  %16890 = vmatprep.mubr.f32.mxu0 %v23574_v17  ;;  %v23584_v17 = vld [vmem:[#allocation15_spill] sm:$0xff] }
 0x7a7   :  { %18775 = vmatprep.subr.bf16.mxu0 %v21730_v36 }
 0x7a9   :  { %16891 = vmatmul.mubr.f32.vlgmr.msra.gmra.mrb[32].mxu0 %v23575_v16  ;;  %v23585_v16 = vld [vmem:[#allocation21_spill] sm:$0xff] }
 0x7aa   :  { %16893 = vmatprep.mubr.f32.mxu0 %v5573_v50  ;;  %18777 = vmatpush3.bf16.msra.mxu0 %v21730_v36  ;;  %v7109_v36 = vld [vmem:[%s23368_s11] sm:$0xff] }
 0x7ab   :  { %18779 = vmatprep.subr.bf16.mxu0 %v21740_v34  ;;  %v7117_v28 = vand.u32 4294901760, %v7109_v36 }
 0x7ad   :  { %16894 = vmatmul.mubr.f32.gmra.mrb[34].mxu0 %v23576_v63  ;;  %v21971_v50 = vpack.c.bf16 %v7120_v11, %v7117_v28  ;;  %v23586_v63 = vld [vmem:[#allocation22_spill] sm:$0xff] }
 0x7ae   :  { %16896 = vmatprep.mubr.f32.mxu0 %v5593_v7  ;;  %18781 = vmatpush3.bf16.msra.mxu0 %v21740_v34  ;;  %v21950_v34 = vsub.f32 %v7109_v36, %v7117_v28  ;;  %v23588_v36 = vld [vmem:[#allocation31_spill] sm:$0xff] }
 0x7af   :  { %18783 = vmatprep.subr.bf16.mxu0 %v21749_v33 }
 0x7b0   :  { %v7268_v23 = vand.u32 4294901760, %v21950_v34 }
 0x7b1   :  { %16897 = vmatmul.mubr.f32.gmra.mrb[36].mxu0 %v23577_v30  ;;  %v23587_v30 = vld [vmem:[#allocation30_spill] sm:$0xff] }
 0x7b2   :  { %16899 = vmatprep.mubr.f32.mxu0 %v5613_v20  ;;  %18785 = vmatpush3.bf16.msra.mxu0 %v21749_v33  ;;  %v21952_v33 = vsub.f32 %v7110_v35, %v7120_v11  ;;  %v7269_v31 = vsub.f32 %v21950_v34, %v7268_v23 }
 0x7b3   :  { %18787 = vmatprep.subr.bf16.mxu0 %v21757_v3 }
 0x7b4   :  { %v7275_v14 = vand.u32 4294901760, %v21952_v33  ;;  %v7270_v7 = vand.u32 4294901760, %v7269_v31  ;;  %v7912_v31 = vld [vmem:[%s23369_s16 + $0x10] sm:$0xff] }
 0x7b5   :  { %16900 = vmatmul.mubr.f32.gmra.mrb[38].mxu0 %v5623_v48  ;;  %v23581_v48 = vld [vmem:[#allocation8_spill] sm:$0xff] }
 0x7b6   :  { %18789 = vmatpush3.bf16.msra.mxu0 %v21757_v3  ;;  %16918 = vmatprep.mubr.f32.mxu0 %v21803_v39  ;;  %v7112_v3 = vld [vmem:[%s23368_s11 + $0x18] sm:$0x3]  ;;  %v7276_v61 = vsub.f32 %v21952_v33, %v7275_v14 }
 0x7b7   :  { %18791 = vmatprep.subr.bf16.mxu0 %v21557_v60  ;;  %v7114_v52 = vsel %vm117_vm0, %v7112_v3, 0 }
 0x7b8   :  { %v7277_v43 = vand.u32 4294901760, %v7276_v61  ;;  %v7913_v61 = vld [vmem:[%s23369_s16 + $0x18] sm:$0xff] }
 0x7b9   :  { %16919 = vmatmul.mubr.f32.vlgmr.msra.gmra.mrb[32].mxu0 %v21799_v55 }
 0x7ba   :  { %16921 = vmatprep.mubr.f32.mxu0 %v21819_v9  ;;  %18793 = vmatpush3.bf16.msra.mxu0 %v21557_v60  ;;  %v7111_v60 = vld [vmem:[%s23368_s11 + $0x10] sm:$0xff]  ;;  %v18862_v54 = vpack.c.bf16 %v7277_v43, %v7270_v7  ;;  %v22053_v35 = vpop.f32.mrb[24].mxu1  ;;  %v7954_v7 = vand.u32 4294901760, %v7913_v61 }
 0x7bb   :  { %18795 = vmatprep.subr.bf16.mxu0 %v21567_v13  ;;  %v7123_v0 = vand.u32 4294901760, %v7111_v60  ;;  %v22056_v28 = vpop.f32.mrb[25].mxu1 }
 0x7bd   :  { %16922 = vmatmul.mubr.f32.gmra.mrb[34].mxu0 %v21816_v1  ;;  %v7281_v41 = vsub.f32 %v7111_v60, %v7123_v0 }
 0x7be   :  { %16924 = vmatprep.mubr.f32.mxu0 %v21839_v37  ;;  %18797 = vmatpush3.bf16.msra.mxu0 %v21567_v13  ;;  %v7126_v13 = vand.u32 4294901760, %v7114_v52  ;;  %v22059_v11 = vpop.f32.mrb[26].mxu1 }
 0x7bf   :  { %18799 = vmatprep.subr.bf16.mxu0 %v21577_v44 }
 0x7c0   :  { %v7288_v15 = vsub.f32 %v7114_v52, %v7126_v13 }
 0x7c1   :  { %16925 = vmatmul.mubr.f32.gmra.mrb[36].mxu0 %v21841_v53 }
 0x7c2   :  { %16927 = vmatprep.mubr.f32.mxu0 %v21860_v19  ;;  %18801 = vmatpush3.bf16.msra.mxu0 %v21577_v44  ;;  %v21982_v44 = vpack.c.bf16 %v7126_v13, %v7123_v0  ;;  %v7289_v6 = vand.u32 4294901760, %v7288_v15 }
 0x7c3   :  { %18803 = vmatprep.subr.bf16.mxu0 %v21593_v27 }
 0x7c4   :  { %v7290_v46 = vsub.f32 %v7288_v15, %v7289_v6 }
 0x7c5   :  { %16928 = vmatmul.mubr.f32.gmra.mrb[38].mxu0 %v21863_v10 }
 0x7c6   :  { %18805 = vmatpush3.bf16.msra.mxu0 %v21593_v27  ;;  %16946 = vmatprep.mubr.f32.mxu0 %v21803_v39  ;;  %v7282_v27 = vand.u32 4294901760, %v7281_v41 }
 0x7c7   :  { %18855 = vmatprep.subr.bf16.mxu0 %v21971_v50 }
 0x7c8   :  { %v7283_v39 = vsub.f32 %v7281_v41, %v7282_v27  ;;  %v18890_v21 = vpack.c.bf16 %v7289_v6, %v7282_v27 }
 0x7c9   :  { %16947 = vmatmul.mubr.f32.vlgmr.msra.gmra.mrb[32].mxu0 %v21799_v55 }
 0x7ca   :  { %16949 = vmatprep.mubr.f32.mxu0 %v21819_v9  ;;  %18857 = vmatpush3.bf16.msra.mxu0 %v21971_v50  ;;  %v7284_v55 = vand.u32 4294901760, %v7283_v39  ;;  %v7291_v9 = vand.u32 4294901760, %v7290_v46 }
 0x7cb   :  { %18859 = vmatprep.subr.bf16.mxu0 %v21982_v44 }
 0x7cc   :  { %v18866_v20 = vpack.c.bf16 %v7291_v9, %v7284_v55 }
 0x7cd   :  { %16950 = vmatmul.mubr.f32.gmra.mrb[34].mxu0 %v21816_v1  ;;  %v18874_v1 = vpack.c.bf16 %v7288_v15, %v7281_v41  ;;  %v7914_v41 = vld [vmem:[%s23369_s16 + $0x20] sm:$0xf] }
 0x7ce   :  { %16952 = vmatprep.mubr.f32.mxu0 %v21839_v37  ;;  %18861 = vmatpush3.bf16.msra.mxu0 %v21982_v44  ;;  %v18870_v37 = vpack.c.bf16 %v21952_v33, %v21950_v34  ;;  %v22062_v34 = vpop.f32.mrb[27].mxu1  ;;  %v7942_v15 = vsel %vm7940_vm3, %v7914_v41, 0 }
 0x7cf   :  { %18863 = vmatprep.subr.bf16.mxu0 %v18862_v54  ;;  %v22065_v33 = vpop.f32.mrb[28].mxu1 }
 0x7d0   :  { %v22067_v3 = vpop.f32.mrb[29].mxu1 }
 0x7d1   :  { %16953 = vmatmul.mubr.f32.gmra.mrb[36].mxu0 %v21841_v53  ;;  %v18886_v53 = vpack.c.bf16 %v7275_v14, %v7268_v23  ;;  %v22069_v60 = vpop.f32.mrb[30].mxu1  ;;  %v7910_v23 = vld [vmem:[%s23369_s16] sm:$0xff]  ;;  %v7911_v14 = vld [vmem:[%s23369_s16 + $0x8] sm:$0xff] }
 0x7d2   :  { %16955 = vmatprep.mubr.f32.mxu0 %v21860_v19  ;;  %v23578_v19 = vld [vmem:[#allocation18_spill] sm:$0xff]  ;;  %v22071_v52 = vpop.f32.mrb[31].mxu1  ;;  %v7945_v0 = vand.u32 4294901760, %v7910_v23  ;;  %v7948_v13 = vand.u32 4294901760, %v7911_v14 }
 0x7d4   :  { %v8096_v27 = vsub.f32 %v7910_v23, %v7945_v0  ;;  %v8103_v6 = vsub.f32 %v7911_v14, %v7948_v13 }
 0x7d5   :  { %16956 = vmatmul.mubr.f32.gmra.mrb[38].mxu0 %v21863_v10  ;;  %v23579_v10 = vld [vmem:[#allocation27_spill] sm:$0xff] }
 0x7d6   :  { %17086 = vmatprep.mubr.f32.mxu0 %v23539_v40  ;;  %v8097_v39 = vand.u32 4294901760, %v8096_v27  ;;  %v8104_v46 = vand.u32 4294901760, %v8103_v6 }
 0x7d8   :  { %v8098_v55 = vsub.f32 %v8096_v27, %v8097_v39  ;;  %v8105_v9 = vsub.f32 %v8103_v6, %v8104_v46 }
 0x7d9   :  { %17087 = vmatmul.mubr.f32.vlgmr.msra.gmra.mrb[40].mxu0 %v23540_v42 }
 0x7da   :  { %18865 = vmatpush3.bf16.msra.mxu0 %v18862_v54  ;;  %17089 = vmatprep.mubr.f32.mxu0 %v23541_v5  ;;  %v22101_v54 = vand.u32 4294901760, %v7942_v15 }
 0x7db   :  { %18867 = vmatprep.subr.bf16.mxu0 %v18866_v20 }
 0x7dd   :  { %17090 = vmatmul.mubr.f32.gmra.mrb[42].mxu0 %v23542_v8 }
 0x7de   :  { %17092 = vmatprep.mubr.f32.mxu0 %v23543_v47  ;;  %18869 = vmatpush3.bf16.msra.mxu0 %v18866_v20 }
 0x7df   :  { %18871 = vmatprep.subr.bf16.mxu0 %v18870_v37 }
 0x7e1   :  { %17093 = vmatmul.mubr.f32.gmra.mrb[44].mxu0 %v23544_v51 }
 0x7e2   :  { %17095 = vmatprep.mubr.f32.mxu0 %v23545_v45 }
 0x7e5   :  { %17096 = vmatmul.mubr.f32.gmra.mrb[46].mxu0 %v23546_v62 }
 0x7e6   :  { %17106 = vmatprep.mubr.f32.mxu0 %v23547_v4 }
 0x7e9   :  { %17107 = vmatmul.mubr.f32.vlgmr.msra.gmra.mrb[40].mxu0 %v23548_v26 }
 0x7ea   :  { %18873 = vmatpush3.bf16.msra.mxu0 %v18870_v37  ;;  %17109 = vmatprep.mubr.f32.mxu0 %v23549_v38  ;;  %v8117_v37 = vsub.f32 %v7913_v61, %v7954_v7 }
 0x7eb   :  { %18875 = vmatprep.subr.bf16.mxu0 %v18874_v1 }
 0x7ec   :  { %v8118_v41 = vand.u32 4294901760, %v8117_v37 }
 0x7ed   :  { %17110 = vmatmul.mubr.f32.gmra.mrb[42].mxu0 %v23550_v24 }
 0x7ee   :  { %17112 = vmatprep.mubr.f32.mxu0 %v23551_v32  ;;  %18877 = vmatpush3.bf16.msra.mxu0 %v18874_v1  ;;  %v8099_v1 = vand.u32 4294901760, %v8098_v55 }
 0x7ef   :  { %18879 = vmatprep.subr.bf16.mxu0 %v21971_v50 }
 0x7f1   :  { %17113 = vmatmul.mubr.f32.gmra.mrb[44].mxu0 %v23552_v58 }
 0x7f2   :  { %17115 = vmatprep.mubr.f32.mxu0 %v23553_v2 }
 0x7f5   :  { %17116 = vmatmul.mubr.f32.gmra.mrb[46].mxu0 %v23554_v56 }
 0x7f6   :  { %17126 = vmatprep.mubr.f32.mxu0 %v23555_v29 }
 0x7f9   :  { %17127 = vmatmul.mubr.f32.vlgmr.msra.gmra.mrb[40].mxu0 %v23556_v25 }
 0x7fa   :  { %18881 = vmatpush3.bf16.msra.mxu0 %v21971_v50  ;;  %17129 = vmatprep.mubr.f32.mxu0 %v23557_v57 }
 0x7fb   :  { %18883 = vmatprep.subr.bf16.mxu0 %v21982_v44 }
 0x7fd   :  { %17130 = vmatmul.mubr.f32.gmra.mrb[42].mxu0 %v23558_v22 }
 0x7fe   :  { %17132 = vmatprep.mubr.f32.mxu0 %v23559_v59  ;;  %18885 = vmatpush3.bf16.msra.mxu0 %v21982_v44 }
 0x7ff   :  { %18887 = vmatprep.subr.bf16.mxu0 %v18886_v53 }
 0x801   :  { %17133 = vmatmul.mubr.f32.gmra.mrb[44].mxu0 %v23578_v19 }
 0x802   :  { %17135 = vmatprep.mubr.f32.mxu0 %v23579_v10 }
 0x805   :  { %17136 = vmatmul.mubr.f32.gmra.mrb[46].mxu0 %v23580_v12 }
 0x806   :  { %17146 = vmatprep.mubr.f32.mxu0 %v23581_v48 }
 0x809   :  { %17147 = vmatmul.mubr.f32.vlgmr.msra.gmra.mrb[40].mxu0 %v23582_v18 }
 0x80a   :  { %18889 = vmatpush3.bf16.msra.mxu0 %v18886_v53  ;;  %17149 = vmatprep.mubr.f32.mxu0 %v23583_v49  ;;  %v8106_v53 = vand.u32 4294901760, %v8105_v9 }
 0x80b   :  { %18891 = vmatprep.subr.bf16.mxu0 %v18890_v21 }
 0x80c   :  { %v22107_v23 = vpack.c.bf16 %v8106_v53, %v8099_v1  ;;  %v22132_v53 = vpack.c.bf16 %v8104_v46, %v8097_v39 }
 0x80d   :  { %17150 = vmatmul.mubr.f32.gmra.mrb[42].mxu0 %v23584_v17 }
 0x80e   :  { %17152 = vmatprep.mubr.f32.mxu0 %v23585_v16  ;;  %18893 = vmatpush3.bf16.msra.mxu0 %v18890_v21  ;;  %v22114_v16 = vpack.c.bf16 %v8103_v6, %v8096_v27 }
 0x80f   :  { %18895 = vmatprep.subr.bf16.mxu0 %v21971_v50 }
 0x811   :  { %17153 = vmatmul.mubr.f32.gmra.mrb[44].mxu0 %v23586_v63 }
 0x812   :  { %17155 = vmatprep.mubr.f32.mxu0 %v23587_v30 }
 0x815   :  { %17156 = vmatmul.mubr.f32.gmra.mrb[46].mxu0 %v23588_v36 }
 0x816   :  { %17166 = vmatprep.mubr.f32.mxu0 %v23547_v4 }
 0x819   :  { %17167 = vmatmul.mubr.f32.vlgmr.msra.gmra.mrb[40].mxu0 %v23548_v26 }
 0x81a   :  { %18897 = vmatpush3.bf16.msra.mxu0 %v21971_v50  ;;  %17169 = vmatprep.mubr.f32.mxu0 %v23549_v38  ;;  %v22079_v50 = vpack.c.bf16 %v7948_v13, %v7945_v0  ;;  %v8119_v0 = vsub.f32 %v8117_v37, %v8118_v41 }
 0x81b   :  { %18899 = vmatprep.subr.bf16.mxu0 %v21982_v44 }
 0x81c   :  { %19286 = vmatprep.subr.bf16.mxu1 %v22079_v50  ;;  %v8120_v36 = vand.u32 4294901760, %v8119_v0 }
 0x81d   :  { %17170 = vmatmul.mubr.f32.gmra.mrb[42].mxu0 %v23550_v24  ;;  %19289 = vmatpush3.bf16.msra.mxu1 %v22079_v50 }
 0x81e   :  { %17172 = vmatprep.mubr.f32.mxu0 %v23551_v32  ;;  %18901 = vmatpush3.bf16.msra.mxu0 %v21982_v44  ;;  %v7951_v44 = vand.u32 4294901760, %v7912_v31 }
 0x81f   :  { %18903 = vmatprep.subr.bf16.mxu0 %v22079_v50 }
 0x820   :  { %v22091_v43 = vpack.c.bf16 %v7954_v7, %v7951_v44  ;;  %v8110_v20 = vsub.f32 %v7912_v31, %v7951_v44 }
 0x821   :  { %17173 = vmatmul.mubr.f32.gmra.mrb[44].mxu0 %v23552_v58 }
 0x822   :  { %17175 = vmatprep.mubr.f32.mxu0 %v23553_v2  ;;  %19287 = vmatprep.subr.bf16.mxu1 %v22091_v43  ;;  %v8111_v21 = vand.u32 4294901760, %v8110_v20  ;;  %v22122_v7 = vpack.c.bf16 %v8117_v37, %v8110_v20 }
 0x823   :  { %19290 = vmatpush3.bf16.msra.mxu1 %v22091_v43 }
 0x824   :  { %19288 = vmatprep.subr.mxu1 %v22101_v54  ;;  %v8112_v14 = vsub.f32 %v8110_v20, %v8111_v21  ;;  %v22134_v27 = vpack.c.bf16 %v8118_v41, %v8111_v21 }
 0x825   :  { %17176 = vmatmul.mubr.f32.gmra.mrb[46].mxu0 %v23554_v56 }
 0x826   :  { %17186 = vmatprep.mubr.f32.mxu0 %v23547_v4  ;;  %v8113_v13 = vand.u32 4294901760, %v8112_v14 }
 0x827   :  { %19291 = vmatpush3.msra.mxu1 %v22101_v54 }
 0x828   :  { %18911 = vmatprep.subr.bf16.mxu1 %v22107_v23  ;;  %v22110_v30 = vpack.c.bf16 %v8120_v36, %v8113_v13 }
 0x829   :  { %17187 = vmatmul.mubr.f32.vlgmr.msra.gmra.mrb[40].mxu0 %v23548_v26 }
 0x82a   :  { %17189 = vmatprep.mubr.f32.mxu0 %v23549_v38  ;;  %18905 = vmatpush3.bf16.msra.mxu0 %v22079_v50 }
 0x82b   :  { %18907 = vmatprep.subr.bf16.mxu0 %v22091_v43 }
 0x82d   :  { %17190 = vmatmul.mubr.f32.gmra.mrb[42].mxu0 %v23550_v24 }
 0x82e   :  { %17192 = vmatprep.mubr.f32.mxu0 %v23551_v32  ;;  %18909 = vmatpush3.bf16.msra.mxu0 %v22091_v43 }
 0x82f   :  { %17206 = vmatprep.subr.mxu0 %v22101_v54 }
 0x831   :  { %17193 = vmatmul.mubr.f32.gmra.mrb[44].mxu0 %v23552_v58 }
 0x832   :  { %17195 = vmatprep.mubr.f32.mxu0 %v23553_v2  ;;  %17207 = vmatpush3.msra.mxu0 %v22101_v54 }
 0x835   :  { %17196 = vmatmul.mubr.f32.gmra.mrb[46].mxu0 %v23554_v56 }
 0x89c   :  { %v22112_v63 = vpop.f32.mrb[32].mxu0 }
 0x89d   :  { %23589 = vst [vmem:[#allocation16_spill] sm:$0xff] %v22112_v63  ;;  %v22116_v31 = vpop.f32.mrb[33].mxu0 }
 0x89e   :  { %23590 = vst [vmem:[#allocation19_spill] sm:$0xff] %v22116_v31 }
 0x8a0   :  { %v22118_v61 = vpop.f32.mrb[34].mxu0 }
 0x8a1   :  { %23591 = vst [vmem:[#allocation20_spill] sm:$0xff] %v22118_v61  ;;  %v22120_v44 = vpop.f32.mrb[35].mxu0 }
 0x8a2   :  { %23592 = vst [vmem:[#allocation23_spill] sm:$0xff] %v22120_v44 }
 0x8a4   :  { %v22124_v55 = vpop.f32.mrb[36].mxu0 }
 0x8a5   :  { %23593 = vst [vmem:[#allocation26_spill] sm:$0xff] %v22124_v55  ;;  %v22126_v9 = vpop.f32.mrb[37].mxu0 }
 0x8a6   :  { %23594 = vst [vmem:[#allocation28_spill] sm:$0xff] %v22126_v9 }
 0x8a8   :  { %v22128_v1 = vpop.f32.mrb[38].mxu0 }
 0x8a9   :  { %23595 = vst [vmem:[#allocation32_spill] sm:$0xff] %v22128_v1  ;;  %v22130_v36 = vpop.f32.mrb[39].mxu0 }
 0x8aa   :  { %23596 = vst [vmem:[#allocation33_spill] sm:$0xff] %v22130_v36 }
 0x8fc   :  { %v17188_v6 = vpop.f32.mrb[40].mxu0 }
 0x8fd   :  { %v7903_v14 = vmul.f32 %v17188_v6, %v22053_v35  ;;  %v7856_v0 = vpop.f32.mrb[41].mxu0 }
 0x8fe   :  { %v7902_v20 = vmul.f32 %v7856_v0, %v22056_v28 }
 0x8ff   :  { %v7920_v37 = vsel %vm7915_vm4, %v7903_v14, 0 }
 0x900   :  { %v22139_v13 = vand.u32 4294901760, %v7920_v37  ;;  %v7917_v9 = vsel %vm7915_vm4, %v7902_v20, 0  ;;  %v17191_v1 = vpop.f32.mrb[42].mxu0 }
 0x901   :  { %v22142_v55 = vand.u32 4294901760, %v7917_v9  ;;  %v7905_v39 = vmul.f32 %v17191_v1, %v22059_v11  ;;  %v7868_v46 = vpop.f32.mrb[43].mxu0  ;;  %v22158_v11 = vsub.f32 %v7942_v15, %v22101_v54 }
 0x902   :  { %v22146_v21 = vsub.f32 %v7920_v37, %v22139_v13  ;;  %v7904_v35 = vmul.f32 %v7868_v46, %v22062_v34 }
 0x903   :  { %v22150_v41 = vsub.f32 %v7917_v9, %v22142_v55  ;;  %v7926_v28 = vsel %vm7915_vm4, %v7905_v39, 0 }
 0x904   :  { %v23459_v6 = vand.u32 4294901760, %v22146_v21  ;;  %v22154_v14 = vand.u32 4294901760, %v7926_v28  ;;  %v7923_v0 = vsel %vm7915_vm4, %v7904_v35, 0  ;;  %v17194_v20 = vpop.f32.mrb[44].mxu0 }
 0x905   :  { %v22160_v1 = vand.u32 4294901760, %v7923_v0  ;;  %v7907_v37 = vmul.f32 %v17194_v20, %v22065_v33  ;;  %v7880_v34 = vpop.f32.mrb[45].mxu0  ;;  %v23460_v9 = vand.u32 4294901760, %v22150_v41 }
 0x906   :  { %v8027_v39 = vsub.f32 %v22146_v21, %v23459_v6  ;;  %v22168_v46 = vsub.f32 %v7926_v28, %v22154_v14  ;;  %v7906_v35 = vmul.f32 %v7880_v34, %v22067_v3  ;;  %v22183_v28 = vand.u32 4294901760, %v22158_v11 }
 0x907   :  { %v22172_v36 = vsub.f32 %v7923_v0, %v22160_v1  ;;  %v7932_v15 = vsel %vm7915_vm4, %v7907_v37, 0  ;;  %v8017_v33 = vsub.f32 %v22150_v41, %v23460_v9 }
 0x908   :  { %v23461_v20 = vand.u32 4294901760, %v22168_v46  ;;  %v22179_v44 = vand.u32 4294901760, %v7932_v15  ;;  %v7929_v6 = vsel %vm7915_vm4, %v7906_v35, 0  ;;  %v17197_v61 = vpop.f32.mrb[46].mxu0  ;;  %v8028_v63 = vand.u32 4294901760, %v8027_v39 }
 0x909   :  { %v22185_v3 = vand.u32 4294901760, %v7929_v6  ;;  %v7909_v0 = vmul.f32 %v17197_v61, %v22069_v60  ;;  %v7892_v34 = vpop.f32.mrb[47].mxu0  ;;  %v8018_v37 = vand.u32 4294901760, %v8017_v33  ;;  %v23462_v31 = vand.u32 4294901760, %v22172_v36 }
 0x90a   :  { %v8047_v9 = vsub.f32 %v22168_v46, %v23461_v20  ;;  %v22193_v17 = vsub.f32 %v7932_v15, %v22179_v44  ;;  %v7908_v35 = vmul.f32 %v7892_v34, %v22071_v52  ;;  %v8126_v20 = vsub.f32 %v22158_v11, %v22183_v28 }
 0x90b   :  { %v22197_v49 = vsub.f32 %v7929_v6, %v22185_v3  ;;  %v7938_v18 = vsel %vm7915_vm4, %v7909_v0, 0  ;;  %17208 = vmatprep.mubr.f32.mxu0 %v8018_v37  ;;  %v8037_v60 = vsub.f32 %v22172_v36, %v23462_v31 }
 0x90c   :  { %v22203_v61 = vand.u32 4294901760, %v7938_v18  ;;  %v7935_v39 = vsel %vm7915_vm4, %v7908_v35, 0  ;;  %17209 = vmatmul.mubr.f32.vlgmr.msra.gmra.mrb[48].mxu0 %v8028_v63  ;;  %v23463_v15 = vand.u32 4294901760, %v22193_v17  ;;  %v8048_v34 = vand.u32 4294901760, %v8047_v9 }
 0x90d   :  { %v22207_v33 = vand.u32 4294901760, %v7935_v39  ;;  %v8038_v52 = vand.u32 4294901760, %v8037_v60  ;;  %v8056_v6 = vand.u32 4294901760, %v22197_v49  ;;  %v8127_v48 = vand.u32 4294901760, %v8126_v20 }
 0x90e   :  { %v22211_v0 = vsub.f32 %v7938_v18, %v22203_v61  ;;  %v8067_v37 = vsub.f32 %v22193_v17, %v23463_v15 }
 0x90f   :  { %v8075_v63 = vsub.f32 %v7935_v39, %v22207_v33  ;;  %17211 = vmatprep.mubr.f32.mxu1 %v8038_v52  ;;  %v8057_v35 = vsub.f32 %v22197_v49, %v8056_v6 }
 0x910   :  { %17212 = vmatmul.mubr.f32.vlgmr.msra.gmra.mrb[32].mxu1 %v8048_v34  ;;  %v8086_v60 = vand.u32 4294901760, %v22211_v0  ;;  %v8068_v31 = vand.u32 4294901760, %v8067_v37 }
 0x911   :  { %18913 = vmatpush3.bf16.msra.mxu1 %v22107_v23  ;;  %v8058_v9 = vand.u32 4294901760, %v8057_v35  ;;  %v8076_v18 = vand.u32 4294901760, %v8075_v63 }
 0x912   :  { %18915 = vmatprep.subr.bf16.mxu1 %v22110_v30  ;;  %v8087_v15 = vsub.f32 %v22211_v0, %v8086_v60 }
 0x913   :  { %17214 = vmatprep.mubr.f32.mxu1 %v8058_v9  ;;  %v8077_v12 = vsub.f32 %v8075_v63, %v8076_v18 }
 0x914   :  { %17215 = vmatmul.mubr.f32.gmra.mrb[34].mxu1 %v8068_v31  ;;  %v8088_v52 = vand.u32 4294901760, %v8087_v15 }
 0x915   :  { %18917 = vmatpush3.bf16.msra.mxu1 %v22110_v30  ;;  %v8078_v39 = vand.u32 4294901760, %v8077_v12  ;;  %v23597_v12 = vand.u32 4294901760, %v22150_v41  ;;  %v23601_v30 = vand.u32 4294901760, %v22193_v17 }
 0x916   :  { %17228 = vmatprep.subr.mxu1 %v8127_v48 }
 0x917   :  { %17217 = vmatprep.mubr.f32.mxu1 %v8078_v39 }
 0x918   :  { %17218 = vmatmul.mubr.f32.gmra.mrb[36].mxu1 %v8088_v52 }
 0x919   :  { %17229 = vmatpush3.msra.mxu1 %v8127_v48  ;;  %17230 = vmatprep.mubr.f32.mxu1 %v22142_v55  ;;  %v23598_v48 = vand.u32 4294901760, %v22146_v21 }
 0x91a   :  { %18919 = vmatprep.subr.bf16.mxu1 %v22114_v16 }
 0x91c   :  { %17231 = vmatmul.mubr.f32.vlgmr.msra.gmra.mrb[38].mxu1 %v22139_v13 }
 0x91d   :  { %17233 = vmatprep.mubr.f32.mxu1 %v22160_v1  ;;  %18921 = vmatpush3.bf16.msra.mxu1 %v22114_v16  ;;  %v23600_v16 = vand.u32 4294901760, %v22168_v46 }
 0x91e   :  { %18923 = vmatprep.subr.bf16.mxu1 %v22122_v7 }
 0x920   :  { %17234 = vmatmul.mubr.f32.gmra.mrb[32].mxu1 %v22154_v14 }
 0x921   :  { %17236 = vmatprep.mubr.f32.mxu1 %v22185_v3  ;;  %18925 = vmatpush3.bf16.msra.mxu1 %v22122_v7 }
 0x922   :  { %17250 = vmatprep.subr.mxu1 %v22158_v11 }
 0x924   :  { %17237 = vmatmul.mubr.f32.gmra.mrb[34].mxu1 %v22179_v44 }
 0x925   :  { %17239 = vmatprep.mubr.f32.mxu1 %v22207_v33  ;;  %17251 = vmatpush3.msra.mxu1 %v22158_v11 }
 0x926   :  { %18927 = vmatprep.subr.bf16.mxu1 %v22079_v50 }
 0x928   :  { %17240 = vmatmul.mubr.f32.gmra.mrb[36].mxu1 %v22203_v61 }
 0x929   :  { %17252 = vmatprep.mubr.f32.mxu1 %v22150_v41 }
 0x92c   :  { %17253 = vmatmul.mubr.f32.vlgmr.msra.gmra.mrb[38].mxu1 %v22146_v21 }
 0x92d   :  { %17255 = vmatprep.mubr.f32.mxu1 %v22172_v36  ;;  %18929 = vmatpush3.bf16.msra.mxu1 %v22079_v50 }
 0x92e   :  { %18931 = vmatprep.subr.bf16.mxu1 %v22091_v43 }
 0x930   :  { %17256 = vmatmul.mubr.f32.gmra.mrb[32].mxu1 %v22168_v46 }
 0x931   :  { %17258 = vmatprep.mubr.f32.mxu1 %v22197_v49  ;;  %18933 = vmatpush3.bf16.msra.mxu1 %v22091_v43  ;;  %v23599_v49 = vand.u32 4294901760, %v22172_v36 }
 0x932   :  { %17272 = vmatprep.subr.mxu1 %v22101_v54 }
 0x934   :  { %17259 = vmatmul.mubr.f32.gmra.mrb[34].mxu1 %v22193_v17  ;;  %v8748_v17 = vld [vmem:[%s23370_s14 + $0x8] sm:$0xf] }
 0x935   :  { %17261 = vmatprep.mubr.f32.mxu1 %v8075_v63  ;;  %17273 = vmatpush3.msra.mxu1 %v22101_v54 }
 0x936   :  { %18935 = vmatprep.subr.bf16.mxu1 %v22132_v53 }
 0x938   :  { %17262 = vmatmul.mubr.f32.gmra.mrb[36].mxu1 %v22211_v0 }
 0x939   :  { %17274 = vmatprep.mubr.f32.mxu1 %v23597_v12 }
 0x93c   :  { %17275 = vmatmul.mubr.f32.vlgmr.msra.gmra.mrb[38].mxu1 %v23598_v48 }
 0x93d   :  { %17277 = vmatprep.mubr.f32.mxu1 %v23599_v49  ;;  %18937 = vmatpush3.bf16.msra.mxu1 %v22132_v53 }
 0x93e   :  { %18939 = vmatprep.subr.bf16.mxu1 %v22134_v27 }
 0x940   :  { %17278 = vmatmul.mubr.f32.gmra.mrb[32].mxu1 %v23600_v16 }
 0x941   :  { %17280 = vmatprep.mubr.f32.mxu1 %v8056_v6  ;;  %18941 = vmatpush3.bf16.msra.mxu1 %v22134_v27 }
 0x942   :  { %17294 = vmatprep.subr.mxu1 %v22183_v28 }
 0x944   :  { %17281 = vmatmul.mubr.f32.gmra.mrb[34].mxu1 %v23601_v30 }
 0x945   :  { %17283 = vmatprep.mubr.f32.mxu1 %v8076_v18  ;;  %17295 = vmatpush3.msra.mxu1 %v22183_v28 }
 0x946   :  { %18943 = vmatprep.subr.bf16.mxu1 %v22079_v50 }
 0x948   :  { %17284 = vmatmul.mubr.f32.gmra.mrb[36].mxu1 %v8086_v60 }
 0x949   :  { %17296 = vmatprep.mubr.f32.mxu1 %v22142_v55 }
 0x94c   :  { %17297 = vmatmul.mubr.f32.vlgmr.msra.gmra.mrb[38].mxu1 %v22139_v13 }
 0x94d   :  { %17299 = vmatprep.mubr.f32.mxu1 %v22160_v1  ;;  %18945 = vmatpush3.bf16.msra.mxu1 %v22079_v50  ;;  %v8747_v50 = vld [vmem:[%s23370_s14] sm:$0xff] }
 0x94e   :  { %18947 = vmatprep.subr.bf16.mxu1 %v22091_v43 }
 0x950   :  { %17300 = vmatmul.mubr.f32.gmra.mrb[32].mxu1 %v22154_v14 }
 0x951   :  { %17302 = vmatprep.mubr.f32.mxu1 %v22185_v3  ;;  %18949 = vmatpush3.bf16.msra.mxu1 %v22091_v43  ;;  %v8775_v43 = vsel %vm7940_vm3, %v8748_v17, 0 }
 0x952   :  { %17316 = vmatprep.subr.mxu1 %v22101_v54  ;;  %v8781_v23 = vand.u32 4294901760, %v8775_v43 }
 0x954   :  { %17303 = vmatmul.mubr.f32.gmra.mrb[34].mxu1 %v22179_v44  ;;  %v8933_v7 = vsub.f32 %v8775_v43, %v8781_v23 }
 0x955   :  { %17305 = vmatprep.mubr.f32.mxu1 %v22207_v33  ;;  %17317 = vmatpush3.msra.mxu1 %v22101_v54  ;;  %v8778_v54 = vand.u32 4294901760, %v8747_v50 }
 0x956   :  { %v8934_v36 = vand.u32 4294901760, %v8933_v7 }
 0x957   :  { %v22297_v31 = vpack.c.bf16 %v8781_v23, %v8778_v54 }
 0x958   :  { %17306 = vmatmul.mubr.f32.gmra.mrb[36].mxu1 %v22203_v61  ;;  %v8935_v27 = vsub.f32 %v8933_v7, %v8934_v36 }
 0x959   :  { %17318 = vmatprep.mubr.f32.mxu1 %v22142_v55  ;;  %18951 = vmatprep.subr.bf16.mxu0 %v22297_v31 }
 0x95a   :  { %18953 = vmatpush3.bf16.msra.mxu0 %v22297_v31  ;;  %v8936_v21 = vand.u32 4294901760, %v8935_v27 }
 0x95c   :  { %17319 = vmatmul.mubr.f32.vlgmr.msra.gmra.mrb[38].mxu1 %v22139_v13 }
 0x95d   :  { %17321 = vmatprep.mubr.f32.mxu1 %v22160_v1 }
 0x960   :  { %17322 = vmatmul.mubr.f32.gmra.mrb[32].mxu1 %v22154_v14 }
 0x961   :  { %17324 = vmatprep.mubr.f32.mxu1 %v22185_v3 }
 0x964   :  { %17325 = vmatmul.mubr.f32.gmra.mrb[34].mxu1 %v22179_v44  ;;  %v8926_v44 = vsub.f32 %v8747_v50, %v8778_v54 }
 0x965   :  { %17327 = vmatprep.mubr.f32.mxu1 %v22207_v33 }
 0x966   :  { %v8927_v55 = vand.u32 4294901760, %v8926_v44  ;;  %v22301_v14 = vpack.c.bf16 %v8933_v7, %v8926_v44 }
 0x968   :  { %17328 = vmatmul.mubr.f32.gmra.mrb[36].mxu1 %v22203_v61  ;;  %v8928_v53 = vsub.f32 %v8926_v44, %v8927_v55  ;;  %v22303_v46 = vpack.c.bf16 %v8934_v36, %v8927_v55 }
 0x96a   :  { %v8929_v13 = vand.u32 4294901760, %v8928_v53 }
 0x96c   :  { %v18954_v41 = vpack.c.bf16 %v8936_v21, %v8929_v13 }
 0x96e   :  { %18955 = vmatprep.subr.bf16.mxu0 %v18954_v41 }
 0x9df   :  { %v17210_v11 = vpop.f32.mrb[48].mxu0 }
 0x9e0   :  { %v8020_v1 = vpop.f32.mrb[49].mxu0 }
 0xa2f   :  { %v17320_v20 = vpop.f32.mrb[38].mxu1 }
 0xa30   :  { %v19340_v28 = vadd.f32 %v17320_v20, %v17210_v11  ;;  %v8697_v3 = vpop.f32.mrb[39].mxu1 }
 0xa31   :  { %v19341_v61 = vadd.f32 %v8697_v3, %v8020_v1 }
 0xa32   :  { %v8754_v15 = vsel %vm8749_vm5, %v19340_v28, 0 }
 0xa33   :  { %v22306_v33 = vand.u32 4294901760, %v8754_v15  ;;  %v8751_v6 = vsel %vm8749_vm5, %v19341_v61, 0  ;;  %v17323_v34 = vpop.f32.mrb[32].mxu1 }
 0xa34   :  { %v22309_v0 = vand.u32 4294901760, %v8751_v6  ;;  %v8760_v37 = vsel %vm8749_vm5, %v17323_v34, 0  ;;  %v8709_v63 = vpop.f32.mrb[33].mxu1 }
 0xa35   :  { %v22313_v35 = vsub.f32 %v8754_v15, %v22306_v33  ;;  %v22315_v60 = vand.u32 4294901760, %v8760_v37  ;;  %v8757_v9 = vsel %vm8749_vm5, %v8709_v63, 0 }
 0xa36   :  { %v22319_v18 = vsub.f32 %v8751_v6, %v22309_v0  ;;  %v22321_v39 = vand.u32 4294901760, %v8757_v9 }
 0xa37   :  { %v8856_v52 = vand.u32 4294901760, %v22313_v35  ;;  %v22325_v12 = vsub.f32 %v8760_v37, %v22315_v60  ;;  %v17326_v48 = vpop.f32.mrb[34].mxu1 }
 0xa38   :  { %v22328_v49 = vsub.f32 %v8757_v9, %v22321_v39  ;;  %v8766_v16 = vsel %vm8749_vm5, %v17326_v48, 0  ;;  %v8721_v30 = vpop.f32.mrb[35].mxu1  ;;  %v8846_v17 = vand.u32 4294901760, %v22319_v18 }
 0xa39   :  { %v8876_v50 = vand.u32 4294901760, %v22325_v12  ;;  %v22333_v43 = vand.u32 4294901760, %v8766_v16  ;;  %v8763_v54 = vsel %vm8749_vm5, %v8721_v30, 0  ;;  %v8857_v23 = vsub.f32 %v22313_v35, %v8856_v52 }
 0xa3a   :  { %v8866_v44 = vand.u32 4294901760, %v22328_v49  ;;  %v22340_v7 = vand.u32 4294901760, %v8763_v54  ;;  %v8847_v55 = vsub.f32 %v22319_v18, %v8846_v17 }
 0xa3b   :  { %v22346_v36 = vsub.f32 %v8766_v16, %v22333_v43  ;;  %v17329_v53 = vpop.f32.mrb[36].mxu1  ;;  %v8858_v27 = vand.u32 4294901760, %v8857_v23  ;;  %v8877_v15 = vsub.f32 %v22325_v12, %v8876_v50 }
 0xa3c   :  { %v8885_v13 = vsub.f32 %v8763_v54, %v22340_v7  ;;  %v8772_v21 = vsel %vm8749_vm5, %v17329_v53, 0  ;;  %v8733_v11 = vpop.f32.mrb[37].mxu1  ;;  %v8848_v1 = vand.u32 4294901760, %v8847_v55  ;;  %v8867_v20 = vsub.f32 %v22328_v49, %v8866_v44 }
 0xa3d   :  { %v8896_v28 = vand.u32 4294901760, %v22346_v36  ;;  %v22352_v3 = vand.u32 4294901760, %v8772_v21  ;;  %v8769_v61 = vsel %vm8749_vm5, %v8733_v11, 0  ;;  %v8878_v30 = vand.u32 4294901760, %v8877_v15 }
 0xa3e   :  { %v8886_v6 = vand.u32 4294901760, %v8885_v13  ;;  %v22358_v34 = vand.u32 4294901760, %v8769_v61  ;;  %17334 = vmatprep.mubr.f32.mxu0 %v8848_v1  ;;  %v8868_v37 = vand.u32 4294901760, %v8867_v20 }
 0xa3f   :  { %v8915_v63 = vsub.f32 %v8772_v21, %v22352_v3  ;;  %17335 = vmatmul.mubr.f32.vlgmr.msra.gmra.mrb[50].mxu0 %v8858_v27  ;;  %v8897_v54 = vsub.f32 %v22346_v36, %v8896_v28 }
 0xa40   :  { %v8905_v9 = vsub.f32 %v8769_v61, %v22358_v34  ;;  %17337 = vmatprep.mubr.f32.mxu0 %v8868_v37  ;;  %18957 = vmatpush3.bf16.msra.mxu0 %v18954_v41  ;;  %v8887_v48 = vsub.f32 %v8885_v13, %v8886_v6  ;;  %v8743_v41 = vld [vmem:[%s23371_s13] sm:$0xff] }
 0xa41   :  { %v8916_v16 = vand.u32 4294901760, %v8915_v63  ;;  %18959 = vmatprep.subr.bf16.mxu0 %v22301_v14  ;;  %v8898_v11 = vand.u32 4294901760, %v8897_v54 }
 0xa42   :  { %v8906_v23 = vand.u32 4294901760, %v8905_v9  ;;  %v8888_v55 = vand.u32 4294901760, %v8887_v48 }
 0xa43   :  { %17338 = vmatmul.mubr.f32.gmra.mrb[52].mxu0 %v8878_v30  ;;  %v8917_v1 = vsub.f32 %v8915_v63, %v8916_v16 }
 0xa44   :  { %17340 = vmatprep.mubr.f32.mxu0 %v8888_v55  ;;  %v8907_v53 = vsub.f32 %v8905_v9, %v8906_v23  ;;  %v23604_v55 = vld [vmem:[#allocation10_spill] sm:$0xff] }
 0xa45   :  { %v8918_v27 = vand.u32 4294901760, %v8917_v1  ;;  %v23607_v1 = vld [vmem:[#allocation21_spill] sm:$0xff] }
 0xa46   :  { %v8908_v21 = vand.u32 4294901760, %v8907_v53  ;;  %v23605_v53 = vld [vmem:[#allocation12_spill] sm:$0xff] }
 0xa47   :  { %17341 = vmatmul.mubr.f32.gmra.mrb[54].mxu0 %v8898_v11  ;;  %v23606_v11 = vld [vmem:[#allocation15_spill] sm:$0xff] }
 0xa48   :  { %17343 = vmatprep.mubr.f32.mxu0 %v8908_v21  ;;  %v23608_v21 = vld [vmem:[#allocation22_spill] sm:$0xff] }
 0xa4b   :  { %17344 = vmatmul.mubr.f32.gmra.mrb[56].mxu0 %v8918_v27  ;;  %v23609_v27 = vld [vmem:[#allocation30_spill] sm:$0xff] }
 0xa4c   :  { %17350 = vmatprep.mubr.f32.mxu0 %v22309_v0 }
 0xa4f   :  { %17351 = vmatmul.mubr.f32.vlgmr.msra.gmra.mrb[50].mxu0 %v22306_v33 }
 0xa50   :  { %17353 = vmatprep.mubr.f32.mxu0 %v22321_v39  ;;  %18961 = vmatpush3.bf16.msra.mxu0 %v22301_v14  ;;  %v8744_v14 = vld [vmem:[%s23371_s13 + $0x8] sm:$0xff] }
 0xa51   :  { %18963 = vmatprep.subr.bf16.mxu0 %v22297_v31 }
 0xa53   :  { %17354 = vmatmul.mubr.f32.gmra.mrb[52].mxu0 %v22315_v60 }
 0xa54   :  { %17356 = vmatprep.mubr.f32.mxu0 %v22340_v7 }
 0xa57   :  { %17357 = vmatmul.mubr.f32.gmra.mrb[54].mxu0 %v22333_v43 }
 0xa58   :  { %17359 = vmatprep.mubr.f32.mxu0 %v22358_v34 }
 0xa5b   :  { %17360 = vmatmul.mubr.f32.gmra.mrb[56].mxu0 %v22352_v3 }
 0xa5c   :  { %17366 = vmatprep.mubr.f32.mxu0 %v22319_v18  ;;  %v9544_v18 = vand.u32 4294901760, %v8744_v14 }
 0xa5f   :  { %17367 = vmatmul.mubr.f32.vlgmr.msra.gmra.mrb[50].mxu0 %v22313_v35  ;;  %v9541_v35 = vand.u32 4294901760, %v8743_v41 }
 0xa60   :  { %17369 = vmatprep.mubr.f32.mxu0 %v22328_v49  ;;  %18965 = vmatpush3.bf16.msra.mxu0 %v22297_v31  ;;  %v8746_v49 = vld [vmem:[%s23371_s13 + $0x18] sm:$0x3] }
 0xa61   :  { %18967 = vmatprep.subr.bf16.mxu0 %v22303_v46 }
 0xa63   :  { %17370 = vmatmul.mubr.f32.gmra.mrb[52].mxu0 %v22325_v12  ;;  %v22404_v12 = vsub.f32 %v8744_v14, %v9544_v18  ;;  %v10334_v14 = vld [vmem:[%s23372_s18] sm:$0xff] }
 0xa64   :  { %17372 = vmatprep.mubr.f32.mxu0 %v8885_v13 }
 0xa67   :  { %17373 = vmatmul.mubr.f32.gmra.mrb[54].mxu0 %v22346_v36 }
 0xa68   :  { %17375 = vmatprep.mubr.f32.mxu0 %v8905_v9 }
 0xa6b   :  { %17376 = vmatmul.mubr.f32.gmra.mrb[56].mxu0 %v8915_v63 }
 0xa6c   :  { %17382 = vmatprep.mubr.f32.mxu0 %v8846_v17  ;;  %v8745_v17 = vld [vmem:[%s23371_s13 + $0x10] sm:$0xff] }
 0xa6d   :  { %v9547_v36 = vand.u32 4294901760, %v8745_v17 }
 0xa6f   :  { %17383 = vmatmul.mubr.f32.vlgmr.msra.gmra.mrb[50].mxu0 %v8856_v52  ;;  %v22402_v52 = vsub.f32 %v8743_v41, %v9541_v35  ;;  %v9705_v37 = vsub.f32 %v8745_v17, %v9547_v36  ;;  %v23610_v41 = vld [vmem:[#allocation31_spill] sm:$0xff] }
 0xa70   :  { %17385 = vmatprep.mubr.f32.mxu0 %v8866_v44  ;;  %18969 = vmatpush3.bf16.msra.mxu0 %v22303_v46  ;;  %v22396_v46 = vpack.c.bf16 %v9544_v18, %v9541_v35  ;;  %v9699_v44 = vand.u32 4294901760, %v22404_v12  ;;  %v10335_v35 = vld [vmem:[%s23372_s18 + $0x8] sm:$0xff]  ;;  %v10366_v18 = vand.u32 4294901760, %v10334_v14 }
 0xa71   :  { %18971 = vmatprep.subr.bf16.mxu0 %v22297_v31  ;;  %v9706_v48 = vand.u32 4294901760, %v9705_v37 }
 0xa73   :  { %17386 = vmatmul.mubr.f32.gmra.mrb[52].mxu0 %v8876_v50  ;;  %v9692_v50 = vand.u32 4294901760, %v22402_v52 }
 0xa74   :  { %17388 = vmatprep.mubr.f32.mxu0 %v8886_v6 }
 0xa75   :  { %v9693_v20 = vsub.f32 %v22402_v52, %v9692_v50 }
 0xa77   :  { %17389 = vmatmul.mubr.f32.gmra.mrb[54].mxu0 %v8896_v28  ;;  %v9700_v28 = vsub.f32 %v22404_v12, %v9699_v44  ;;  %v9694_v15 = vand.u32 4294901760, %v9693_v20 }
 0xa78   :  { %17391 = vmatprep.mubr.f32.mxu0 %v8906_v23 }
 0xa79   :  { %v9701_v6 = vand.u32 4294901760, %v9700_v28  ;;  %v10518_v28 = vsub.f32 %v10334_v14, %v10366_v18 }
 0xa7b   :  { %17392 = vmatmul.mubr.f32.gmra.mrb[56].mxu0 %v8916_v16  ;;  %v18982_v9 = vpack.c.bf16 %v9701_v6, %v9694_v15  ;;  %v10519_v15 = vand.u32 4294901760, %v10518_v28 }
 0xa7c   :  { %17398 = vmatprep.mubr.f32.mxu0 %v22309_v0 }
 0xa7f   :  { %17399 = vmatmul.mubr.f32.vlgmr.msra.gmra.mrb[50].mxu0 %v22306_v33 }
 0xa80   :  { %17401 = vmatprep.mubr.f32.mxu0 %v22321_v39  ;;  %18973 = vmatpush3.bf16.msra.mxu0 %v22297_v31  ;;  %v9538_v31 = vsel %vm117_vm0, %v8746_v49, 0 }
 0xa81   :  { %18975 = vmatprep.subr.bf16.mxu0 %v22396_v46  ;;  %v9550_v13 = vand.u32 4294901760, %v9538_v31 }
 0xa83   :  { %17402 = vmatmul.mubr.f32.gmra.mrb[52].mxu0 %v22315_v60  ;;  %v22427_v61 = vpack.c.bf16 %v9550_v13, %v9547_v36  ;;  %v9712_v63 = vsub.f32 %v9538_v31, %v9550_v13 }
 0xa84   :  { %17404 = vmatprep.mubr.f32.mxu0 %v22340_v7 }
 0xa85   :  { %v9713_v16 = vand.u32 4294901760, %v9712_v63 }
 0xa87   :  { %17405 = vmatmul.mubr.f32.gmra.mrb[54].mxu0 %v22333_v43  ;;  %v9714_v30 = vsub.f32 %v9712_v63, %v9713_v16  ;;  %v19010_v23 = vpack.c.bf16 %v9713_v16, %v9706_v48 }
 0xa88   :  { %17407 = vmatprep.mubr.f32.mxu0 %v22358_v34 }
 0xa8b   :  { %17408 = vmatmul.mubr.f32.gmra.mrb[56].mxu0 %v22352_v3 }
 0xa8c   :  { %17414 = vmatprep.mubr.f32.mxu0 %v22309_v0  ;;  %v9707_v0 = vsub.f32 %v9705_v37, %v9706_v48 }
 0xa8f   :  { %17415 = vmatmul.mubr.f32.vlgmr.msra.gmra.mrb[50].mxu0 %v22306_v33  ;;  %v9708_v33 = vand.u32 4294901760, %v9707_v0 }
 0xa90   :  { %17417 = vmatprep.mubr.f32.mxu0 %v22321_v39  ;;  %18977 = vmatpush3.bf16.msra.mxu0 %v22396_v46  ;;  %v9715_v39 = vand.u32 4294901760, %v9714_v30 }
 0xa91   :  { %18979 = vmatprep.subr.bf16.mxu0 %v22427_v61 }
 0xa92   :  { %v18986_v54 = vpack.c.bf16 %v9715_v39, %v9708_v33 }
 0xa93   :  { %17418 = vmatmul.mubr.f32.gmra.mrb[52].mxu0 %v22315_v60  ;;  %v18990_v60 = vpack.c.bf16 %v22404_v12, %v22402_v52  ;;  %v10336_v12 = vld [vmem:[%s23372_s18 + $0x10] sm:$0xff] }
 0xa94   :  { %17420 = vmatprep.mubr.f32.mxu0 %v22340_v7  ;;  %18981 = vmatpush3.bf16.msra.mxu0 %v22427_v61  ;;  %v19006_v7 = vpack.c.bf16 %v9699_v44, %v9692_v50  ;;  %v10372_v49 = vand.u32 4294901760, %v10336_v12  ;;  %v10338_v50 = vld [vmem:[%s23372_s18 + $0x20] sm:$0xff]  ;;  %v10339_v44 = vld [vmem:[%s23372_s18 + $0x28] sm:$0xff] }
 0xa95   :  { %18983 = vmatprep.subr.bf16.mxu0 %v18982_v9  ;;  %v10378_v36 = vand.u32 4294901760, %v10338_v50  ;;  %v10381_v13 = vand.u32 4294901760, %v10339_v44 }
 0xa97   :  { %17421 = vmatmul.mubr.f32.gmra.mrb[54].mxu0 %v22333_v43  ;;  %v18994_v43 = vpack.c.bf16 %v9712_v63, %v9705_v37  ;;  %v22528_v20 = vpack.c.bf16 %v10381_v13, %v10378_v36  ;;  %v10520_v37 = vsub.f32 %v10518_v28, %v10519_v15 }
 0xa98   :  { %17423 = vmatprep.mubr.f32.mxu0 %v22358_v34  ;;  %v23603_v34 = vld [vmem:[#allocation8_spill] sm:$0xff] }
 0xa99   :  { %v10521_v16 = vand.u32 4294901760, %v10520_v37 }
 0xa9b   :  { %17424 = vmatmul.mubr.f32.gmra.mrb[56].mxu0 %v22352_v3  ;;  %v23602_v3 = vld [vmem:[#allocation29_spill] sm:$0xff] }
 0xa9c   :  { %17434 = vmatprep.mubr.f32.mxu0 %v23539_v40 }
 0xa9f   :  { %17435 = vmatmul.mubr.f32.vlgmr.msra.gmra.mrb[50].mxu0 %v23540_v42 }
 0xaa0   :  { %18985 = vmatpush3.bf16.msra.mxu0 %v18982_v9  ;;  %17437 = vmatprep.mubr.f32.mxu0 %v23541_v5  ;;  %v10532_v9 = vsub.f32 %v10336_v12, %v10372_v49 }
 0xaa1   :  { %18987 = vmatprep.subr.bf16.mxu0 %v18986_v54 }
 0xaa2   :  { %v10533_v30 = vand.u32 4294901760, %v10532_v9 }
 0xaa3   :  { %17438 = vmatmul.mubr.f32.gmra.mrb[52].mxu0 %v23542_v8 }
 0xaa4   :  { %17440 = vmatprep.mubr.f32.mxu0 %v23543_v47  ;;  %18989 = vmatpush3.bf16.msra.mxu0 %v18986_v54  ;;  %v10534_v54 = vsub.f32 %v10532_v9, %v10533_v30 }
 0xaa5   :  { %18991 = vmatprep.subr.bf16.mxu0 %v18990_v60 }
 0xaa7   :  { %17441 = vmatmul.mubr.f32.gmra.mrb[54].mxu0 %v23544_v51 }
 0xaa8   :  { %17443 = vmatprep.mubr.f32.mxu0 %v23545_v45 }
 0xaab   :  { %17444 = vmatmul.mubr.f32.gmra.mrb[56].mxu0 %v23546_v62 }
 0xaac   :  { %17454 = vmatprep.mubr.f32.mxu0 %v23547_v4 }
 0xaaf   :  { %17455 = vmatmul.mubr.f32.vlgmr.msra.gmra.mrb[50].mxu0 %v23548_v26 }
 0xab0   :  { %18993 = vmatpush3.bf16.msra.mxu0 %v18990_v60  ;;  %17457 = vmatprep.mubr.f32.mxu0 %v23549_v38 }
 0xab1   :  { %18995 = vmatprep.subr.bf16.mxu0 %v18994_v43 }
 0xab3   :  { %17458 = vmatmul.mubr.f32.gmra.mrb[52].mxu0 %v23550_v24 }
 0xab4   :  { %17460 = vmatprep.mubr.f32.mxu0 %v23551_v32  ;;  %18997 = vmatpush3.bf16.msra.mxu0 %v18994_v43  ;;  %v10546_v43 = vsub.f32 %v10338_v50, %v10378_v36 }
 0xab5   :  { %18999 = vmatprep.subr.bf16.mxu0 %v22396_v46 }
 0xab7   :  { %17461 = vmatmul.mubr.f32.gmra.mrb[54].mxu0 %v23552_v58 }
 0xab8   :  { %17463 = vmatprep.mubr.f32.mxu0 %v23553_v2 }
 0xabb   :  { %17464 = vmatmul.mubr.f32.gmra.mrb[56].mxu0 %v23554_v56 }
 0xabc   :  { %17474 = vmatprep.mubr.f32.mxu0 %v23555_v29 }
 0xabf   :  { %17475 = vmatmul.mubr.f32.vlgmr.msra.gmra.mrb[50].mxu0 %v23556_v25 }
 0xac0   :  { %19001 = vmatpush3.bf16.msra.mxu0 %v22396_v46  ;;  %17477 = vmatprep.mubr.f32.mxu0 %v23557_v57 }
 0xac1   :  { %19003 = vmatprep.subr.bf16.mxu0 %v22427_v61 }
 0xac3   :  { %17478 = vmatmul.mubr.f32.gmra.mrb[52].mxu0 %v23558_v22 }
 0xac4   :  { %17480 = vmatprep.mubr.f32.mxu0 %v23559_v59  ;;  %19005 = vmatpush3.bf16.msra.mxu0 %v22427_v61 }
 0xac5   :  { %19007 = vmatprep.subr.bf16.mxu0 %v19006_v7 }
 0xac7   :  { %17481 = vmatmul.mubr.f32.gmra.mrb[54].mxu0 %v23578_v19 }
 0xac8   :  { %17483 = vmatprep.mubr.f32.mxu0 %v23579_v10 }
 0xacb   :  { %17484 = vmatmul.mubr.f32.gmra.mrb[56].mxu0 %v23602_v3 }
 0xacc   :  { %17494 = vmatprep.mubr.f32.mxu0 %v23603_v34 }
 0xacf   :  { %17495 = vmatmul.mubr.f32.vlgmr.msra.gmra.mrb[50].mxu0 %v23604_v55 }
 0xad0   :  { %19009 = vmatpush3.bf16.msra.mxu0 %v19006_v7  ;;  %17497 = vmatprep.mubr.f32.mxu0 %v23605_v53  ;;  %v10553_v7 = vsub.f32 %v10339_v44, %v10381_v13 }
 0xad1   :  { %19011 = vmatprep.subr.bf16.mxu0 %v19010_v23 }
 0xad2   :  { %v22543_v50 = vpack.c.bf16 %v10553_v7, %v10546_v43 }
 0xad3   :  { %17498 = vmatmul.mubr.f32.gmra.mrb[52].mxu0 %v23606_v11 }
 0xad4   :  { %17500 = vmatprep.mubr.f32.mxu0 %v23607_v1  ;;  %19013 = vmatpush3.bf16.msra.mxu0 %v19010_v23  ;;  %v10535_v23 = vand.u32 4294901760, %v10534_v54  ;;  %v11967_v54 = vld [vmem:[%s23373_s12 + $0x8] sm:$0xff] }
 0xad5   :  { %19015 = vmatprep.subr.bf16.mxu0 %v22396_v46 }
 0xad7   :  { %17501 = vmatmul.mubr.f32.gmra.mrb[54].mxu0 %v23608_v21 }
 0xad8   :  { %17503 = vmatprep.mubr.f32.mxu0 %v23609_v27 }
 0xadb   :  { %17504 = vmatmul.mubr.f32.gmra.mrb[56].mxu0 %v23610_v41 }
 0xadc   :  { %17514 = vmatprep.mubr.f32.mxu0 %v23547_v4 }
 0xadf   :  { %17515 = vmatmul.mubr.f32.vlgmr.msra.gmra.mrb[50].mxu0 %v23548_v26 }
 0xae0   :  { %19017 = vmatpush3.bf16.msra.mxu0 %v22396_v46  ;;  %17517 = vmatprep.mubr.f32.mxu0 %v23549_v38  ;;  %v10369_v46 = vand.u32 4294901760, %v10335_v35 }
 0xae1   :  { %19019 = vmatprep.subr.bf16.mxu0 %v22427_v61 }
 0xae2   :  { %v22508_v52 = vpack.c.bf16 %v10369_v46, %v10366_v18  ;;  %v10554_v18 = vand.u32 4294901760, %v10553_v7 }
 0xae3   :  { %17518 = vmatmul.mubr.f32.gmra.mrb[52].mxu0 %v23550_v24 }
 0xae4   :  { %17520 = vmatprep.mubr.f32.mxu0 %v23551_v32  ;;  %19021 = vmatpush3.bf16.msra.mxu0 %v22427_v61  ;;  %v10525_v61 = vsub.f32 %v10335_v35, %v10369_v46  ;;  %v10547_v35 = vand.u32 4294901760, %v10546_v43 }
 0xae5   :  { %19023 = vmatprep.subr.bf16.mxu1 %v22508_v52 }
 0xae6   :  { %19025 = vmatpush3.bf16.msra.mxu1 %v22508_v52  ;;  %v10526_v6 = vand.u32 4294901760, %v10525_v61  ;;  %v10548_v12 = vsub.f32 %v10546_v43, %v10547_v35  ;;  %v22549_v13 = vpack.c.bf16 %v10554_v18, %v10547_v35 }
 0xae7   :  { %17521 = vmatmul.mubr.f32.gmra.mrb[54].mxu0 %v23552_v58 }
 0xae8   :  { %17523 = vmatprep.mubr.f32.mxu0 %v23553_v2  ;;  %v10527_v63 = vsub.f32 %v10525_v61, %v10526_v6  ;;  %v22545_v44 = vpack.c.bf16 %v10526_v6, %v10519_v15  ;;  %23613 = vst [vmem:[#allocation14_spill] sm:$0xff] %v22549_v13  ;;  %v11969_v15 = vld [vmem:[%s23373_s12 + $0x18] sm:$0x3] }
 0xaea   :  { %v10528_v0 = vand.u32 4294901760, %v10527_v63  ;;  %v22539_v63 = vpack.c.bf16 %v10525_v61, %v10518_v28  ;;  %23611 = vst [vmem:[#allocation7_spill] sm:$0xff] %v22545_v44  ;;  %v11968_v28 = vld [vmem:[%s23373_s12 + $0x10] sm:$0xff] }
 0xaeb   :  { %17524 = vmatmul.mubr.f32.gmra.mrb[56].mxu0 %v23554_v56  ;;  %v11980_v6 = vand.u32 4294901760, %v11968_v28 }
 0xaec   :  { %17534 = vmatprep.mubr.f32.mxu0 %v23547_v4  ;;  %v22532_v39 = vpack.c.bf16 %v10528_v0, %v10521_v16  ;;  %v11966_v0 = vld [vmem:[%s23373_s12] sm:$0xff] }
 0xaed   :  { %v11974_v61 = vand.u32 4294901760, %v11966_v0 }
 0xaef   :  { %17535 = vmatmul.mubr.f32.vlgmr.msra.gmra.mrb[50].mxu0 %v23548_v26 }
 0xaf0   :  { %17537 = vmatprep.mubr.f32.mxu0 %v23549_v38 }
 0xaf3   :  { %17538 = vmatmul.mubr.f32.gmra.mrb[52].mxu0 %v23550_v24 }
 0xaf4   :  { %17540 = vmatprep.mubr.f32.mxu0 %v23551_v32 }
 0xaf7   :  { %17541 = vmatmul.mubr.f32.gmra.mrb[54].mxu0 %v23552_v58 }
 0xaf8   :  { %17543 = vmatprep.mubr.f32.mxu0 %v23553_v2 }
 0xafb   :  { %17544 = vmatmul.mubr.f32.gmra.mrb[56].mxu0 %v23554_v56 }
 0xafc   :  { %17794 = vmatprep.mubr.f32.mxu0 %v23539_v40  ;;  %v10337_v40 = vld [vmem:[%s23372_s18 + $0x18] sm:$0xff] }
 0xafd   :  { %v10375_v17 = vand.u32 4294901760, %v10337_v40 }
 0xaff   :  { %v22518_v31 = vpack.c.bf16 %v10375_v17, %v10372_v49  ;;  %v10539_v48 = vsub.f32 %v10337_v40, %v10375_v17  ;;  %v10555_v40 = vsub.f32 %v10553_v7, %v10554_v18  ;;  %v10549_v49 = vand.u32 4294901760, %v10548_v12 }
 0xb00   :  { %v22570_v7 = vsub.f32 %v11968_v28, %v11980_v6 }
 0xb01   :  { %19027 = vmatprep.subr.bf16.mxu1 %v22518_v31  ;;  %v10540_v33 = vand.u32 4294901760, %v10539_v48  ;;  %v10556_v17 = vand.u32 4294901760, %v10555_v40  ;;  %v22541_v16 = vpack.c.bf16 %v10539_v48, %v10532_v9  ;;  %v11977_v9 = vand.u32 4294901760, %v11967_v54 }
 0xb02   :  { %19029 = vmatpush3.bf16.msra.mxu1 %v22518_v31  ;;  %v23465_v12 = vand.u32 4294901760, %v22570_v7 }
 0xb03   :  { %19031 = vmatprep.subr.bf16.mxu1 %v22528_v20  ;;  %v10541_v60 = vsub.f32 %v10539_v48, %v10540_v33  ;;  %v22537_v37 = vpack.c.bf16 %v10556_v17, %v10549_v49  ;;  %v22547_v36 = vpack.c.bf16 %v10540_v33, %v10533_v30  ;;  %v11971_v48 = vsel %vm117_vm0, %v11969_v15, 0 }
 0xb04   :  { %v22564_v30 = vpack.c.bf16 %v11977_v9, %v11974_v61  ;;  %v11983_v33 = vand.u32 4294901760, %v11971_v48  ;;  %v22568_v43 = vsub.f32 %v11967_v54, %v11977_v9 }
 0xb05   :  { %v10542_v14 = vand.u32 4294901760, %v10541_v60  ;;  %23612 = vst [vmem:[#allocation13_spill] sm:$0xff] %v22547_v36  ;;  %v22566_v60 = vsub.f32 %v11966_v0, %v11974_v61  ;;  %v12140_v0 = vsub.f32 %v22570_v7, %v23465_v12 }
 0xb06   :  { %19033 = vmatpush3.bf16.msra.mxu1 %v22528_v20  ;;  %19119 = vmatprep.subr.bf16.mxu0 %v22564_v30  ;;  %v23466_v35 = vand.u32 4294901760, %v22568_v43  ;;  %v22577_v18 = vsub.f32 %v11971_v48, %v11983_v33 }
 0xb07   :  { %19035 = vmatprep.subr.bf16.mxu1 %v22532_v39  ;;  %v22535_v46 = vpack.c.bf16 %v10542_v14, %v10535_v23  ;;  %v22573_v23 = vpack.c.bf16 %v11983_v33, %v11980_v6  ;;  %v23467_v14 = vand.u32 4294901760, %v22566_v60  ;;  %19121 = vmatpush3.bf16.msra.mxu0 %v22564_v30  ;;  %v12141_v9 = vand.u32 4294901760, %v12140_v0  ;;  %v14449_v33 = vld [vmem:[%s23374_s8] ss:$0 sm:$0xff] }
 0xb08   :  { %v12133_v49 = vsub.f32 %v22568_v43, %v23466_v35  ;;  %v23464_v17 = vand.u32 4294901760, %v22577_v18 }
 0xb09   :  { %19123 = vmatprep.subr.bf16.mxu0 %v22573_v23  ;;  %v12126_v40 = vsub.f32 %v22566_v60, %v23467_v14 }
 0xb0a   :  { %v12134_v28 = vand.u32 4294901760, %v12133_v49  ;;  %v12147_v61 = vsub.f32 %v22577_v18, %v23464_v17  ;;  %v23614_v49 = vld [vmem:[#allocation16_spill] sm:$0xff] }
 0xb0b   :  { %v12127_v54 = vand.u32 4294901760, %v12126_v40  ;;  %19125 = vmatpush3.bf16.msra.mxu0 %v22573_v23  ;;  %v19134_v40 = vpack.c.bf16 %v22568_v43, %v22566_v60  ;;  %v19332_v0 = vadd.f32 %v23614_v49, %v14449_v33 }
 0xb0c   :  { %v12148_v6 = vand.u32 4294901760, %v12147_v61 }
 0xb0d   :  { %v19126_v15 = vpack.c.bf16 %v12134_v28, %v12127_v54 }
 0xb0e   :  { %17795 = vmatmul.mubr.f32.vlgmr.msra.gmra.mrb[58].mxu0 %v23540_v42  ;;  %v19130_v48 = vpack.c.bf16 %v12148_v6, %v12141_v9  ;;  %v23615_v42 = vld [vmem:[#allocation19_spill] sm:$0xff] }
 0xb0f   :  { %19127 = vmatprep.subr.bf16.mxu0 %v19126_v15  ;;  %17797 = vmatprep.mubr.f32.mxu0 %v23541_v5  ;;  %v19333_v54 = vadd.f32 %v14449_v33, %v23615_v42 }
 0xb10   :  { %19129 = vmatpush3.bf16.msra.mxu0 %v19126_v15  ;;  %v23616_v15 = vld [vmem:[#allocation20_spill] sm:$0xff] }
 0xb11   :  { %19131 = vmatprep.subr.bf16.mxu0 %v19130_v48  ;;  %v19334_v6 = vadd.f32 %v23616_v15, %v14449_v33 }
 0xb12   :  { %17798 = vmatmul.mubr.f32.gmra.mrb[60].mxu0 %v23542_v8  ;;  %v23617_v8 = vld [vmem:[#allocation23_spill] sm:$0xff] }
 0xb13   :  { %17800 = vmatprep.mubr.f32.mxu0 %v23543_v47  ;;  %v19335_v49 = vadd.f32 %v14449_v33, %v23617_v8 }
 0xb14   :  { %19133 = vmatpush3.bf16.msra.mxu0 %v19130_v48 }
 0xb15   :  { %19135 = vmatprep.subr.bf16.mxu0 %v19134_v40 }
 0xb16   :  { %17801 = vmatmul.mubr.f32.gmra.mrb[62].mxu0 %v23544_v51 }
 0xb17   :  { %17803 = vmatprep.mubr.f32.mxu0 %v23545_v45  ;;  %v23619_v45 = vld [vmem:[#allocation28_spill] sm:$0xff] }
 0xb18   :  { %v19337_v15 = vadd.f32 %v14449_v33, %v23619_v45 }
 0xb1a   :  { %17804 = vmatmul.mubr.f32.gmra.mrb[64].mxu0 %v23546_v62  ;;  %v19138_v62 = vpack.c.bf16 %v22577_v18, %v22570_v7 }
 0xb1b   :  { %17814 = vmatprep.mubr.f32.mxu0 %v23547_v4 }
 0xb1e   :  { %17815 = vmatmul.mubr.f32.vlgmr.msra.gmra.mrb[58].mxu0 %v23548_v26 }
 0xb1f   :  { %17817 = vmatprep.mubr.f32.mxu0 %v23549_v38  ;;  %19137 = vmatpush3.bf16.msra.mxu0 %v19134_v40 }
 0xb20   :  { %19139 = vmatprep.subr.bf16.mxu0 %v19138_v62 }
 0xb22   :  { %17818 = vmatmul.mubr.f32.gmra.mrb[60].mxu0 %v23550_v24 }
 0xb23   :  { %17820 = vmatprep.mubr.f32.mxu0 %v23551_v32  ;;  %19141 = vmatpush3.bf16.msra.mxu0 %v19138_v62 }
 0xb24   :  { %19143 = vmatprep.subr.bf16.mxu0 %v22564_v30 }
 0xb26   :  { %17821 = vmatmul.mubr.f32.gmra.mrb[62].mxu0 %v23552_v58 }
 0xb27   :  { %17823 = vmatprep.mubr.f32.mxu0 %v23553_v2 }
 0xb2a   :  { %17824 = vmatmul.mubr.f32.gmra.mrb[64].mxu0 %v23554_v56 }
 0xb2b   :  { %17834 = vmatprep.mubr.f32.mxu0 %v23555_v29  ;;  %v23634_v29 = vand.u32 4294901760, %v22566_v60 }
 0xb2e   :  { %17835 = vmatmul.mubr.f32.vlgmr.msra.gmra.mrb[58].mxu0 %v23556_v25  ;;  %v23635_v25 = vand.u32 4294901760, %v22568_v43 }
 0xb2f   :  { %17837 = vmatprep.mubr.f32.mxu0 %v23557_v57  ;;  %19145 = vmatpush3.bf16.msra.mxu0 %v22564_v30  ;;  %v23636_v57 = vand.u32 4294901760, %v22570_v7 }
 0xb30   :  { %19147 = vmatprep.subr.bf16.mxu0 %v22573_v23 }
 0xb32   :  { %17838 = vmatmul.mubr.f32.gmra.mrb[60].mxu0 %v23558_v22  ;;  %v23637_v22 = vand.u32 4294901760, %v22577_v18 }
 0xb33   :  { %17840 = vmatprep.mubr.f32.mxu0 %v23559_v59  ;;  %19149 = vmatpush3.bf16.msra.mxu0 %v22573_v23 }
 0xb34   :  { %v19154_v59 = vpack.c.bf16 %v23637_v22, %v23636_v57 }
 0xb36   :  { %17841 = vmatmul.mubr.f32.gmra.mrb[62].mxu0 %v23578_v19  ;;  %v23638_v19 = vld [vmem:[#allocation2_spill] sm:$0xff] }
 0xb37   :  { %17843 = vmatprep.mubr.f32.mxu0 %v23579_v10  ;;  %v23639_v10 = vld [vmem:[#allocation7_spill] sm:$0xff] }
 0xb3a   :  { %17844 = vmatmul.mubr.f32.gmra.mrb[64].mxu0 %v23602_v3  ;;  %v23640_v3 = vld [vmem:[#allocation3_spill] sm:$0xff] }
 0xb3b   :  { %17854 = vmatprep.mubr.f32.mxu0 %v23603_v34  ;;  %v23641_v34 = vld [vmem:[#allocation5_spill] sm:$0xff] }
 0xb3e   :  { %17855 = vmatmul.mubr.f32.vlgmr.msra.gmra.mrb[58].mxu0 %v23604_v55 }
 0xb3f   :  { %17857 = vmatprep.mubr.f32.mxu0 %v23605_v53 }
 0xb42   :  { %17858 = vmatmul.mubr.f32.gmra.mrb[60].mxu0 %v23606_v11  ;;  %v23644_v11 = vld [vmem:[#allocation13_spill] sm:$0xff] }
 0xb43   :  { %17860 = vmatprep.mubr.f32.mxu0 %v23607_v1  ;;  %v23645_v1 = vld [vmem:[#allocation14_spill] sm:$0xff] }
 0xb46   :  { %17861 = vmatmul.mubr.f32.gmra.mrb[62].mxu0 %v23608_v21  ;;  %v11178_v21 = vld [vmem:[%s23375_s15 + $0x8] sm:$0xf] }
 0xb47   :  { %17863 = vmatprep.mubr.f32.mxu0 %v23609_v27  ;;  %v11177_v27 = vld [vmem:[%s23375_s15] sm:$0xff] }
 0xb4a   :  { %17864 = vmatmul.mubr.f32.gmra.mrb[64].mxu0 %v23610_v41  ;;  %v11204_v41 = vsel %vm7940_vm3, %v11178_v21, 0 }
 0xb4b   :  { %17874 = vmatprep.mubr.f32.mxu0 %v23638_v19 }
 0xbc2   :  { %v17536_v28 = vpop.f32.mrb[50].mxu0 }
 0xbc3   :  { %v10327_v5 = vmul.f32 %v19332_v0, %v17536_v28  ;;  %v10280_v61 = vpop.f32.mrb[51].mxu0 }
 0xbc4   :  { %v10326_v9 = vmul.f32 %v19333_v54, %v10280_v61 }
 0xbc5   :  { %v10345_v17 = vsel %vm10340_vm6, %v10327_v5, 0  ;;  %v23618_v5 = vld [vmem:[#allocation26_spill] sm:$0xff] }
 0xbc6   :  { %v22612_v47 = vand.u32 4294901760, %v10345_v17  ;;  %v10342_v48 = vsel %vm10340_vm6, %v10326_v9, 0  ;;  %v17539_v42 = vpop.f32.mrb[52].mxu0  ;;  %v19336_v61 = vadd.f32 %v23618_v5, %v14449_v33 }
 0xbc7   :  { %v22615_v12 = vand.u32 4294901760, %v10342_v48  ;;  %v10329_v0 = vmul.f32 %v19334_v6, %v17539_v42  ;;  %v10292_v28 = vpop.f32.mrb[53].mxu0 }
 0xbc8   :  { %v22618_v54 = vsub.f32 %v10345_v17, %v22612_v47  ;;  %v10328_v51 = vmul.f32 %v19335_v49, %v10292_v28 }
 0xbc9   :  { %v22624_v8 = vsub.f32 %v10342_v48, %v22615_v12  ;;  %v10351_v9 = vsel %vm10340_vm6, %v10329_v0, 0 }
 0xbca   :  { %v22629_v6 = vand.u32 4294901760, %v22618_v54  ;;  %v22631_v42 = vand.u32 4294901760, %v10351_v9  ;;  %v10348_v17 = vsel %vm10340_vm6, %v10328_v51, 0  ;;  %v17542_v49 = vpop.f32.mrb[54].mxu0  ;;  %v23622_v51 = vld [vmem:[#allocation32_spill] sm:$0xff] }
 0xbcb   :  { %v22636_v28 = vand.u32 4294901760, %v10348_v17  ;;  %v10331_v5 = vmul.f32 %v19336_v61, %v17542_v49  ;;  %v10304_v48 = vpop.f32.mrb[55].mxu0  ;;  %v22639_v45 = vand.u32 4294901760, %v22624_v8  ;;  %v19338_v13 = vadd.f32 %v23622_v51, %v14449_v33 }
 0xbcc   :  { %23620 = vst [vmem:[#allocation24_spill] sm:$0xff] %v22629_v6  ;;  %v10449_v0 = vsub.f32 %v22618_v54, %v22629_v6  ;;  %v22644_v35 = vsub.f32 %v10351_v9, %v22631_v42  ;;  %v10330_v14 = vmul.f32 %v19337_v15, %v10304_v48  ;;  %v23623_v6 = vld [vmem:[#allocation33_spill] sm:$0xff] }
 0xbcd   :  { %23621 = vst [vmem:[#allocation25_spill] sm:$0xff] %v22639_v45  ;;  %v22649_v36 = vsub.f32 %v10348_v17, %v22636_v28  ;;  %v10357_v61 = vsel %vm10340_vm6, %v10331_v5, 0  ;;  %v10439_v49 = vsub.f32 %v22624_v8, %v22639_v45  ;;  %v19339_v44 = vadd.f32 %v14449_v33, %v23623_v6 }
 0xbce   :  { %v22656_v9 = vand.u32 4294901760, %v10357_v61  ;;  %v10354_v15 = vsel %vm10340_vm6, %v10330_v14, 0  ;;  %v17545_v48 = vpop.f32.mrb[56].mxu0  ;;  %v22660_v51 = vand.u32 4294901760, %v22644_v35  ;;  %v22672_v6 = vand.u32 4294901760, %v10449_v0 }
 0xbcf   :  { %v22662_v17 = vand.u32 4294901760, %v10354_v15  ;;  %v10333_v5 = vmul.f32 %v19338_v13, %v17545_v48  ;;  %v10316_v26 = vpop.f32.mrb[57].mxu0  ;;  %v22664_v4 = vand.u32 4294901760, %v10439_v49  ;;  %v22667_v45 = vand.u32 4294901760, %v22649_v36 }
 0xbd0   :  { %23624 = vst [vmem:[#allocation4_spill] sm:$0xff] %v22660_v51  ;;  %v22670_v33 = vsub.f32 %v10357_v61, %v22656_v9  ;;  %v10332_v40 = vmul.f32 %v19339_v44, %v10316_v26  ;;  %23626 = vst [vmem:[#allocation9_spill] sm:$0xff] %v22672_v6  ;;  %v10469_v14 = vsub.f32 %v22644_v35, %v22660_v51 }
 0xbd1   :  { %23625 = vst [vmem:[#allocation6_spill] sm:$0xff] %v22667_v45  ;;  %v22678_v38 = vsub.f32 %v10354_v15, %v22662_v17  ;;  %v10363_v13 = vsel %vm10340_vm6, %v10333_v5, 0  ;;  %17558 = vmatprep.mubr.f32.mxu1 %v22664_v4  ;;  %v10459_v49 = vsub.f32 %v22649_v36, %v22667_v45 }
 0xbd2   :  { %v22685_v26 = vand.u32 4294901760, %v10363_v13  ;;  %v10360_v44 = vsel %vm10340_vm6, %v10332_v40, 0  ;;  %17559 = vmatmul.mubr.f32.vlgmr.msra.gmra.mrb[40].mxu1 %v22672_v6  ;;  %v22690_v0 = vand.u32 4294901760, %v22670_v33  ;;  %v22704_v40 = vand.u32 4294901760, %v10469_v14 }
 0xbd3   :  { %v22692_v61 = vand.u32 4294901760, %v10360_v44  ;;  %19037 = vmatpush3.bf16.msra.mxu1 %v22532_v39  ;;  %v22695_v15 = vand.u32 4294901760, %v10459_v49  ;;  %v22698_v48 = vand.u32 4294901760, %v22678_v38  ;;  %v23643_v53 = vld [vmem:[#allocation24_spill] sm:$0xff] }
 0xbd4   :  { %23627 = vst [vmem:[#allocation11_spill] sm:$0xff] %v22690_v0  ;;  %v22702_v5 = vsub.f32 %v10363_v13, %v22685_v26  ;;  %19039 = vmatprep.subr.bf16.mxu1 %v22535_v46  ;;  %v10489_v62 = vsub.f32 %v22670_v33, %v22690_v0  ;;  %v23642_v55 = vld [vmem:[#allocation25_spill] sm:$0xff] }
 0xbd5   :  { %23628 = vst [vmem:[#allocation17_spill] sm:$0xff] %v22695_v15  ;;  %23629 = vst [vmem:[#allocation18_spill] sm:$0xff] %v22698_v48  ;;  %v22711_v39 = vsub.f32 %v10360_v44, %v22692_v61  ;;  %17561 = vmatprep.mubr.f32.mxu1 %v22695_v15  ;;  %v10479_v49 = vsub.f32 %v22678_v38, %v22698_v48 }
 0xbd6   :  { %23630 = vst [vmem:[#allocation27_spill] sm:$0xff] %v22702_v5  ;;  %17562 = vmatmul.mubr.f32.gmra.mrb[42].mxu1 %v22704_v40  ;;  %v22719_v14 = vand.u32 4294901760, %v22702_v5  ;;  %v22727_v44 = vand.u32 4294901760, %v10489_v62 }
 0xbd7   :  { %23631 = vst [vmem:[#allocation29_spill] sm:$0xff] %v22711_v39  ;;  %v22721_v13 = vand.u32 4294901760, %v10479_v49  ;;  %19041 = vmatpush3.bf16.msra.mxu1 %v22535_v46  ;;  %v22725_v6 = vand.u32 4294901760, %v22711_v39 }
 0xbd8   :  { %23632 = vst [vmem:[#allocation8_spill] sm:$0xff] %v22719_v14  ;;  %19043 = vmatprep.subr.bf16.mxu1 %v22537_v37  ;;  %v10509_v15 = vsub.f32 %v22702_v5, %v22719_v14 }
 0xbd9   :  { %23633 = vst [vmem:[#allocation10_spill] sm:$0xff] %v22725_v6  ;;  %17564 = vmatprep.mubr.f32.mxu1 %v22721_v13  ;;  %v10499_v49 = vsub.f32 %v22711_v39, %v22725_v6 }
 0xbda   :  { %17565 = vmatmul.mubr.f32.gmra.mrb[44].mxu1 %v22727_v44  ;;  %v22741_v62 = vand.u32 4294901760, %v10509_v15 }
 0xbdb   :  { %v22738_v46 = vand.u32 4294901760, %v10499_v49  ;;  %19045 = vmatpush3.bf16.msra.mxu1 %v22537_v37  ;;  %v19150_v37 = vpack.c.bf16 %v23635_v25, %v23634_v29 }
 0xbdc   :  { %19047 = vmatprep.subr.bf16.mxu1 %v22539_v63 }
 0xbdd   :  { %17567 = vmatprep.mubr.f32.mxu1 %v22738_v46  ;;  %19151 = vmatprep.subr.bf16.mxu0 %v19150_v37 }
 0xbde   :  { %17568 = vmatmul.mubr.f32.gmra.mrb[46].mxu1 %v22741_v62  ;;  %19153 = vmatpush3.bf16.msra.mxu0 %v19150_v37 }
 0xbdf   :  { %17582 = vmatprep.mubr.f32.mxu1 %v22615_v12  ;;  %19155 = vmatprep.subr.bf16.mxu0 %v19154_v59 }
 0xbe2   :  { %17583 = vmatmul.mubr.f32.vlgmr.msra.gmra.mrb[40].mxu1 %v22612_v47  ;;  %19157 = vmatpush3.bf16.msra.mxu0 %v19154_v59 }
 0xbe3   :  { %17585 = vmatprep.mubr.f32.mxu1 %v22636_v28  ;;  %19049 = vmatpush3.bf16.msra.mxu1 %v22539_v63  ;;  %v11207_v63 = vand.u32 4294901760, %v11177_v27 }
 0xbe4   :  { %19051 = vmatprep.subr.bf16.mxu1 %v22541_v16  ;;  %19159 = vmatprep.subr.bf16.mxu0 %v22564_v30 }
 0xbe5   :  { %17875 = vmatmul.mubr.f32.vlgmr.msra.gmra.mrb[58].mxu0 %v23640_v3 }
 0xbe6   :  { %17586 = vmatmul.mubr.f32.gmra.mrb[42].mxu1 %v22631_v42  ;;  %17877 = vmatprep.mubr.f32.mxu0 %v23641_v34 }
 0xbe7   :  { %17588 = vmatprep.mubr.f32.mxu1 %v22662_v17  ;;  %19053 = vmatpush3.bf16.msra.mxu1 %v22541_v16  ;;  %v11210_v16 = vand.u32 4294901760, %v11204_v41 }
 0xbe8   :  { %19055 = vmatprep.subr.bf16.mxu1 %v22543_v50  ;;  %19161 = vmatpush3.bf16.msra.mxu0 %v22564_v30 }
 0xbe9   :  { %19163 = vmatprep.subr.bf16.mxu0 %v22573_v23  ;;  %17878 = vmatmul.mubr.f32.gmra.mrb[60].mxu0 %v23550_v24 }
 0xbea   :  { %17589 = vmatmul.mubr.f32.gmra.mrb[44].mxu1 %v22656_v9  ;;  %17880 = vmatprep.mubr.f32.mxu0 %v23551_v32 }
 0xbeb   :  { %17591 = vmatprep.mubr.f32.mxu1 %v22692_v61  ;;  %19057 = vmatpush3.bf16.msra.mxu1 %v22543_v50 }
 0xbec   :  { %19059 = vmatprep.subr.bf16.mxu1 %v22508_v52  ;;  %19165 = vmatpush3.bf16.msra.mxu0 %v22573_v23 }
 0xbed   :  { %17881 = vmatmul.mubr.f32.gmra.mrb[62].mxu0 %v23552_v58 }
 0xbee   :  { %17592 = vmatmul.mubr.f32.gmra.mrb[46].mxu1 %v22685_v26  ;;  %17883 = vmatprep.mubr.f32.mxu0 %v23553_v2 }
 0xbef   :  { %17606 = vmatprep.mubr.f32.mxu1 %v22624_v8 }
 0xbf1   :  { %17884 = vmatmul.mubr.f32.gmra.mrb[64].mxu0 %v23554_v56 }
 0xbf2   :  { %17607 = vmatmul.mubr.f32.vlgmr.msra.gmra.mrb[40].mxu1 %v22618_v54  ;;  %17894 = vmatprep.mubr.f32.mxu0 %v23638_v19 }
 0xbf3   :  { %17609 = vmatprep.mubr.f32.mxu1 %v22649_v36  ;;  %19061 = vmatpush3.bf16.msra.mxu1 %v22508_v52 }
 0xbf4   :  { %19063 = vmatprep.subr.bf16.mxu1 %v22518_v31 }
 0xbf5   :  { %17895 = vmatmul.mubr.f32.vlgmr.msra.gmra.mrb[58].mxu0 %v23640_v3 }
 0xbf6   :  { %17610 = vmatmul.mubr.f32.gmra.mrb[42].mxu1 %v22644_v35  ;;  %17897 = vmatprep.mubr.f32.mxu0 %v23641_v34 }
 0xbf7   :  { %17612 = vmatprep.mubr.f32.mxu1 %v22678_v38  ;;  %19065 = vmatpush3.bf16.msra.mxu1 %v22518_v31 }
 0xbf8   :  { %19067 = vmatprep.subr.bf16.mxu1 %v22528_v20 }
 0xbf9   :  { %17898 = vmatmul.mubr.f32.gmra.mrb[60].mxu0 %v23550_v24  ;;  %v22849_v24 = vpack.c.bf16 %v11210_v16, %v11207_v63 }
 0xbfa   :  { %17613 = vmatmul.mubr.f32.gmra.mrb[44].mxu1 %v22670_v33  ;;  %17900 = vmatprep.mubr.f32.mxu0 %v23551_v32  ;;  %v11355_v32 = vsub.f32 %v11177_v27, %v11207_v63 }
 0xbfb   :  { %17615 = vmatprep.mubr.f32.mxu1 %v22711_v39  ;;  %19069 = vmatpush3.bf16.msra.mxu1 %v22528_v20 }
 0xbfc   :  { %19071 = vmatprep.subr.bf16.mxu1 %v23639_v10 }
 0xbfd   :  { %17901 = vmatmul.mubr.f32.gmra.mrb[62].mxu0 %v23552_v58  ;;  %v11362_v58 = vsub.f32 %v11204_v41, %v11210_v16 }
 0xbfe   :  { %17616 = vmatmul.mubr.f32.gmra.mrb[46].mxu1 %v22702_v5  ;;  %17903 = vmatprep.mubr.f32.mxu0 %v23553_v2  ;;  %v11356_v2 = vand.u32 4294901760, %v11355_v32 }
 0xbff   :  { %17630 = vmatprep.mubr.f32.mxu1 %v23642_v55  ;;  %v22866_v60 = vpack.c.bf16 %v11362_v58, %v11355_v32 }
 0xc01   :  { %17904 = vmatmul.mubr.f32.gmra.mrb[64].mxu0 %v23554_v56  ;;  %v11363_v56 = vand.u32 4294901760, %v11362_v58 }
 0xc02   :  { %17631 = vmatmul.mubr.f32.vlgmr.msra.gmra.mrb[40].mxu1 %v23643_v53 }
 0xc03   :  { %17633 = vmatprep.mubr.f32.mxu1 %v22667_v45  ;;  %19073 = vmatpush3.bf16.msra.mxu1 %v23639_v10  ;;  %v22868_v43 = vpack.c.bf16 %v11363_v56, %v11356_v2 }
 0xc04   :  { %19075 = vmatprep.subr.bf16.mxu1 %v23644_v11 }
 0xc06   :  { %17634 = vmatmul.mubr.f32.gmra.mrb[42].mxu1 %v22660_v51 }
 0xc07   :  { %17636 = vmatprep.mubr.f32.mxu1 %v22698_v48  ;;  %19077 = vmatpush3.bf16.msra.mxu1 %v23644_v11 }
 0xc08   :  { %19079 = vmatprep.subr.bf16.mxu1 %v23645_v1 }
 0xc0a   :  { %17637 = vmatmul.mubr.f32.gmra.mrb[44].mxu1 %v22690_v0 }
 0xc0b   :  { %17639 = vmatprep.mubr.f32.mxu1 %v22725_v6  ;;  %19081 = vmatpush3.bf16.msra.mxu1 %v23645_v1 }
 0xc0c   :  { %19083 = vmatprep.subr.bf16.mxu1 %v22508_v52 }
 0xc0e   :  { %17640 = vmatmul.mubr.f32.gmra.mrb[46].mxu1 %v22719_v14 }
 0xc0f   :  { %17654 = vmatprep.mubr.f32.mxu1 %v22615_v12 }
 0xc12   :  { %17655 = vmatmul.mubr.f32.vlgmr.msra.gmra.mrb[40].mxu1 %v22612_v47 }
 0xc13   :  { %17657 = vmatprep.mubr.f32.mxu1 %v22636_v28  ;;  %19085 = vmatpush3.bf16.msra.mxu1 %v22508_v52  ;;  %v11357_v52 = vsub.f32 %v11355_v32, %v11356_v2 }
 0xc14   :  { %19087 = vmatprep.subr.bf16.mxu1 %v22518_v31 }
 0xc16   :  { %17658 = vmatmul.mubr.f32.gmra.mrb[42].mxu1 %v22631_v42 }
 0xc17   :  { %17660 = vmatprep.mubr.f32.mxu1 %v22662_v17  ;;  %19089 = vmatpush3.bf16.msra.mxu1 %v22518_v31  ;;  %v11364_v31 = vsub.f32 %v11362_v58, %v11363_v56 }
 0xc18   :  { %19091 = vmatprep.subr.bf16.mxu1 %v22528_v20 }
 0xc19   :  { %v11365_v50 = vand.u32 4294901760, %v11364_v31 }
 0xc1a   :  { %17661 = vmatmul.mubr.f32.gmra.mrb[44].mxu1 %v22656_v9 }
 0xc1b   :  { %17663 = vmatprep.mubr.f32.mxu1 %v22692_v61  ;;  %19093 = vmatpush3.bf16.msra.mxu1 %v22528_v20  ;;  %v11358_v20 = vand.u32 4294901760, %v11357_v52 }
 0xc1c   :  { %19095 = vmatprep.subr.bf16.mxu1 %v22849_v24 }
 0xc1d   :  { %v19098_v30 = vpack.c.bf16 %v11365_v50, %v11358_v20 }
 0xc1e   :  { %17664 = vmatmul.mubr.f32.gmra.mrb[46].mxu1 %v22685_v26 }
 0xc1f   :  { %17678 = vmatprep.mubr.f32.mxu1 %v22615_v12 }
 0xc22   :  { %17679 = vmatmul.mubr.f32.vlgmr.msra.gmra.mrb[40].mxu1 %v22612_v47 }
 0xc23   :  { %17681 = vmatprep.mubr.f32.mxu1 %v22636_v28  ;;  %19097 = vmatpush3.bf16.msra.mxu1 %v22849_v24 }
 0xc24   :  { %19099 = vmatprep.subr.bf16.mxu1 %v19098_v30 }
 0xc26   :  { %17682 = vmatmul.mubr.f32.gmra.mrb[42].mxu1 %v22631_v42 }
 0xc27   :  { %17684 = vmatprep.mubr.f32.mxu1 %v22662_v17 }
 0xc2a   :  { %17685 = vmatmul.mubr.f32.gmra.mrb[44].mxu1 %v22656_v9 }
 0xc2b   :  { %17687 = vmatprep.mubr.f32.mxu1 %v22692_v61 }
 0xc2e   :  { %17688 = vmatmul.mubr.f32.gmra.mrb[46].mxu1 %v22685_v26 }
 0xcc8   :  { %v22870_v7 = vpop.f32.mrb[58].mxu0 }
 0xcc9   :  { %v22872_v23 = vpop.f32.mrb[59].mxu0 }
 0xccc   :  { %v22874_v18 = vpop.f32.mrb[60].mxu0 }
 0xccd   :  { %v22876_v15 = vpop.f32.mrb[61].mxu0 }
 0xcd0   :  { %v22878_v49 = vpop.f32.mrb[62].mxu0 }
 0xcd1   :  { %v22880_v29 = vpop.f32.mrb[63].mxu0 }
 0xcd4   :  { %v22882_v25 = vpop.f32.mrb[64].mxu0 }
 0xcd5   :  { %v22884_v37 = vpop.f32.mrb[65].mxu0 }
 0xcf5   :  { %v17680_v57 = vpop.f32.mrb[40].mxu1 }
 0xcf6   :  { %v11183_v22 = vsel %vm8749_vm5, %v17680_v57, 0  ;;  %v11131_v59 = vpop.f32.mrb[41].mxu1 }
 0xcf7   :  { %v22887_v19 = vand.u32 4294901760, %v11183_v22  ;;  %v11180_v10 = vsel %vm8749_vm5, %v11131_v59, 0 }
 0xcf8   :  { %v22890_v3 = vand.u32 4294901760, %v11180_v10 }
 0xcf9   :  { %v22893_v34 = vsub.f32 %v11183_v22, %v22887_v19  ;;  %v17683_v11 = vpop.f32.mrb[42].mxu1 }
 0xcfa   :  { %v22896_v1 = vsub.f32 %v11180_v10, %v22890_v3  ;;  %v11189_v21 = vsel %vm8749_vm5, %v17683_v11, 0  ;;  %v11143_v27 = vpop.f32.mrb[43].mxu1 }
 0xcfb   :  { %v23480_v41 = vand.u32 4294901760, %v22893_v34  ;;  %v22900_v63 = vand.u32 4294901760, %v11189_v21  ;;  %v11186_v16 = vsel %vm8749_vm5, %v11143_v27, 0 }
 0xcfc   :  { %v23481_v32 = vand.u32 4294901760, %v22896_v1  ;;  %v22904_v58 = vand.u32 4294901760, %v11186_v16 }
 0xcfd   :  { %v11286_v2 = vsub.f32 %v22893_v34, %v23480_v41  ;;  %v22910_v56 = vsub.f32 %v11189_v21, %v22900_v63  ;;  %v17686_v52 = vpop.f32.mrb[44].mxu1 }
 0xcfe   :  { %v22913_v31 = vsub.f32 %v11186_v16, %v22904_v58  ;;  %v11195_v20 = vsel %vm8749_vm5, %v17686_v52, 0  ;;  %v11155_v50 = vpop.f32.mrb[45].mxu1  ;;  %v11276_v57 = vsub.f32 %v22896_v1, %v23481_v32 }
 0xcff   :  { %v23487_v22 = vand.u32 4294901760, %v22910_v56  ;;  %v22920_v59 = vand.u32 4294901760, %v11195_v20  ;;  %v11192_v10 = vsel %vm8749_vm5, %v11155_v50, 0  ;;  %v11287_v16 = vand.u32 4294901760, %v11286_v2 }
 0xd00   :  { %v11295_v11 = vand.u32 4294901760, %v22913_v31  ;;  %v22924_v21 = vand.u32 4294901760, %v11192_v10  ;;  %v11277_v27 = vand.u32 4294901760, %v11276_v57 }
 0xd01   :  { %v22927_v41 = vsub.f32 %v11195_v20, %v22920_v59  ;;  %v17689_v52 = vpop.f32.mrb[46].mxu1  ;;  %v11306_v32 = vsub.f32 %v22910_v56, %v23487_v22 }
 0xd02   :  { %v11314_v14 = vsub.f32 %v11192_v10, %v22924_v21  ;;  %v11201_v6 = vsel %vm8749_vm5, %v17689_v52, 0  ;;  %v11167_v0 = vpop.f32.mrb[47].mxu1  ;;  %17694 = vmatprep.mubr.f32.mxu1 %v11277_v27  ;;  %v11296_v50 = vsub.f32 %v22913_v31, %v11295_v11 }
 0xd03   :  { %v11325_v48 = vand.u32 4294901760, %v22927_v41  ;;  %v22936_v57 = vand.u32 4294901760, %v11201_v6  ;;  %v11198_v2 = vsel %vm8749_vm5, %v11167_v0, 0  ;;  %17695 = vmatmul.mubr.f32.vlgmr.msra.gmra.mrb[48].mxu1 %v11287_v16  ;;  %v11307_v45 = vand.u32 4294901760, %v11306_v32 }
 0xd04   :  { %v11315_v20 = vand.u32 4294901760, %v11314_v14  ;;  %v22939_v51 = vand.u32 4294901760, %v11198_v2  ;;  %19101 = vmatpush3.bf16.msra.mxu1 %v19098_v30  ;;  %v11297_v22 = vand.u32 4294901760, %v11296_v50 }
 0xd05   :  { %v11344_v10 = vsub.f32 %v11201_v6, %v22936_v57  ;;  %v11326_v52 = vsub.f32 %v22927_v41, %v11325_v48  ;;  %19103 = vmatprep.subr.bf16.mxu1 %v22866_v60 }
 0xd06   :  { %v11334_v27 = vsub.f32 %v11198_v2, %v22939_v51  ;;  %17697 = vmatprep.mubr.f32.mxu1 %v11297_v22  ;;  %v11316_v53 = vsub.f32 %v11314_v14, %v11315_v20 }
 0xd07   :  { %v11345_v55 = vand.u32 4294901760, %v11344_v10  ;;  %17698 = vmatmul.mubr.f32.gmra.mrb[50].mxu1 %v11307_v45  ;;  %v11327_v5 = vand.u32 4294901760, %v11326_v52  ;;  %v23646_v45 = vand.u32 4294901760, %v22896_v1 }
 0xd08   :  { %v11335_v0 = vand.u32 4294901760, %v11334_v27  ;;  %v11317_v16 = vand.u32 4294901760, %v11316_v53 }
 0xd09   :  { %v11346_v39 = vsub.f32 %v11344_v10, %v11345_v55 }
 0xd0a   :  { %17700 = vmatprep.mubr.f32.mxu1 %v11317_v16  ;;  %v11336_v30 = vsub.f32 %v11334_v27, %v11335_v0 }
 0xd0b   :  { %17701 = vmatmul.mubr.f32.gmra.mrb[52].mxu1 %v11327_v5  ;;  %v11347_v6 = vand.u32 4294901760, %v11346_v39  ;;  %v23647_v5 = vand.u32 4294901760, %v22893_v34  ;;  %v23648_v39 = vand.u32 4294901760, %v22910_v56 }
 0xd0c   :  { %v11337_v50 = vand.u32 4294901760, %v11336_v30 }
 0xd0e   :  { %17703 = vmatprep.mubr.f32.mxu1 %v11337_v50 }
 0xd0f   :  { %17704 = vmatmul.mubr.f32.gmra.mrb[54].mxu1 %v11347_v6 }
 0xd10   :  { %17710 = vmatprep.mubr.f32.mxu1 %v22890_v3 }
 0xd13   :  { %17711 = vmatmul.mubr.f32.vlgmr.msra.gmra.mrb[48].mxu1 %v22887_v19 }
 0xd14   :  { %17713 = vmatprep.mubr.f32.mxu1 %v22904_v58  ;;  %19105 = vmatpush3.bf16.msra.mxu1 %v22866_v60  ;;  %v12769_v60 = vld [vmem:[%s23376_s19 + $0x10] sm:$0xff] }
 0xd15   :  { %19107 = vmatprep.subr.bf16.mxu1 %v22849_v24 }
 0xd17   :  { %17714 = vmatmul.mubr.f32.gmra.mrb[50].mxu1 %v22900_v63 }
 0xd18   :  { %17716 = vmatprep.mubr.f32.mxu1 %v22924_v21 }
 0xd1b   :  { %17717 = vmatmul.mubr.f32.gmra.mrb[52].mxu1 %v22920_v59 }
 0xd1c   :  { %17719 = vmatprep.mubr.f32.mxu1 %v22939_v51 }
 0xd1f   :  { %17720 = vmatmul.mubr.f32.gmra.mrb[54].mxu1 %v22936_v57 }
 0xd20   :  { %17726 = vmatprep.mubr.f32.mxu1 %v22896_v1 }
 0xd23   :  { %17727 = vmatmul.mubr.f32.vlgmr.msra.gmra.mrb[48].mxu1 %v22893_v34  ;;  %v12771_v34 = vld [vmem:[%s23376_s19 + $0x20] sm:$0xf] }
 0xd24   :  { %17729 = vmatprep.mubr.f32.mxu1 %v22913_v31  ;;  %19109 = vmatpush3.bf16.msra.mxu1 %v22849_v24  ;;  %v12797_v1 = vsel %vm7940_vm3, %v12771_v34, 0 }
 0xd25   :  { %19111 = vmatprep.subr.bf16.mxu1 %v22868_v43 }
 0xd27   :  { %17730 = vmatmul.mubr.f32.gmra.mrb[50].mxu1 %v22910_v56 }
 0xd28   :  { %17732 = vmatprep.mubr.f32.mxu1 %v11314_v14  ;;  %v12768_v14 = vld [vmem:[%s23376_s19 + $0x8] sm:$0xff] }
 0xd29   :  { %v12803_v53 = vand.u32 4294901760, %v12768_v14 }
 0xd2b   :  { %17733 = vmatmul.mubr.f32.gmra.mrb[52].mxu1 %v22927_v41  ;;  %v23011_v41 = vand.u32 4294901760, %v12797_v1  ;;  %v12958_v32 = vsub.f32 %v12768_v14, %v12803_v53 }
 0xd2c   :  { %17735 = vmatprep.mubr.f32.mxu1 %v11334_v27 }
 0xd2d   :  { %v12959_v56 = vand.u32 4294901760, %v12958_v32 }
 0xd2f   :  { %17736 = vmatmul.mubr.f32.gmra.mrb[54].mxu1 %v11344_v10  ;;  %v12960_v22 = vsub.f32 %v12958_v32, %v12959_v56 }
 0xd30   :  { %17742 = vmatprep.mubr.f32.mxu1 %v23646_v45 }
 0xd33   :  { %17743 = vmatmul.mubr.f32.vlgmr.msra.gmra.mrb[48].mxu1 %v23647_v5 }
 0xd34   :  { %17745 = vmatprep.mubr.f32.mxu1 %v11295_v11  ;;  %19113 = vmatpush3.bf16.msra.mxu1 %v22868_v43  ;;  %v12806_v43 = vand.u32 4294901760, %v12769_v60 }
 0xd35   :  { %19115 = vmatprep.subr.bf16.mxu1 %v22849_v24 }
 0xd37   :  { %17746 = vmatmul.mubr.f32.gmra.mrb[50].mxu1 %v23648_v39 }
 0xd38   :  { %17748 = vmatprep.mubr.f32.mxu1 %v11315_v20 }
 0xd3b   :  { %17749 = vmatmul.mubr.f32.gmra.mrb[52].mxu1 %v11325_v48  ;;  %v12767_v48 = vld [vmem:[%s23376_s19] sm:$0xff] }
 0xd3c   :  { %17751 = vmatprep.mubr.f32.mxu1 %v11335_v0 }
 0xd3f   :  { %17752 = vmatmul.mubr.f32.gmra.mrb[54].mxu1 %v11345_v55  ;;  %v12800_v55 = vand.u32 4294901760, %v12767_v48 }
 0xd40   :  { %17758 = vmatprep.mubr.f32.mxu1 %v22890_v3 }
 0xd43   :  { %17759 = vmatmul.mubr.f32.vlgmr.msra.gmra.mrb[48].mxu1 %v22887_v19 }
 0xd44   :  { %17761 = vmatprep.mubr.f32.mxu1 %v22904_v58  ;;  %19117 = vmatpush3.bf16.msra.mxu1 %v22849_v24  ;;  %v22993_v24 = vpack.c.bf16 %v12803_v53, %v12800_v55 }
 0xd46   :  { %19167 = vmatprep.subr.bf16.mxu1 %v22993_v24 }
 0xd47   :  { %17762 = vmatmul.mubr.f32.gmra.mrb[50].mxu1 %v22900_v63 }
 0xd48   :  { %17764 = vmatprep.mubr.f32.mxu1 %v22924_v21 }
 0xd4b   :  { %17765 = vmatmul.mubr.f32.gmra.mrb[52].mxu1 %v22920_v59 }
 0xd4c   :  { %17767 = vmatprep.mubr.f32.mxu1 %v22939_v51 }
 0xd4f   :  { %17768 = vmatmul.mubr.f32.gmra.mrb[54].mxu1 %v22936_v57 }
 0xd50   :  { %17774 = vmatprep.mubr.f32.mxu1 %v22890_v3 }
 0xd53   :  { %17775 = vmatmul.mubr.f32.vlgmr.msra.gmra.mrb[48].mxu1 %v22887_v19 }
 0xd54   :  { %17777 = vmatprep.mubr.f32.mxu1 %v22904_v58  ;;  %19169 = vmatpush3.bf16.msra.mxu1 %v22993_v24 }
 0xd57   :  { %17778 = vmatmul.mubr.f32.gmra.mrb[50].mxu1 %v22900_v63  ;;  %v12951_v63 = vsub.f32 %v12767_v48, %v12800_v55 }
 0xd58   :  { %17780 = vmatprep.mubr.f32.mxu1 %v22924_v21 }
 0xd59   :  { %v12952_v58 = vand.u32 4294901760, %v12951_v63  ;;  %v23020_v50 = vpack.c.bf16 %v12958_v32, %v12951_v63 }
 0xd5b   :  { %17781 = vmatmul.mubr.f32.gmra.mrb[52].mxu1 %v22920_v59  ;;  %v12953_v31 = vsub.f32 %v12951_v63, %v12952_v58  ;;  %v12965_v59 = vsub.f32 %v12769_v60, %v12806_v43  ;;  %v23024_v45 = vpack.c.bf16 %v12959_v56, %v12952_v58 }
 0xd5c   :  { %17783 = vmatprep.mubr.f32.mxu1 %v22939_v51  ;;  %v12770_v51 = vld [vmem:[%s23376_s19 + $0x18] sm:$0xff] }
 0xd5d   :  { %v12809_v19 = vand.u32 4294901760, %v12770_v51  ;;  %v12954_v21 = vand.u32 4294901760, %v12953_v31  ;;  %v12966_v2 = vand.u32 4294901760, %v12965_v59 }
 0xd5f   :  { %17784 = vmatmul.mubr.f32.gmra.mrb[54].mxu1 %v22936_v57  ;;  %v23003_v3 = vpack.c.bf16 %v12809_v19, %v12806_v43  ;;  %v12972_v11 = vsub.f32 %v12770_v51, %v12809_v19  ;;  %v12961_v57 = vand.u32 4294901760, %v12960_v22  ;;  %v12967_v52 = vsub.f32 %v12965_v59, %v12966_v2 }
 0xd60   :  { %v23035_v19 = vsub.f32 %v12797_v1, %v23011_v41 }
 0xd61   :  { %19171 = vmatprep.subr.bf16.mxu1 %v23003_v3  ;;  %v12973_v20 = vand.u32 4294901760, %v12972_v11  ;;  %v23015_v10 = vpack.c.bf16 %v12961_v57, %v12954_v21  ;;  %v12968_v0 = vand.u32 4294901760, %v12967_v52  ;;  %v23022_v6 = vpack.c.bf16 %v12972_v11, %v12965_v59 }
 0xd62   :  { %19173 = vmatpush3.bf16.msra.mxu1 %v23003_v3 }
 0xd63   :  { %17914 = vmatprep.subr.mxu1 %v23011_v41  ;;  %v12974_v27 = vsub.f32 %v12972_v11, %v12973_v20  ;;  %v23026_v5 = vpack.c.bf16 %v12973_v20, %v12966_v2 }
 0xd65   :  { %v12975_v16 = vand.u32 4294901760, %v12974_v27 }
 0xd66   :  { %17915 = vmatpush3.msra.mxu1 %v23011_v41 }
 0xd67   :  { %19175 = vmatprep.subr.bf16.mxu1 %v23015_v10  ;;  %v23018_v30 = vpack.c.bf16 %v12975_v16, %v12968_v0 }
 0xe26   :  { %v17776_v39 = vpop.f32.mrb[48].mxu1 }
 0xe27   :  { %v12760_v48 = vmul.f32 %v22870_v7, %v17776_v39  ;;  %v11920_v14 = vpop.f32.mrb[49].mxu1 }
 0xe28   :  { %v12759_v55 = vmul.f32 %v22872_v23, %v11920_v14 }
 0xe29   :  { %v12776_v53 = vsel %vm7915_vm4, %v12760_v48, 0 }
 0xe2a   :  { %v23031_v60 = vand.u32 4294901760, %v12776_v53  ;;  %v12773_v51 = vsel %vm7915_vm4, %v12759_v55, 0  ;;  %v17779_v43 = vpop.f32.mrb[50].mxu1 }
 0xe2b   :  { %v23037_v34 = vand.u32 4294901760, %v12773_v51  ;;  %v12762_v63 = vmul.f32 %v22874_v18, %v17779_v43  ;;  %v11932_v32 = vpop.f32.mrb[51].mxu1  ;;  %v23053_v18 = vand.u32 4294901760, %v23035_v19 }
 0xe2c   :  { %v23041_v7 = vsub.f32 %v12776_v53, %v23031_v60  ;;  %v12761_v23 = vmul.f32 %v22876_v15, %v11932_v32 }
 0xe2d   :  { %v23045_v58 = vsub.f32 %v12773_v51, %v23037_v34  ;;  %v12782_v56 = vsel %vm7915_vm4, %v12762_v63, 0  ;;  %v12981_v55 = vsub.f32 %v23035_v19, %v23053_v18 }
 0xe2e   :  { %v12881_v31 = vand.u32 4294901760, %v23041_v7  ;;  %v23049_v22 = vand.u32 4294901760, %v12782_v56  ;;  %v12779_v1 = vsel %vm7915_vm4, %v12761_v23, 0  ;;  %v17782_v59 = vpop.f32.mrb[52].mxu1 }
 0xe2f   :  { %v23055_v11 = vand.u32 4294901760, %v12779_v1  ;;  %v12764_v21 = vmul.f32 %v22878_v49, %v17782_v59  ;;  %v11944_v15 = vpop.f32.mrb[53].mxu1  ;;  %v12871_v57 = vand.u32 4294901760, %v23045_v58 }
 0xe30   :  { %v12882_v2 = vsub.f32 %v23041_v7, %v12881_v31  ;;  %v23063_v20 = vsub.f32 %v12782_v56, %v23049_v22  ;;  %v12763_v52 = vmul.f32 %v22880_v29, %v11944_v15 }
 0xe31   :  { %v23067_v27 = vsub.f32 %v12779_v1, %v23055_v11  ;;  %v12788_v0 = vsel %vm7915_vm4, %v12764_v21, 0  ;;  %v12872_v49 = vsub.f32 %v23045_v58, %v12871_v57 }
 0xe32   :  { %v23073_v16 = vand.u32 4294901760, %v12788_v0  ;;  %v12785_v39 = vsel %vm7915_vm4, %v12763_v52, 0  ;;  %v17785_v48 = vpop.f32.mrb[54].mxu1  ;;  %v23491_v14 = vand.u32 4294901760, %v23063_v20  ;;  %v12883_v32 = vand.u32 4294901760, %v12882_v2 }
 0xe33   :  { %v23079_v29 = vand.u32 4294901760, %v12785_v39  ;;  %v12766_v53 = vmul.f32 %v22882_v25, %v17785_v48  ;;  %v11956_v51 = vpop.f32.mrb[55].mxu1  ;;  %v12873_v43 = vand.u32 4294901760, %v12872_v49  ;;  %v12891_v63 = vand.u32 4294901760, %v23067_v27 }
 0xe34   :  { %v23084_v23 = vsub.f32 %v12788_v0, %v23073_v16  ;;  %v12765_v56 = vmul.f32 %v22884_v37, %v11956_v51  ;;  %v12902_v1 = vsub.f32 %v23063_v20, %v23491_v14  ;;  %v12982_v51 = vand.u32 4294901760, %v12981_v55 }
 0xe35   :  { %v23091_v59 = vsub.f32 %v12785_v39, %v23079_v29  ;;  %v12794_v21 = vsel %vm7915_vm4, %v12766_v53, 0  ;;  %17916 = vmatprep.mubr.f32.mxu1 %v12873_v43  ;;  %v12892_v25 = vsub.f32 %v23067_v27, %v12891_v63 }
 0xe36   :  { %v23097_v15 = vand.u32 4294901760, %v12794_v21  ;;  %v12791_v2 = vsel %vm7915_vm4, %v12765_v56, 0  ;;  %17917 = vmatmul.mubr.f32.vlgmr.msra.gmra.mrb[56].mxu1 %v12883_v32  ;;  %v12921_v37 = vand.u32 4294901760, %v23084_v23  ;;  %v12903_v48 = vand.u32 4294901760, %v12902_v1 }
 0xe37   :  { %v23101_v52 = vand.u32 4294901760, %v12791_v2  ;;  %19177 = vmatpush3.bf16.msra.mxu1 %v23015_v10  ;;  %v12893_v0 = vand.u32 4294901760, %v12892_v25  ;;  %v12911_v49 = vand.u32 4294901760, %v23091_v59 }
 0xe38   :  { %v23106_v39 = vsub.f32 %v12794_v21, %v23097_v15  ;;  %19179 = vmatprep.subr.bf16.mxu1 %v23018_v30  ;;  %v12922_v53 = vsub.f32 %v23084_v23, %v12921_v37 }
 0xe39   :  { %v12930_v43 = vsub.f32 %v12791_v2, %v23101_v52  ;;  %17919 = vmatprep.mubr.f32.mxu1 %v12893_v0  ;;  %v12912_v32 = vsub.f32 %v23091_v59, %v12911_v49 }
 0xe3a   :  { %17920 = vmatmul.mubr.f32.gmra.mrb[58].mxu1 %v12903_v48  ;;  %v12941_v10 = vand.u32 4294901760, %v23106_v39  ;;  %v12923_v1 = vand.u32 4294901760, %v12922_v53 }
 0xe3b   :  { %v12913_v56 = vand.u32 4294901760, %v12912_v32  ;;  %19181 = vmatpush3.bf16.msra.mxu1 %v23018_v30  ;;  %v12931_v21 = vand.u32 4294901760, %v12930_v43  ;;  %v23649_v30 = vand.u32 4294901760, %v23063_v20 }
 0xe3c   :  { %17936 = vmatprep.subr.mxu1 %v12982_v51  ;;  %v12942_v25 = vsub.f32 %v23106_v39, %v12941_v10 }
 0xe3d   :  { %17922 = vmatprep.mubr.f32.mxu1 %v12913_v56  ;;  %v12932_v14 = vsub.f32 %v12930_v43, %v12931_v21 }
 0xe3e   :  { %17923 = vmatmul.mubr.f32.gmra.mrb[60].mxu1 %v12923_v1  ;;  %v12943_v2 = vand.u32 4294901760, %v12942_v25 }
 0xe3f   :  { %v12933_v55 = vand.u32 4294901760, %v12932_v14  ;;  %17937 = vmatpush3.msra.mxu1 %v12982_v51  ;;  %v13603_v14 = vld [vmem:[%s23377_s17 + $0x28] sm:$0xff] }
 0xe40   :  { %19183 = vmatprep.subr.bf16.mxu1 %v23020_v50 }
 0xe41   :  { %17925 = vmatprep.mubr.f32.mxu1 %v12933_v55 }
 0xe42   :  { %17926 = vmatmul.mubr.f32.gmra.mrb[62].mxu1 %v12943_v2  ;;  %v23650_v2 = vld [vmem:[#allocation9_spill] sm:$0xff] }
 0xe43   :  { %17938 = vmatprep.mubr.f32.mxu1 %v23037_v34 }
 0xe46   :  { %17939 = vmatmul.mubr.f32.vlgmr.msra.gmra.mrb[56].mxu1 %v23031_v60 }
 0xe47   :  { %17941 = vmatprep.mubr.f32.mxu1 %v23055_v11  ;;  %19185 = vmatpush3.bf16.msra.mxu1 %v23020_v50  ;;  %v13598_v50 = vld [vmem:[%s23377_s17] sm:$0xff] }
 0xe48   :  { %19187 = vmatprep.subr.bf16.mxu1 %v23022_v6 }
 0xe4a   :  { %17942 = vmatmul.mubr.f32.gmra.mrb[58].mxu1 %v23049_v22 }
 0xe4b   :  { %17944 = vmatprep.mubr.f32.mxu1 %v23079_v29  ;;  %19189 = vmatpush3.bf16.msra.mxu1 %v23022_v6  ;;  %v13599_v6 = vld [vmem:[%s23377_s17 + $0x8] sm:$0xff] }
 0xe4c   :  { %17958 = vmatprep.subr.mxu1 %v23035_v19 }
 0xe4e   :  { %17945 = vmatmul.mubr.f32.gmra.mrb[60].mxu1 %v23073_v16 }
 0xe4f   :  { %17947 = vmatprep.mubr.f32.mxu1 %v23101_v52  ;;  %17959 = vmatpush3.msra.mxu1 %v23035_v19 }
 0xe50   :  { %19191 = vmatprep.subr.bf16.mxu1 %v22993_v24 }
 0xe52   :  { %17948 = vmatmul.mubr.f32.gmra.mrb[62].mxu1 %v23097_v15 }
 0xe53   :  { %17960 = vmatprep.mubr.f32.mxu1 %v23045_v58 }
 0xe56   :  { %17961 = vmatmul.mubr.f32.vlgmr.msra.gmra.mrb[56].mxu1 %v23041_v7 }
 0xe57   :  { %17963 = vmatprep.mubr.f32.mxu1 %v23067_v27  ;;  %19193 = vmatpush3.bf16.msra.mxu1 %v22993_v24  ;;  %v13602_v27 = vld [vmem:[%s23377_s17 + $0x20] sm:$0xff] }
 0xe58   :  { %19195 = vmatprep.subr.bf16.mxu1 %v23003_v3 }
 0xe5a   :  { %17964 = vmatmul.mubr.f32.gmra.mrb[58].mxu1 %v23063_v20 }
 0xe5b   :  { %17966 = vmatprep.mubr.f32.mxu1 %v23091_v59  ;;  %19197 = vmatpush3.bf16.msra.mxu1 %v23003_v3 }
 0xe5c   :  { %17980 = vmatprep.subr.mxu1 %v23011_v41 }
 0xe5e   :  { %17967 = vmatmul.mubr.f32.gmra.mrb[60].mxu1 %v23084_v23 }
 0xe5f   :  { %17969 = vmatprep.mubr.f32.mxu1 %v12930_v43  ;;  %17981 = vmatpush3.msra.mxu1 %v23011_v41 }
 0xe60   :  { %19199 = vmatprep.subr.bf16.mxu1 %v23024_v45 }
 0xe62   :  { %17970 = vmatmul.mubr.f32.gmra.mrb[62].mxu1 %v23106_v39 }
 0xe63   :  { %17982 = vmatprep.mubr.f32.mxu1 %v12871_v57 }
 0xe66   :  { %17983 = vmatmul.mubr.f32.vlgmr.msra.gmra.mrb[56].mxu1 %v12881_v31  ;;  %v13601_v31 = vld [vmem:[%s23377_s17 + $0x18] sm:$0xff] }
 0xe67   :  { %17985 = vmatprep.mubr.f32.mxu1 %v12891_v63  ;;  %19201 = vmatpush3.bf16.msra.mxu1 %v23024_v45  ;;  %v13605_v45 = vand.u32 4294901760, %v13598_v50  ;;  %v13614_v20 = vand.u32 4294901760, %v13601_v31  ;;  %v13620_v63 = vand.u32 4294901760, %v13603_v14 }
 0xe68   :  { %19203 = vmatprep.subr.bf16.mxu1 %v23026_v5 }
 0xe69   :  { %v23175_v19 = vsub.f32 %v13598_v50, %v13605_v45  ;;  %v23224_v32 = vsub.f32 %v13603_v14, %v13620_v63 }
 0xe6a   :  { %17986 = vmatmul.mubr.f32.gmra.mrb[58].mxu1 %v23649_v30  ;;  %v23651_v30 = vld [vmem:[#allocation17_spill] sm:$0xff] }
 0xe6b   :  { %17988 = vmatprep.mubr.f32.mxu1 %v12911_v49  ;;  %19205 = vmatpush3.bf16.msra.mxu1 %v23026_v5  ;;  %v13608_v5 = vand.u32 4294901760, %v13599_v6  ;;  %v23212_v49 = vsub.f32 %v13601_v31, %v13614_v20 }
 0xe6c   :  { %18002 = vmatprep.subr.mxu1 %v23053_v18 }
 0xe6d   :  { %v23177_v7 = vsub.f32 %v13599_v6, %v13608_v5  ;;  %v23180_v58 = vpack.c.bf16 %v13608_v5, %v13605_v45  ;;  %v13779_v51 = vand.u32 4294901760, %v23212_v49  ;;  %v23659_v6 = vld [vmem:[#allocation11_spill] sm:$0xff]  ;;  %v23660_v45 = vld [vmem:[#allocation10_spill] sm:$0xff]  ;;  %v23661_v5 = vld [vmem:[#allocation8_spill] sm:$0xff] }
 0xe6e   :  { %17989 = vmatmul.mubr.f32.gmra.mrb[60].mxu1 %v12921_v37 }
 0xe6f   :  { %17991 = vmatprep.mubr.f32.mxu1 %v12931_v21  ;;  %18003 = vmatpush3.msra.mxu1 %v23053_v18  ;;  %v13765_v18 = vand.u32 4294901760, %v23177_v7  ;;  %v13793_v21 = vand.u32 4294901760, %v23224_v32 }
 0xe70   :  { %19207 = vmatprep.subr.bf16.mxu1 %v22993_v24 }
 0xe71   :  { %v13766_v59 = vsub.f32 %v23177_v7, %v13765_v18  ;;  %v13794_v25 = vsub.f32 %v23224_v32, %v13793_v21 }
 0xe72   :  { %17992 = vmatmul.mubr.f32.gmra.mrb[62].mxu1 %v12941_v10  ;;  %v13780_v10 = vsub.f32 %v23212_v49, %v13779_v51 }
 0xe73   :  { %18004 = vmatprep.mubr.f32.mxu1 %v23037_v34  ;;  %v13767_v48 = vand.u32 4294901760, %v13766_v59 }
 0xe76   :  { %18005 = vmatmul.mubr.f32.vlgmr.msra.gmra.mrb[56].mxu1 %v23031_v60 }
 0xe77   :  { %18007 = vmatprep.mubr.f32.mxu1 %v23055_v11  ;;  %19209 = vmatpush3.bf16.msra.mxu1 %v22993_v24  ;;  %v13600_v24 = vld [vmem:[%s23377_s17 + $0x10] sm:$0xff] }
 0xe78   :  { %19211 = vmatprep.subr.bf16.mxu1 %v23003_v3  ;;  %v13611_v57 = vand.u32 4294901760, %v13600_v24 }
 0xe7a   :  { %18008 = vmatmul.mubr.f32.gmra.mrb[58].mxu1 %v23049_v22  ;;  %v23208_v37 = vpack.c.bf16 %v13614_v20, %v13611_v57  ;;  %v23210_v0 = vsub.f32 %v13600_v24, %v13611_v57 }
 0xe7b   :  { %18010 = vmatprep.mubr.f32.mxu1 %v23079_v29  ;;  %19213 = vmatpush3.bf16.msra.mxu1 %v23003_v3  ;;  %v13758_v3 = vand.u32 4294901760, %v23175_v19 }
 0xe7c   :  { %18024 = vmatprep.subr.mxu1 %v23011_v41  ;;  %v13772_v53 = vand.u32 4294901760, %v23210_v0 }
 0xe7d   :  { %v13759_v23 = vsub.f32 %v23175_v19, %v13758_v3 }
 0xe7e   :  { %18011 = vmatmul.mubr.f32.gmra.mrb[60].mxu1 %v23073_v16 }
 0xe7f   :  { %18013 = vmatprep.mubr.f32.mxu1 %v23101_v52  ;;  %18025 = vmatpush3.msra.mxu1 %v23011_v41  ;;  %v13617_v41 = vand.u32 4294901760, %v13602_v27  ;;  %v13760_v39 = vand.u32 4294901760, %v13759_v23 }
 0xe80   :  { %19215 = vmatprep.subr.bf16.mxu1 %v23180_v58 }
 0xe81   :  { %v23222_v43 = vsub.f32 %v13602_v27, %v13617_v41 }
 0xe82   :  { %18014 = vmatmul.mubr.f32.gmra.mrb[62].mxu1 %v23097_v15 }
 0xe83   :  { %18026 = vmatprep.mubr.f32.mxu1 %v23037_v34  ;;  %v23217_v34 = vpack.c.bf16 %v13620_v63, %v13617_v41  ;;  %v13786_v56 = vand.u32 4294901760, %v23222_v43 }
 0xe85   :  { %v13787_v1 = vsub.f32 %v23222_v43, %v13786_v56 }
 0xe86   :  { %18027 = vmatmul.mubr.f32.vlgmr.msra.gmra.mrb[56].mxu1 %v23031_v60  ;;  %v19226_v60 = vpack.c.bf16 %v13767_v48, %v13760_v39 }
 0xe87   :  { %18029 = vmatprep.mubr.f32.mxu1 %v23055_v11  ;;  %19217 = vmatpush3.bf16.msra.mxu1 %v23180_v58  ;;  %v13773_v11 = vsub.f32 %v23210_v0, %v13772_v53  ;;  %v13788_v55 = vand.u32 4294901760, %v13787_v1 }
 0xe88   :  { %19219 = vmatprep.subr.bf16.mxu1 %v23208_v37 }
 0xe8a   :  { %18030 = vmatmul.mubr.f32.gmra.mrb[58].mxu1 %v23049_v22  ;;  %v13774_v22 = vand.u32 4294901760, %v13773_v11 }
 0xe8b   :  { %18032 = vmatprep.mubr.f32.mxu1 %v23079_v29  ;;  %19221 = vmatpush3.bf16.msra.mxu1 %v23208_v37  ;;  %v13781_v29 = vand.u32 4294901760, %v13780_v10 }
 0xe8c   :  { %19223 = vmatprep.subr.bf16.mxu1 %v23217_v34 }
 0xe8e   :  { %18033 = vmatmul.mubr.f32.gmra.mrb[60].mxu1 %v23073_v16  ;;  %v19230_v16 = vpack.c.bf16 %v13781_v29, %v13774_v22 }
 0xe8f   :  { %18035 = vmatprep.mubr.f32.mxu1 %v23101_v52  ;;  %19225 = vmatpush3.bf16.msra.mxu1 %v23217_v34  ;;  %v13795_v52 = vand.u32 4294901760, %v13794_v25 }
 0xe90   :  { %19227 = vmatprep.subr.bf16.mxu1 %v19226_v60 }
 0xe91   :  { %v19234_v50 = vpack.c.bf16 %v13795_v52, %v13788_v55 }
 0xe92   :  { %18036 = vmatmul.mubr.f32.gmra.mrb[62].mxu1 %v23097_v15  ;;  %v19238_v15 = vpack.c.bf16 %v23177_v7, %v23175_v19 }
 0xe93   :  { %18050 = vmatprep.mubr.f32.mxu1 %v22664_v4  ;;  %v19242_v4 = vpack.c.bf16 %v23212_v49, %v23210_v0 }
 0xe96   :  { %18051 = vmatmul.mubr.f32.vlgmr.msra.gmra.mrb[56].mxu1 %v23650_v2 }
 0xe97   :  { %18053 = vmatprep.mubr.f32.mxu1 %v23651_v30  ;;  %19229 = vmatpush3.bf16.msra.mxu1 %v19226_v60 }
 0xe98   :  { %19231 = vmatprep.subr.bf16.mxu1 %v19230_v16 }
 0xe9a   :  { %18054 = vmatmul.mubr.f32.gmra.mrb[58].mxu1 %v22704_v40  ;;  %v19246_v40 = vpack.c.bf16 %v23224_v32, %v23222_v43 }
 0xe9b   :  { %18056 = vmatprep.mubr.f32.mxu1 %v22721_v13  ;;  %19233 = vmatpush3.bf16.msra.mxu1 %v19230_v16  ;;  %v23655_v13 = vld [vmem:[#allocation24_spill] sm:$0xff] }
 0xe9c   :  { %19235 = vmatprep.subr.bf16.mxu1 %v19234_v50 }
 0xe9e   :  { %18057 = vmatmul.mubr.f32.gmra.mrb[60].mxu1 %v22727_v44  ;;  %v23656_v44 = vld [vmem:[#allocation6_spill] sm:$0xff] }
 0xe9f   :  { %18059 = vmatprep.mubr.f32.mxu1 %v22738_v46  ;;  %19237 = vmatpush3.bf16.msra.mxu1 %v19234_v50  ;;  %v23657_v46 = vld [vmem:[#allocation4_spill] sm:$0xff] }
 0xea0   :  { %19239 = vmatprep.subr.bf16.mxu1 %v19238_v15 }
 0xea2   :  { %18060 = vmatmul.mubr.f32.gmra.mrb[62].mxu1 %v22741_v62  ;;  %v23658_v62 = vld [vmem:[#allocation18_spill] sm:$0xff] }
 0xea3   :  { %18074 = vmatprep.mubr.f32.mxu1 %v22615_v12 }
 0xea6   :  { %18075 = vmatmul.mubr.f32.vlgmr.msra.gmra.mrb[56].mxu1 %v22612_v47 }
 0xea7   :  { %18077 = vmatprep.mubr.f32.mxu1 %v22636_v28  ;;  %19241 = vmatpush3.bf16.msra.mxu1 %v19238_v15 }
 0xea8   :  { %19243 = vmatprep.subr.bf16.mxu1 %v19242_v4 }
 0xeaa   :  { %18078 = vmatmul.mubr.f32.gmra.mrb[58].mxu1 %v22631_v42 }
 0xeab   :  { %18080 = vmatprep.mubr.f32.mxu1 %v22662_v17  ;;  %19245 = vmatpush3.bf16.msra.mxu1 %v19242_v4 }
 0xeac   :  { %19247 = vmatprep.subr.bf16.mxu1 %v19246_v40 }
 0xeae   :  { %18081 = vmatmul.mubr.f32.gmra.mrb[60].mxu1 %v22656_v9 }
 0xeaf   :  { %18083 = vmatprep.mubr.f32.mxu1 %v22692_v61  ;;  %19249 = vmatpush3.bf16.msra.mxu1 %v19246_v40 }
 0xeb0   :  { %19251 = vmatprep.subr.bf16.mxu1 %v23180_v58 }
 0xeb2   :  { %18084 = vmatmul.mubr.f32.gmra.mrb[62].mxu1 %v22685_v26 }
 0xeb3   :  { %18098 = vmatprep.mubr.f32.mxu1 %v22624_v8  ;;  %v19262_v8 = vpack.c.bf16 %v13765_v18, %v13758_v3 }
 0xeb6   :  { %18099 = vmatmul.mubr.f32.vlgmr.msra.gmra.mrb[56].mxu1 %v22618_v54  ;;  %v23653_v54 = vld [vmem:[#allocation27_spill] sm:$0xff] }
 0xeb7   :  { %18101 = vmatprep.mubr.f32.mxu1 %v22649_v36  ;;  %19253 = vmatpush3.bf16.msra.mxu1 %v23180_v58  ;;  %v23652_v36 = vld [vmem:[#allocation29_spill] sm:$0xff] }
 0xeb8   :  { %19255 = vmatprep.subr.bf16.mxu1 %v23208_v37 }
 0xeba   :  { %18102 = vmatmul.mubr.f32.gmra.mrb[58].mxu1 %v22644_v35  ;;  %v23654_v35 = vld [vmem:[#allocation25_spill] sm:$0xff] }
 0xebb   :  { %18104 = vmatprep.mubr.f32.mxu1 %v22678_v38  ;;  %19257 = vmatpush3.bf16.msra.mxu1 %v23208_v37  ;;  %v19266_v38 = vpack.c.bf16 %v13779_v51, %v13772_v53 }
 0xebc   :  { %19259 = vmatprep.subr.bf16.mxu1 %v23217_v34 }
 0xebe   :  { %18105 = vmatmul.mubr.f32.gmra.mrb[60].mxu1 %v22670_v33  ;;  %v19270_v33 = vpack.c.bf16 %v13793_v21, %v13786_v56 }
 0xebf   :  { %18107 = vmatprep.mubr.f32.mxu1 %v23652_v36  ;;  %19261 = vmatpush3.bf16.msra.mxu1 %v23217_v34 }
 0xec0   :  { %19263 = vmatprep.subr.bf16.mxu1 %v19262_v8 }
 0xec2   :  { %18108 = vmatmul.mubr.f32.gmra.mrb[62].mxu1 %v23653_v54 }
 0xec3   :  { %18122 = vmatprep.mubr.f32.mxu1 %v23654_v35 }
 0xec6   :  { %18123 = vmatmul.mubr.f32.vlgmr.msra.gmra.mrb[56].mxu1 %v23655_v13 }
 0xec7   :  { %18125 = vmatprep.mubr.f32.mxu1 %v23656_v44  ;;  %19265 = vmatpush3.bf16.msra.mxu1 %v19262_v8 }
 0xec8   :  { %19267 = vmatprep.subr.bf16.mxu1 %v19266_v38 }
 0xeca   :  { %18126 = vmatmul.mubr.f32.gmra.mrb[58].mxu1 %v23657_v46 }
 0xecb   :  { %18128 = vmatprep.mubr.f32.mxu1 %v23658_v62  ;;  %19269 = vmatpush3.bf16.msra.mxu1 %v19266_v38 }
 0xecc   :  { %19271 = vmatprep.subr.bf16.mxu1 %v19270_v33 }
 0xece   :  { %18129 = vmatmul.mubr.f32.gmra.mrb[60].mxu1 %v23659_v6 }
 0xecf   :  { %18131 = vmatprep.mubr.f32.mxu1 %v23660_v45  ;;  %19273 = vmatpush3.bf16.msra.mxu1 %v19270_v33 }
 0xed0   :  { %19275 = vmatprep.subr.bf16.mxu1 %v23180_v58 }
 0xed2   :  { %18132 = vmatmul.mubr.f32.gmra.mrb[62].mxu1 %v23661_v5 }
 0xed3   :  { %18146 = vmatprep.mubr.f32.mxu1 %v22615_v12 }
 0xed6   :  { %18147 = vmatmul.mubr.f32.vlgmr.msra.gmra.mrb[56].mxu1 %v22612_v47 }
 0xed7   :  { %18149 = vmatprep.mubr.f32.mxu1 %v22636_v28  ;;  %19277 = vmatpush3.bf16.msra.mxu1 %v23180_v58 }
 0xed8   :  { %19279 = vmatprep.subr.bf16.mxu1 %v23208_v37 }
 0xeda   :  { %18150 = vmatmul.mubr.f32.gmra.mrb[58].mxu1 %v22631_v42 }
 0xedb   :  { %18152 = vmatprep.mubr.f32.mxu1 %v22662_v17  ;;  %19281 = vmatpush3.bf16.msra.mxu1 %v23208_v37 }
 0xedc   :  { %19283 = vmatprep.subr.bf16.mxu1 %v23217_v34 }
 0xede   :  { %18153 = vmatmul.mubr.f32.gmra.mrb[60].mxu1 %v22656_v9 }
 0xedf   :  { %18155 = vmatprep.mubr.f32.mxu1 %v22692_v61  ;;  %19285 = vmatpush3.bf16.msra.mxu1 %v23217_v34 }
 0xee2   :  { %18156 = vmatmul.mubr.f32.gmra.mrb[62].mxu1 %v22685_v26 }
 0xee3   :  { %18170 = vmatprep.mubr.f32.mxu1 %v22615_v12 }
 0xee6   :  { %18171 = vmatmul.mubr.f32.vlgmr.msra.gmra.mrb[56].mxu1 %v22612_v47 }
 0xee7   :  { %18173 = vmatprep.mubr.f32.mxu1 %v22636_v28 }
 0xeea   :  { %18174 = vmatmul.mubr.f32.gmra.mrb[58].mxu1 %v22631_v42 }
 0xeeb   :  { %18176 = vmatprep.mubr.f32.mxu1 %v22662_v17 }
 0xeee   :  { %18177 = vmatmul.mubr.f32.gmra.mrb[60].mxu1 %v22656_v9 }
 0xeef   :  { %18179 = vmatprep.mubr.f32.mxu1 %v22692_v61 }
 0xef2   :  { %18180 = vmatmul.mubr.f32.gmra.mrb[62].mxu1 %v22685_v26 }
 0xfb9   :  { %v18172_v19 = vpop.f32.mrb[56].mxu1 }
 0xfba   :  { %14418 = vst.msk [vmem:[%s23378_s20 + $0x8] sm:$0xff] %vm14416_vm7, %v18172_v19  ;;  %v14370_v12 = vpop.f32.mrb[57].mxu1 }
 0xfbb   :  { %14417 = vst.msk [vmem:[%s23378_s20] sm:$0xff] %vm14416_vm7, %v14370_v12 }
 0xfbd   :  { %v18175_v47 = vpop.f32.mrb[58].mxu1 }
 0xfbe   :  { %14420 = vst.msk [vmem:[%s23378_s20 + $0x18] sm:$0xff] %vm14416_vm7, %v18175_v47  ;;  %v14382_v42 = vpop.f32.mrb[59].mxu1 }
 0xfbf   :  { %14419 = vst.msk [vmem:[%s23378_s20 + $0x10] sm:$0xff] %vm14416_vm7, %v14382_v42 }
 0xfc1   :  { %v18178_v28 = vpop.f32.mrb[60].mxu1 }
 0xfc2   :  { %14422 = vst.msk [vmem:[%s23378_s20 + $0x28] sm:$0xff] %vm14416_vm7, %v18178_v28  ;;  %v14394_v9 = vpop.f32.mrb[61].mxu1 }
 0xfc3   :  { %14421 = vst.msk [vmem:[%s23378_s20 + $0x20] sm:$0xff] %vm14416_vm7, %v14394_v9 }
 0xfc5   :  { %v18181_v17 = vpop.f32.mrb[62].mxu1 }
 0xfc6   :  { %14424 = vst.msk [vmem:[%s23378_s20 + $0x38] sm:$0xff] %vm14416_vm7, %v18181_v17  ;;  %v14406_v26 = vpop.f32.mrb[63].mxu1 }
 0xfc7   :  { %14423 = vst.msk [vmem:[%s23378_s20 + $0x30] sm:$0xff] %vm14416_vm7, %v14406_v26 }

</bundles_post_ra>
